<compile_context>
chip_gen: v6e
topology: v6e:2x2x1
jax: 0.10.0
libtpu: 0.0.40
codegen_flags: <defaults>
</compile_context>

<pallas_src>
import numpy as np
import jax
import jax.numpy as jnp
from jax.experimental import pallas as pl
from jax.experimental.pallas import tpu as pltpu

NUM_CLASSES = 16
_NEG = jnp.float32(-1e30)   # bias for padded class lanes (excluded from max/LSE/argmax)
_LANE = 128
_SUB = 8
_MIN_PALLAS_ROWS = 128      # below ~one tile: plain XLA fallback
_MIN_GROUP_K = 256          # group modalities so each MXU dot has K >= 256
_MAX_TB = 512               # batch-tile cap (v6e/v7x; 256 is already enough on v5e)
_VMEM_BUDGET = 24 << 20     # conservative per-kernel VMEM budget (fits v7x 64 MiB)


def _round_up(x, m):
    return (x + m - 1) // m * m


def _group_modalities(dims, min_k):
    """Greedy contiguous grouping so each group's flattened dim >= min_k."""
    groups, cur, cur_k = [], [], 0
    for idx, d in enumerate(dims):
        cur.append(idx)
        cur_k += d
        if cur_k >= min_k:
            groups.append(cur)
            cur, cur_k = [], 0
    if cur:
        if groups:
            groups[-1].extend(cur)
        else:
            groups.append(cur)
    return groups


def _make_train_kernel(n_grp, tb, cpad, batch_valid):
    def kernel(*refs):
        x_refs = refs[:n_grp]
        w_refs = refs[n_grp:2 * n_grp]
        b_ref = refs[2 * n_grp]
        labels_ref = refs[2 * n_grp + 1]
        logits_ref, stats_ref = refs[2 * n_grp + 2:]

        # ---- base-model head: logits = sum_g x_g @ W_g + b (bf16 MXU, f32 acc) ----
        acc = jnp.dot(x_refs[0][...], w_refs[0][...],
                      preferred_element_type=jnp.float32)
        for g in range(1, n_grp):
            acc = acc + jnp.dot(x_refs[g][...], w_refs[g][...],
                                preferred_element_type=jnp.float32)
        logits = acc + b_ref[...]           # padded class lanes carry -1e30 bias
        logits_ref[...] = logits            # lane-dense [tb, cpad] store

        # ---- F.cross_entropy per row (stable log-softmax), in-kernel gather ----
        m = jnp.max(logits, axis=-1, keepdims=True)
        lse = m + jnp.log(jnp.sum(jnp.exp(logits - m), axis=-1, keepdims=True))
        labels = labels_ref[...]            # [tb, 1] int32
        col = jax.lax.broadcasted_iota(jnp.int32, (tb, cpad), 1)
        picked = jnp.sum(jnp.where(col == labels, logits, 0.0),
                         axis=-1, keepdims=True)
        per_row_loss = lse - picked         # [tb, 1]

        # ---- predictions = argmax(logits); per-row correctness ----
        is_max = logits == m
        pred = jnp.min(jnp.where(is_max, col, cpad), axis=-1, keepdims=True)
        correct = (pred == labels).astype(jnp.float32)

        # ---- mask padded batch rows, reduce to per-block partial sums ----
        row = jax.lax.broadcasted_iota(jnp.int32, (tb, 1), 0)
        global_row = pl.program_id(0) * tb + row
        valid = (global_row < batch_valid).astype(jnp.float32)
        loss_sum = jnp.sum(per_row_loss * valid)
        corr_sum = jnp.sum(correct * valid)

        # single lane-dense (1, 8, 128) stats tile: sublane 0 = loss sum,
        # sublane 1 = correct count (broadcast across lanes), rest zero.
        srow = jax.lax.broadcasted_iota(jnp.int32, (1, _SUB, _LANE), 1)
        stats_ref[...] = jnp.where(srow == 0, loss_sum,
                                   jnp.where(srow == 1, corr_sum, 0.0))
    return kernel


def _make_predict_kernel(n_grp):
    def kernel(*refs):
        x_refs = refs[:n_grp]
        w_refs = refs[n_grp:2 * n_grp]
        b_ref = refs[2 * n_grp]
        logits_ref = refs[2 * n_grp + 1]
        acc = jnp.dot(x_refs[0][...], w_refs[0][...],
                      preferred_element_type=jnp.float32)
        for g in range(1, n_grp):
            acc = acc + jnp.dot(x_refs[g][...], w_refs[g][...],
                                preferred_element_type=jnp.float32)
        logits_ref[...] = acc + b_ref[...]
    return kernel


def _run_pallas(x_groups, w_groups, b_pad, labels_2d, tb, cpad, batch_valid,
                vmem_limit):
    n_grp = len(x_groups)
    b_total = int(x_groups[0].shape[0])
    gdims = [int(x.shape[1]) for x in x_groups]
    d_total = sum(gdims)
    n_blocks = b_total // tb
    x_isz = x_groups[0].dtype.itemsize

    x_specs = [pl.BlockSpec((tb, d), lambda i: (i, 0)) for d in gdims]
    # Constant index_maps keep the head weights / bias resident in VMEM across
    # the whole grid. (pipeline_mode=pl.Buffered(1) would drop the redundant
    # second buffer — negligible at this D, so left at the portable default.)
    w_specs = [pl.BlockSpec((d, cpad), lambda i: (0, 0)) for d in gdims]
    b_spec = pl.BlockSpec((1, cpad), lambda i: (0, 0))
    logits_spec = pl.BlockSpec((tb, cpad), lambda i: (i, 0))

    with_labels = labels_2d is not None
    cost = pl.CostEstimate(
        flops=2 * b_total * d_total * cpad,
        transcendentals=(b_total * cpad if with_labels else 0),
        bytes_accessed=(b_total * d_total * x_isz + d_total * cpad * x_isz
                        + 4 * b_total * cpad + 4 * b_total),
    )
    # Batch axis is "parallel" (megacore-shardable). On v7x, CORE_PARALLEL /
    # pl.core_map could be used to force a 2-TC split; kept portable here.
    cparams = pltpu.CompilerParams(dimension_semantics=("parallel",),
                                   vmem_limit_bytes=int(vmem_limit))

    if with_labels:
        labels_spec = pl.BlockSpec((tb, 1), lambda i: (i, 0))
        stats_spec = pl.BlockSpec((1, _SUB, _LANE), lambda i: (i, 0, 0))
        return pl.pallas_call(
            _make_train_kernel(n_grp, tb, cpad, batch_valid),
            grid=(n_blocks,),
            in_specs=x_specs + w_specs + [b_spec, labels_spec],
            out_specs=[logits_spec, stats_spec],
            out_shape=[
                jax.ShapeDtypeStruct((b_total, cpad), jnp.float32),
                jax.ShapeDtypeStruct((n_blocks, _SUB, _LANE), jnp.float32),
            ],
            compiler_params=cparams,
            cost_estimate=cost,
        )(*x_groups, *w_groups, b_pad, labels_2d)
    else:
        return pl.pallas_call(
            _make_predict_kernel(n_grp),
            grid=(n_blocks,),
            in_specs=x_specs + w_specs + [b_spec],
            out_specs=logits_spec,
            out_shape=jax.ShapeDtypeStruct((b_total, cpad), jnp.float32),
            compiler_params=cparams,
            cost_estimate=cost,
        )(*x_groups, *w_groups, b_pad)


def model_wrapper_forward(inputs, params, labels=None, training_phase="multimodal",
                          matmul_dtype=jnp.bfloat16):
    """JAX equivalent of ModelWrapper.forward.

    inputs: dict of modality arrays (e.g. 'camera' NCHW, 'imu' [B, T, F])
    params: (W, b) of the synthetic base-model classifier head
    labels: optional int labels [B]
    matmul_dtype: dtype used for the MXU dots (bf16 default; f32 accumulation).
    """
    # TODO(synk): the real EgoDriveMultimodalTransformer backbone is not provided;
    # a deterministic linear classifier head stands in for `self.base_model`.
    keys = sorted(inputs.keys())
    parts = [inputs[k].reshape(inputs[k].shape[0], -1).astype(jnp.float32)
             for k in keys]
    w, b = params
    w = jnp.asarray(w, jnp.float32)
    b = jnp.asarray(b, jnp.float32).reshape(-1)

    B = int(parts[0].shape[0])
    dims = [int(p.shape[1]) for p in parts]
    D = sum(dims)
    C = int(w.shape[1])

    # ---- small-batch fallback: one tile of work -> plain fused XLA ops ----
    if B < _MIN_PALLAS_ROWS:
        x = parts[0] if len(parts) == 1 else jnp.concatenate(parts, axis=-1)
        logits = x @ w + b
        out = {"logits": logits}
        if labels is not None:
            lab = labels.astype(jnp.int32)
            lse = jax.nn.logsumexp(logits, axis=-1)
            picked = jnp.take_along_axis(logits, lab[:, None], axis=-1)[:, 0]
            out["loss"] = jnp.mean(lse - picked)
            out["accuracy"] = jnp.mean(
                (jnp.argmax(logits, axis=-1) == lab).astype(jnp.float32))
        return out

    # ---- lane-dense padded class dim (>=128, multiple of 128) ----
    cpad = max(_LANE, _round_up(C, _LANE))
    w_pad = jnp.pad(w, ((0, 0), (0, cpad - C)))
    b_pad = jnp.concatenate(
        [b, jnp.full((cpad - C,), _NEG, jnp.float32)]).reshape(1, cpad)

    # ---- group small modalities so each MXU dot has K >= 256 ----
    offs = np.cumsum([0] + dims)
    groups = _group_modalities(dims, _MIN_GROUP_K)
    x_groups, w_groups = [], []
    for g in groups:
        xg = parts[g[0]] if len(g) == 1 else jnp.concatenate(
            [parts[i] for i in g], axis=-1)
        x_groups.append(xg.astype(matmul_dtype))
        w_groups.append(
            w_pad[int(offs[g[0]]):int(offs[g[-1] + 1]), :].astype(matmul_dtype))

    # ---- batch tiling against an explicit VMEM budget ----
    x_isz = jnp.dtype(matmul_dtype).itemsize

    def vmem_need(t):
        return (2 * t * D * x_isz          # activation blocks (double-buffered)
                + 2 * D * cpad * x_isz     # resident weights
                + 2 * cpad * 4             # bias
                + 2 * t * 4                # labels
                + 2 * t * cpad * 4         # logits out
                + 2 * _SUB * _LANE * 4)    # stats out

    tb = min(_MAX_TB, _round_up(B, _SUB))
    while tb > _SUB and vmem_need(tb) > _VMEM_BUDGET:
        tb = _round_up(tb // 2, _SUB)
    vmem_limit = min(64 << 20, max(vmem_need(tb) + (8 << 20), 32 << 20))

    b_total = _round_up(B, tb)
    if b_total != B:
        x_groups = [jnp.pad(x, ((0, b_total - B), (0, 0))) for x in x_groups]

    if labels is None:
        logits_pad = _run_pallas(x_groups, w_groups, b_pad, None, tb, cpad, B,
                                 vmem_limit)
        return {"logits": logits_pad[:B, :C]}

    # NOTE: labels are assumed to lie in [0, C) (torch's F.cross_entropy would
    # raise for out-of-range labels; this kernel does not validate them).
    lab = labels.astype(jnp.int32)
    labels_pad = jnp.pad(lab, (0, b_total - B)).reshape(b_total, 1)
    logits_pad, stats = _run_pallas(x_groups, w_groups, b_pad, labels_pad, tb,
                                    cpad, B, vmem_limit)
    inv_b = jnp.float32(1.0 / B)
    return {
        "logits": logits_pad[:B, :C],
        "loss": jnp.sum(stats[:, 0, 0]) * inv_b,
        "accuracy": jnp.sum(stats[:, 1, 0]) * inv_b,
    }


if __name__ == "__main__":
    key = jax.random.PRNGKey(0)
    k_cam, k_imu, k_w, k_b, k_lab = jax.random.split(key, 5)

    CH, H, WS, T, F = 4, 16, 16, 8, 16
    D = CH * H * WS + T * F                      # 1152

    Wm = jax.random.normal(k_w, (D, NUM_CLASSES), dtype=jnp.float32) * 0.02
    bv = jax.random.normal(k_b, (NUM_CLASSES,), dtype=jnp.float32) * 0.02

    # ---------------- Pallas path (B >= one tile) ----------------
    B = 256
    camera = jax.random.normal(k_cam, (B, CH, H, WS), dtype=jnp.float32)   # NCHW
    imu = jax.random.normal(k_imu, (B, T, F), dtype=jnp.float32)
    inputs = {"camera": camera, "imu": imu}
    labels = jax.random.randint(k_lab, (B,), 0, NUM_CLASSES, dtype=jnp.int32)

    outputs = model_wrapper_forward(inputs, (Wm, bv), labels=labels,
                                    training_phase="multimodal")
    jax.block_until_ready(outputs)

    pred_only = model_wrapper_forward(inputs, (Wm, bv), labels=None)
    jax.block_until_ready(pred_only)

    # f32 reference (highest precision) — kernel matmul is bf16, so loose tol.
    x_cat = jnp.concatenate([inputs[k].reshape(B, -1) for k in sorted(inputs)],
                            axis=-1)
    logits_f32 = jnp.dot(x_cat, Wm, precision=jax.lax.Precision.HIGHEST) + bv
    assert jnp.allclose(outputs["logits"], logits_f32, atol=3e-2, rtol=3e-2)
    assert jnp.allclose(pred_only["logits"], outputs["logits"], atol=1e-5)

    # loss / accuracy must be consistent with the kernel's own logits.
    klog = outputs["logits"]
    loss_k = jnp.mean(jax.nn.logsumexp(klog, axis=-1)
                      - jnp.take_along_axis(klog, labels[:, None], axis=-1)[:, 0])
    acc_k = jnp.mean((jnp.argmax(klog, axis=-1) == labels).astype(jnp.float32))
    assert jnp.allclose(outputs["loss"], loss_k, atol=1e-3, rtol=1e-3)
    assert jnp.allclose(outputs["accuracy"], acc_k, atol=1e-6)

    loss_f32 = jnp.mean(
        jax.nn.logsumexp(logits_f32, axis=-1)
        - jnp.take_along_axis(logits_f32, labels[:, None], axis=-1)[:, 0])
    assert jnp.allclose(outputs["loss"], loss_f32, atol=3e-2, rtol=3e-2)

    # ---------------- small-batch fallback path (plain XLA) ----------------
    Bs = 8
    small_inputs = {"camera": camera[:Bs], "imu": imu[:Bs]}
    small = model_wrapper_forward(small_inputs, (Wm, bv), labels=labels[:Bs])
    jax.block_until_ready(small)
    xs = jnp.concatenate([small_inputs[k].reshape(Bs, -1)
                          for k in sorted(small_inputs)], axis=-1)
    logits_s = xs @ Wm + bv
    loss_s = jnp.mean(
        jax.nn.logsumexp(logits_s, axis=-1)
        - jnp.take_along_axis(logits_s, labels[:Bs, None], axis=-1)[:, 0])
    acc_s = jnp.mean((jnp.argmax(logits_s, axis=-1) == labels[:Bs])
                     .astype(jnp.float32))
    assert jnp.allclose(small["logits"], logits_s, atol=1e-4, rtol=1e-4)
    assert jnp.allclose(small["loss"], loss_s, atol=1e-4, rtol=1e-4)
    assert jnp.allclose(small["accuracy"], acc_s, atol=1e-6)

    print("KERNEL_OK")
</pallas_src>

<mosaic_0001>
module attributes {stable_mosaic.version = 11 : i64} {
  func.func @kernel(%arg0: i32, %arg1: memref<256x1152xbf16, #tpu.memory_space<vmem>>, %arg2: memref<1152x128xbf16, #tpu.memory_space<vmem>>, %arg3: memref<1x128xf32, #tpu.memory_space<vmem>>, %arg4: memref<256x1xi32, #tpu.memory_space<vmem>>, %arg5: memref<256x128xf32, #tpu.memory_space<vmem>>, %arg6: memref<1x8x128xf32, #tpu.memory_space<vmem>>) attributes {dimension_semantics = [#tpu.dimension_semantics<parallel>], iteration_bounds = array<i64: 1>, scalar_prefetch = 0 : i64, scratch_operands = 0 : i64, tpu.core_type = #tpu.core_type<tc>, window_params = [{transform_indices = @transform_0, window_bounds = array<i64: 256, 1152>}, {pipeline_mode = #tpu.pipeline_mode<synchronous>, transform_indices = @transform_1, window_bounds = array<i64: 1152, 128>}, {pipeline_mode = #tpu.pipeline_mode<synchronous>, transform_indices = @transform_2, window_bounds = array<i64: 1, 128>}, {transform_indices = @transform_3, window_bounds = array<i64: 256, 1>}, {transform_indices = @transform_4, window_bounds = array<i64: 256, 128>}, {transform_indices = @transform_5, window_bounds = array<i64: 1, 8, 128>}]} {
    %c0 = arith.constant 0 : index
    %c0_0 = arith.constant 0 : index
    %0 = vector.load %arg1[%c0, %c0_0] : memref<256x1152xbf16, #tpu.memory_space<vmem>>, vector<256x1152xbf16>
    %c0_1 = arith.constant 0 : index
    %c0_2 = arith.constant 0 : index
    %1 = vector.load %arg2[%c0_1, %c0_2] : memref<1152x128xbf16, #tpu.memory_space<vmem>>, vector<1152x128xbf16>
    %cst = arith.constant dense<0.000000e+00> : vector<256x128xf32>
    %2 = tpu.matmul %0, %1, %cst {dimension_numbers = #tpu.dot_dimension_numbers<[1], [0], [0], [1], [0, 0, 1, 1], [], []>} : vector<256x1152xbf16>, vector<1152x128xbf16>, vector<256x128xf32> -> vector<256x128xf32>
    %c0_3 = arith.constant 0 : index
    %c0_4 = arith.constant 0 : index
    %3 = vector.load %arg3[%c0_3, %c0_4] : memref<1x128xf32, #tpu.memory_space<vmem>>, vector<1x128xf32>
    %4 = vector.broadcast %3 : vector<1x128xf32> to vector<256x128xf32>
    %5 = arith.addf %2, %4 : vector<256x128xf32>
    %c0_5 = arith.constant 0 : index
    %c0_6 = arith.constant 0 : index
    %6 = vector.load %arg5[%c0_5, %c0_6] : memref<256x128xf32, #tpu.memory_space<vmem>>, vector<256x128xf32>
    tpu.vector_store %arg5[%c0_5, %c0_6], %5 {strides = array<i32>} : memref<256x128xf32, #tpu.memory_space<vmem>>, vector<256x128xf32>,
    %cst_7 = arith.constant dense<0xFF800000> : vector<256xf32>
    %7 = vector.multi_reduction <maximumf>, %5, %cst_7 [1] : vector<256x128xf32> to vector<256xf32>
    %8 = vector.shape_cast %7 : vector<256xf32> to vector<256x1xf32>
    %9 = vector.broadcast %8 : vector<256x1xf32> to vector<256x128xf32>
    %10 = arith.subf %5, %9 : vector<256x128xf32>
    %11 = math.exp %10 : vector<256x128xf32>
    %cst_8 = arith.constant dense<0.000000e+00> : vector<256xf32>
    %12 = vector.multi_reduction <add>, %11, %cst_8 [1] : vector<256x128xf32> to vector<256xf32>
    %13 = vector.shape_cast %12 : vector<256xf32> to vector<256x1xf32>
    %14 = math.log %13 : vector<256x1xf32>
    %15 = arith.addf %8, %14 : vector<256x1xf32>
    %c0_9 = arith.constant 0 : index
    %c0_10 = arith.constant 0 : index
    %16 = vector.load %arg4[%c0_9, %c0_10] : memref<256x1xi32, #tpu.memory_space<vmem>>, vector<256x1xi32>
    %17 = tpu.iota {dimensions = array<i32: 1>} : vector<256x128xi32>
    %18 = vector.broadcast %16 : vector<256x1xi32> to vector<256x128xi32>
    %19 = arith.cmpi eq, %17, %18 : vector<256x128xi32>
    %cst_11 = arith.constant 0.000000e+00 : f32
    %20 = vector.broadcast %cst_11 : f32 to vector<256x128xf32>
    %21 = arith.select %19, %5, %20 : vector<256x128xi1>, vector<256x128xf32>
    %cst_12 = arith.constant dense<0.000000e+00> : vector<256xf32>
    %22 = vector.multi_reduction <add>, %21, %cst_12 [1] : vector<256x128xf32> to vector<256xf32>
    %23 = vector.shape_cast %22 : vector<256xf32> to vector<256x1xf32>
    %24 = arith.subf %15, %23 : vector<256x1xf32>
    %25 = vector.broadcast %8 : vector<256x1xf32> to vector<256x128xf32>
    %26 = arith.cmpf oeq, %5, %25 : vector<256x128xf32>
    %c128_i32 = arith.constant 128 : i32
    %27 = vector.broadcast %c128_i32 : i32 to vector<256x128xi32>
    %28 = arith.select %26, %17, %27 : vector<256x128xi1>, vector<256x128xi32>
    %cst_13 = arith.constant dense<2147483647> : vector<256xi32>
    %29 = vector.multi_reduction <minsi>, %28, %cst_13 [1] : vector<256x128xi32> to vector<256xi32>
    %30 = vector.shape_cast %29 : vector<256xi32> to vector<256x1xi32>
    %31 = arith.cmpi eq, %30, %16 : vector<256x1xi32>
    %32 = arith.extui %31 : vector<256x1xi1> to vector<256x1xi32>
    %33 = arith.sitofp %32 : vector<256x1xi32> to vector<256x1xf32>
    %34 = tpu.iota {dimensions = array<i32: 0>} : vector<256x1xi32>
    %c256_i32 = arith.constant 256 : i32
    %35 = arith.muli %arg0, %c256_i32 : i32
    %36 = vector.broadcast %35 : i32 to vector<256x1xi32>
    %37 = arith.addi %36, %34 : vector<256x1xi32>
    %c256_i32_14 = arith.constant 256 : i32
    %38 = vector.broadcast %c256_i32_14 : i32 to vector<256x1xi32>
    %39 = arith.cmpi slt, %37, %38 : vector<256x1xi32>
    %40 = arith.extui %39 : vector<256x1xi1> to vector<256x1xi32>
    %41 = arith.sitofp %40 : vector<256x1xi32> to vector<256x1xf32>
    %42 = arith.mulf %24, %41 : vector<256x1xf32>
    %43 = vector.shape_cast %42 : vector<256x1xf32> to vector<1x256x1xf32>
    %cst_15 = arith.constant dense<0.000000e+00> : vector<1xf32>
    %44 = vector.multi_reduction <add>, %43, %cst_15 [1, 2] : vector<1x256x1xf32> to vector<1xf32>
    %45 = vector.shape_cast %44 : vector<1xf32> to vector<1x1x1xf32>
    %46 = vector.extract %45[0, 0, 0] : f32 from vector<1x1x1xf32>
    %47 = arith.mulf %33, %41 : vector<256x1xf32>
    %48 = vector.shape_cast %47 : vector<256x1xf32> to vector<1x256x1xf32>
    %cst_16 = arith.constant dense<0.000000e+00> : vector<1xf32>
    %49 = vector.multi_reduction <add>, %48, %cst_16 [1, 2] : vector<1x256x1xf32> to vector<1xf32>
    %50 = vector.shape_cast %49 : vector<1xf32> to vector<1x1x1xf32>
    %51 = vector.extract %50[0, 0, 0] : f32 from vector<1x1x1xf32>
    %52 = tpu.iota {dimensions = array<i32: 1>} : vector<1x8x128xi32>
    %c0_i32 = arith.constant 0 : i32
    %53 = vector.broadcast %c0_i32 : i32 to vector<1x8x128xi32>
    %54 = arith.cmpi eq, %52, %53 : vector<1x8x128xi32>
    %c1_i32 = arith.constant 1 : i32
    %55 = vector.broadcast %c1_i32 : i32 to vector<1x8x128xi32>
    %56 = arith.cmpi eq, %52, %55 : vector<1x8x128xi32>
    %cst_17 = arith.constant 0.000000e+00 : f32
    %57 = vector.broadcast %51 : f32 to vector<1x8x128xf32>
    %58 = vector.broadcast %cst_17 : f32 to vector<1x8x128xf32>
    %59 = arith.select %56, %57, %58 : vector<1x8x128xi1>, vector<1x8x128xf32>
    %60 = vector.broadcast %46 : f32 to vector<1x8x128xf32>
    %61 = arith.select %54, %60, %59 : vector<1x8x128xi1>, vector<1x8x128xf32>
    %c0_18 = arith.constant 0 : index
    %c0_19 = arith.constant 0 : index
    %c0_20 = arith.constant 0 : index
    %62 = vector.load %arg6[%c0_18, %c0_19, %c0_20] : memref<1x8x128xf32, #tpu.memory_space<vmem>>, vector<1x8x128xf32>
    tpu.vector_store %arg6[%c0_18, %c0_19, %c0_20], %61 {strides = array<i32>} : memref<1x8x128xf32, #tpu.memory_space<vmem>>, vector<1x8x128xf32>,
    return
  }
  func.func @transform_0(%arg0: i32) -> (i32, i32) {
    %c0_i32 = arith.constant 0 : i32
    %c0_i32_0 = arith.constant 0 : i32
    return %arg0, %c0_i32 : i32, i32
  }
  func.func @transform_1(%arg0: i32) -> (i32, i32) {
    %c0_i32 = arith.constant 0 : i32
    %c0_i32_0 = arith.constant 0 : i32
    %c0_i32_1 = arith.constant 0 : i32
    return %c0_i32, %c0_i32_0 : i32, i32
  }
  func.func @transform_2(%arg0: i32) -> (i32, i32) {
    %c0_i32 = arith.constant 0 : i32
    %c0_i32_0 = arith.constant 0 : i32
    %c0_i32_1 = arith.constant 0 : i32
    return %c0_i32, %c0_i32_0 : i32, i32
  }
  func.func @transform_3(%arg0: i32) -> (i32, i32) {
    %c0_i32 = arith.constant 0 : i32
    %c0_i32_0 = arith.constant 0 : i32
    return %arg0, %c0_i32 : i32, i32
  }
  func.func @transform_4(%arg0: i32) -> (i32, i32) {
    %c0_i32 = arith.constant 0 : i32
    %c0_i32_0 = arith.constant 0 : i32
    return %arg0, %c0_i32 : i32, i32
  }
  func.func @transform_5(%arg0: i32) -> (i32, i32, i32) {
    %c0_i32 = arith.constant 0 : i32
    %c0_i32_0 = arith.constant 0 : i32
    %c0_i32_1 = arith.constant 0 : i32
    return %arg0, %c0_i32, %c0_i32_0 : i32, i32, i32
  }
}

</mosaic_0001>

<bundles_post_ra>
// kernel: tpu_custom_call.1
= control target key start
LH: loop header
LB: loop body
LE: loop exit
PB: predicated region body
PF: predicated region fallthrough
CT: control target
= control target key end

     0   :  { %11 = vsyncpa [#allocation3], 0  ;;  %s7145_s0 = inlined_call_operand.hbm [shape: bf16[256,1152], index: 0, kind: input, shape index: {}]   ;;  %s7146_s1 = inlined_call_operand.hbm [shape: bf16[1152,128], index: 1, kind: input, shape index: {}]   ;;  %s7147_s2 = inlined_call_operand.vmem [shape: f32[1,128], index: 2, kind: input, shape index: {}]   ;;  %s7148_s3 = inlined_call_operand.vmem [shape: s32[256,1], index: 3, kind: input, shape index: {}]   ;;  %s7149_s4 = inlined_call_operand.hbm [shape: f32[256,128], index: 4, kind: output, shape index: {0}]   ;;  %s7150_s5 = inlined_call_operand.hbm [shape: f32[1,8,128], index: 5, kind: output, shape index: {1}]  }
   0x1   :  { %12 = vsyncpa [#allocation6], 0 }
   0x2   :  { %13 = vsyncpa [#allocation4], 0 }
   0x3   :  { %14 = vsyncpa [#allocation9], 0  ;;  %s5336_s18 = smov [#allocation2]  }
   0x4   :  { %s20_s19 = sshll.u32 %s5336_s18, 4  ;;  %s21_s19 = int_to_ptr.vmem [resolvable:$true] %s20_s19 }
   0x5   :  { %s5256_s20 = scalar_lea.vmem %s21_s19, 18432  ;;  %p5261_p1 = scmp.lt.s32.totalorder %s21_s19, %s21_s19 }
   0x6   :  { %p5257_p0 = scmp.ne.s32.totalorder %s21_s19, %s5256_s20  ;;  %p5262_p2 = scmp.lt.s32.totalorder %s5256_s20, %s5256_s20 }
   0x8   :  { %p5263_p3 = por %p5262_p2, %p5261_p1 }
   0xa   :  { %p5264_p4 = pnand %p5263_p3, %p5257_p0 }
   0xc   :  { %5267 = shalt.err (!%p5264_p4)
}
   0xd   :  { %s5337_s21 = smov 576   ;;  %s5338_s22 = smov 36  }
   0xe   :  { %26 = dma.hbm_to_vmem [thread:$0]  %s7145_s0, 18432, %s21_s19, [#allocation3], %s5337_s21, %s5337_s21, %s5338_s22  }
   0xf   :  { %s5339_s25 = smov [#allocation5]  }
  0x10   :  { %s32_s26 = sshll.u32 %s5339_s25, 4  ;;  %s33_s26 = int_to_ptr.vmem [resolvable:$true] %s32_s26 }
  0x11   :  { %s5276_s27 = scalar_lea.vmem %s33_s26, 9216  ;;  %p5281_p6 = scmp.lt.s32.totalorder %s33_s26, %s33_s26 }
  0x12   :  { %p5277_p5 = scmp.ne.s32.totalorder %s33_s26, %s5276_s27  ;;  %p5282_p7 = scmp.lt.s32.totalorder %s5276_s27, %s5276_s27 }
  0x14   :  { %p5283_p8 = por %p5282_p7, %p5281_p6 }
  0x16   :  { %p5284_p9 = pnand %p5283_p8, %p5277_p5 }
  0x18   :  { %5287 = shalt.err (!%p5284_p9)
}
  0x19   :  { %s5340_s28 = smov 64   ;;  %s5341_s29 = smov 4  }
  0x1a   :  { %38 = dma.hbm_to_vmem [thread:$0]  %s7146_s1, 9216, %s33_s26, [#allocation6], %s5340_s28, %s5340_s28, %s5341_s29  }
  0x1b   :  { %5328 = dma.done.wait [#allocation3], 18432  }
  0x1c   :  { %5329 = vsyncadd [#allocation3], 4294948864 }
  0x1d   :  { %5330 = dma.done.wait [#allocation6], 9216  }
  0x1e   :  { %5331 = vsyncadd [#allocation6], 4294958080  ;;  %v4798_v0 = vld [vmem:[#allocation5 + $0x78] sm:$0xff]   ;;  %v4800_v2 = vld [vmem:[#allocation5 + $0x70] sm:$0xff]   ;;  %s5344_s24 = smov [#allocation7]  }
  0x1f   :  { %v4799_v1 = vld [vmem:[#allocation5 + $0x38] sm:$0xff]   ;;  %4244 = vmatprep.subr.bf16.mxu0 %v4798_v0  ;;  %4764 = vmatprep.subr.bf16.mxu1 %v4798_v0  ;;  %v4801_v3 = vld [vmem:[#allocation5 + $0x30] sm:$0xff]   ;;  %v4802_v4 = vld [vmem:[#allocation5 + $0x68] sm:$0xff]   ;;  %s3968_s25 = sshll.u32 %s5344_s24, 4  ;;  %s3969_s25 = int_to_ptr.vmem [resolvable:$true] %s3968_s25 }
  0x20   :  { %4245 = vmatpush3.bf16.msra.mxu0 %v4799_v1  ;;  %4772 = vmatpush3.bf16.msra.mxu1 %v4799_v1  ;;  %v4803_v5 = vld [vmem:[#allocation5 + $0x28] sm:$0xff]   ;;  %v4804_v6 = vld [vmem:[#allocation5 + $0x60] sm:$0xff]   ;;  %v4806_v8 = vld [vmem:[#allocation5 + $0x58] sm:$0xff]   ;;  %s5288_s26 = scalar_lea.vmem %s3969_s25, 4096  ;;  %p5293_p11 = scmp.lt.s32.totalorder %s3969_s25, %s3969_s25 }
  0x21   :  { %4246 = vmatprep.subr.bf16.mxu0 %v4800_v2  ;;  %4765 = vmatprep.subr.bf16.mxu1 %v4800_v2  ;;  %v4805_v7 = vld [vmem:[#allocation5 + $0x20] sm:$0xff]   ;;  %v4807_v9 = vld [vmem:[#allocation5 + $0x18] sm:$0xff]   ;;  %v4808_v10 = vld [vmem:[#allocation5 + $0x50] sm:$0xff]   ;;  %p5289_p10 = scmp.ne.s32.totalorder %s3969_s25, %s5288_s26  ;;  %p5294_p12 = scmp.lt.s32.totalorder %s5288_s26, %s5288_s26 }
  0x22   :  { %v4816_v11 = vld [vmem:[#allocation2 + $0x4] ss:$36 sps:$4 sm:$0xff]   ;;  %v4809_v13 = vld [vmem:[#allocation5 + $0x10] sm:$0xff]   ;;  %v4820_v18 = vld [vmem:[#allocation5 + $0xf8] sm:$0xff]  }
  0x23   :  { %v4819_v12 = vld [vmem:[#allocation2 + $0x364] ss:$36 sps:$4 sm:$0xff]   ;;  %1561 = vmatprep.mubr.bf16.mxu0 %v4816_v11  ;;  %v4821_v21 = vld [vmem:[#allocation5 + $0x178] sm:$0xff]   ;;  %v4824_v24 = vld [vmem:[#allocation5 + $0xf0] sm:$0xff]   ;;  %p5295_p13 = por %p5294_p12, %p5293_p11 }
  0x24   :  { %4247 = vmatpush3.bf16.msra.mxu0 %v4801_v3  ;;  %4773 = vmatpush3.bf16.msra.mxu1 %v4801_v3  ;;  %v4810_v14 = vld [vmem:[#allocation5 + $0x48] sm:$0xff]   ;;  %v4812_v16 = vld [vmem:[#allocation5 + $0x40] sm:$0xff]   ;;  %v4822_v22 = vld [vmem:[#allocation5 + $0xb8] sm:$0xff]  }
  0x25   :  { %4248 = vmatprep.subr.bf16.mxu0 %v4802_v4  ;;  %4766 = vmatprep.subr.bf16.mxu1 %v4802_v4  ;;  %v4811_v15 = vld [vmem:[#allocation5 + $0x8] sm:$0xff]   ;;  %v4813_v17 = vld [vmem:[#allocation5] sm:$0xff]   ;;  %v4823_v23 = vld [vmem:[#allocation5 + $0x138] sm:$0xff]   ;;  %p5296_p0 = pnand %p5295_p13, %p5289_p10 }
  0x26   :  { %1657 = vmatprep.mubr.bf16.mxu1 %v4819_v12  ;;  %v4814_v19 = vld [vmem:[#allocation2] ss:$36 sps:$4 sm:$0xff]   ;;  %v4826_v25 = vld [vmem:[#allocation2 + $0x4c] ss:$36 sps:$4 sm:$0xff]   ;;  %v4838_v35 = vld [vmem:[#allocation2 + $0x94] ss:$36 sps:$4 sm:$0xff]  }
  0x27   :  { %v4817_v20 = vld [vmem:[#allocation2 + $0x360] ss:$36 sps:$4 sm:$0xff]   ;;  %v4828_v26 = vld [vmem:[#allocation2 + $0x3ac] ss:$36 sps:$4 sm:$0xff]   ;;  %v4840_v36 = vld [vmem:[#allocation2 + $0x3f4] ss:$36 sps:$4 sm:$0xff]  }
  0x28   :  { %4249 = vmatpush3.bf16.msra.mxu0 %v4803_v5  ;;  %4774 = vmatpush3.bf16.msra.mxu1 %v4803_v5  ;;  %v4835_v27 = vld [vmem:[#allocation5 + $0x170] sm:$0xff]   ;;  %v4830_v30 = vld [vmem:[#allocation2 + $0x48] ss:$36 sps:$4 sm:$0xff]   ;;  %v4834_v34 = vld [vmem:[#allocation5 + $0xe0] sm:$0xff]  }
  0x29   :  { %4250 = vmatprep.subr.bf16.mxu0 %v4804_v6  ;;  %4767 = vmatprep.subr.bf16.mxu1 %v4804_v6  ;;  %v4825_v28 = vld [vmem:[#allocation5 + $0xb0] sm:$0xff]   ;;  %v4831_v31 = vld [vmem:[#allocation2 + $0x3a8] ss:$36 sps:$4 sm:$0xff]   ;;  %v4836_v37 = vld [vmem:[#allocation5 + $0xa0] sm:$0xff]  }
  0x2a   :  { %v4837_v29 = vld [vmem:[#allocation5 + $0x130] sm:$0xff]   ;;  %v4832_v32 = vld [vmem:[#allocation5 + $0xe8] sm:$0xff]   ;;  %v4844_v38 = vld [vmem:[#allocation5 + $0xd8] sm:$0xff]  }
  0x2b   :  { %v4833_v33 = vld [vmem:[#allocation5 + $0xa8] sm:$0xff]   ;;  %v4842_v39 = vld [vmem:[#allocation2 + $0x90] ss:$36 sps:$4 sm:$0xff]   ;;  %v4845_v42 = vld [vmem:[#allocation5 + $0x98] sm:$0xff]  }
  0x2c   :  { %4251 = vmatpush3.bf16.msra.mxu0 %v4805_v7  ;;  %4775 = vmatpush3.bf16.msra.mxu1 %v4805_v7  ;;  %v4843_v40 = vld [vmem:[#allocation2 + $0x3f0] ss:$36 sps:$4 sm:$0xff]   ;;  %v4855_v41 = vld [vmem:[#allocation5 + $0x168] sm:$0xff]   ;;  %v4848_v45 = vld [vmem:[#allocation2 + $0xdc] ss:$36 sps:$4 sm:$0xff]  }
  0x2d   :  { %4252 = vmatprep.subr.bf16.mxu0 %v4806_v8  ;;  %4768 = vmatprep.subr.bf16.mxu1 %v4806_v8  ;;  %v4846_v43 = vld [vmem:[#allocation5 + $0xd0] sm:$0xff]   ;;  %v4857_v44 = vld [vmem:[#allocation5 + $0x128] sm:$0xff]   ;;  %v4850_v46 = vld [vmem:[#allocation2 + $0x43c] ss:$36 sps:$4 sm:$0xff]  }
  0x2e   :  { %v4847_v47 = vld [vmem:[#allocation5 + $0x90] sm:$0xff]   ;;  %v4854_v48 = vld [vmem:[#allocation5 + $0xc8] sm:$0xff]   ;;  %v4852_v49 = vld [vmem:[#allocation2 + $0xd8] ss:$36 sps:$4 sm:$0xff]  }
  0x2f   :  { %v4866_v50 = vld [vmem:[#allocation5 + $0x160] sm:$0xff]   ;;  %v4853_v52 = vld [vmem:[#allocation2 + $0x438] ss:$36 sps:$4 sm:$0xff]   ;;  %v4856_v53 = vld [vmem:[#allocation5 + $0x88] sm:$0xff]  }
  0x30   :  { %4253 = vmatpush3.bf16.msra.mxu0 %v4807_v9  ;;  %4776 = vmatpush3.bf16.msra.mxu1 %v4807_v9  ;;  %v4867_v51 = vld [vmem:[#allocation5 + $0x120] sm:$0xff]   ;;  %v4864_v56 = vld [vmem:[#allocation2 + $0xc] ss:$36 sps:$4 sm:$0xff]   ;;  %v4880_v58 = vld [vmem:[#allocation5 + $0x158] sm:$0xff]  }
  0x31   :  { %4254 = vmatprep.subr.bf16.mxu0 %v4808_v10  ;;  %4769 = vmatprep.subr.bf16.mxu1 %v4808_v10  ;;  %v4858_v54 = vld [vmem:[#allocation5 + $0xc0] sm:$0xff]   ;;  %v4881_v59 = vld [vmem:[#allocation5 + $0x118] sm:$0xff]   ;;  %v4862_v60 = vld [vmem:[#allocation2 + $0x8] ss:$36 sps:$4 sm:$0xff]  }
  0x32   :  { %v4860_v55 = vld [vmem:[#allocation2 + $0x124] ss:$36 sps:$4 sm:$0xff]   ;;  %v4868_v62 = vld [vmem:[#allocation2 + $0x16c] ss:$36 sps:$4 sm:$0xff]   ;;  %v4870_v63 = vld [vmem:[#allocation2 + $0x54] ss:$36 sps:$4 sm:$0xff]  }
  0x33   :  { %v4859_v57 = vld [vmem:[#allocation5 + $0x80] sm:$0xff]   ;;  %v4888_v0 = vld [vmem:[#allocation5 + $0x150] sm:$0xff]   ;;  %v4872_v2 = vld [vmem:[#allocation2 + $0x168] ss:$36 sps:$4 sm:$0xff]  }
  0x34   :  { %4255 = vmatpush3.bf16.msra.mxu0 %v4809_v13  ;;  %4777 = vmatpush3.bf16.msra.mxu1 %v4809_v13  ;;  %v4865_v61 = vld [vmem:[#allocation2 + $0x120] ss:$36 sps:$4 sm:$0xff]   ;;  %v4889_v1 = vld [vmem:[#allocation5 + $0x110] sm:$0xff]   ;;  %v4902_v6 = vld [vmem:[#allocation5 + $0x148] sm:$0xff]  }
  0x35   :  { %4256 = vmatprep.subr.bf16.mxu0 %v4810_v14  ;;  %4770 = vmatprep.subr.bf16.mxu1 %v4810_v14  ;;  %v4873_v3 = vld [vmem:[#allocation2 + $0x50] ss:$36 sps:$4 sm:$0xff]   ;;  %v4876_v5 = vld [vmem:[#allocation2 + $0x9c] ss:$36 sps:$4 sm:$0xff]   ;;  %v4903_v7 = vld [vmem:[#allocation5 + $0x108] sm:$0xff]  }
  0x36   :  { %v4874_v4 = vld [vmem:[#allocation2 + $0x1b4] ss:$36 sps:$4 sm:$0xff]   ;;  %v4882_v11 = vld [vmem:[#allocation2 + $0x1fc] ss:$36 sps:$4 sm:$0xff]   ;;  %v4884_v12 = vld [vmem:[#allocation2 + $0xe4] ss:$36 sps:$4 sm:$0xff]  }
  0x37   :  { %v4878_v8 = vld [vmem:[#allocation2 + $0x1b0] ss:$36 sps:$4 sm:$0xff]   ;;  %v4879_v9 = vld [vmem:[#allocation2 + $0x98] ss:$36 sps:$4 sm:$0xff]   ;;  %v4912_v14 = vld [vmem:[#allocation5 + $0x140] sm:$0xff]  }
  0x38   :  { %4257 = vmatpush3.bf16.msra.mxu0 %v4811_v15  ;;  %4778 = vmatpush3.bf16.msra.mxu1 %v4811_v15  ;;  %v4910_v10 = vld [vmem:[#allocation5 + $0x1f8] sm:$0xff]   ;;  %v4913_v15 = vld [vmem:[#allocation5 + $0x100] sm:$0xff]  }
  0x39   :  { %4258 = vmatprep.subr.bf16.mxu0 %v4812_v16  ;;  %4771 = vmatprep.subr.bf16.mxu1 %v4812_v16  ;;  %v4911_v13 = vld [vmem:[#allocation5 + $0x1b8] sm:$0xff]  }
  0x3a   :  { %v4886_v16 = vld [vmem:[#allocation2 + $0x1f8] ss:$36 sps:$4 sm:$0xff]  }
  0x3c   :  { %4259 = vmatpush3.bf16.msra.mxu0 %v4813_v17  ;;  %4779 = vmatpush3.bf16.msra.mxu1 %v4813_v17  ;;  %v4887_v17 = vld [vmem:[#allocation2 + $0xe0] ss:$36 sps:$4 sm:$0xff]  }
  0x3d   :  { %4356 = vmatprep.subr.bf16.mxu1 %v4820_v18  ;;  %4468 = vmatprep.subr.bf16.mxu0 %v4821_v21  ;;  %v5342_v18 = vmov 0   ;;  %v5384_v21 = vld [vmem:[#allocation5 + $0x238] sm:$0xff]  }
  0x3e   :  { %4796 = vset.pattern.permute.xlu0 %v5342_v18  ;;  %4797 = vset.pattern.permute.xlu1 %v5342_v18  ;;  %v4954_v18 = vld [vmem:[#allocation2 + $0x368] ss:$36 sps:$4 sm:$0xff]  }
  0x3f   :  { %1562 = vmatmul.mubr.bf16.vlgmr.msra.gmra.mxu0 %v4814_v19  ;;  %1658 = vmatmul.mubr.bf16.vlgmr.msra.gmra.mxu1 %v4817_v20  ;;  %v4890_v19 = vld [vmem:[#allocation2 + $0x244] ss:$36 sps:$4 sm:$0xff]   ;;  %v4892_v20 = vld [vmem:[#allocation2 + $0x12c] ss:$36 sps:$4 sm:$0xff]  }
  0x40   :  { %4357 = vmatpush3.bf16.msra.mxu1 %v4822_v22  ;;  %4469 = vmatpush3.bf16.msra.mxu0 %v4823_v23  ;;  %v4927_v22 = vld [vmem:[#allocation5 + $0x1f0] sm:$0xff]  }
  0x41   :  { %4358 = vmatprep.subr.bf16.mxu1 %v4824_v24  ;;  %1569 = vmatprep.mubr.bf16.mxu0 %v4826_v25  ;;  %v4928_v23 = vld [vmem:[#allocation5 + $0x1b0] sm:$0xff]   ;;  %v4894_v24 = vld [vmem:[#allocation2 + $0x240] ss:$36 sps:$4 sm:$0xff]   ;;  %v4895_v25 = vld [vmem:[#allocation2 + $0x128] ss:$36 sps:$4 sm:$0xff]  }
  0x42   :  { %1665 = vmatprep.mubr.bf16.mxu1 %v4828_v26  ;;  %4470 = vmatprep.subr.bf16.mxu0 %v4835_v27  ;;  %v4896_v26 = vld [vmem:[#allocation2 + $0x28c] ss:$36 sps:$4 sm:$0xff]   ;;  %v4898_v27 = vld [vmem:[#allocation2 + $0x174] ss:$36 sps:$4 sm:$0xff]  }
  0x44   :  { %4359 = vmatpush3.bf16.msra.mxu1 %v4825_v28  ;;  %4471 = vmatpush3.bf16.msra.mxu0 %v4837_v29  ;;  %v4942_v28 = vld [vmem:[#allocation5 + $0x1e8] sm:$0xff]  }
  0x45   :  { %4360 = vmatprep.subr.bf16.mxu1 %v4832_v32  ;;  %4472 = vmatprep.subr.bf16.mxu0 %v4855_v41  ;;  %v4943_v29 = vld [vmem:[#allocation5 + $0x1a8] sm:$0xff]   ;;  %v4904_v32 = vld [vmem:[#allocation2 + $0x2d4] ss:$36 sps:$4 sm:$0xff]  }
  0x46   :  { %v4973_v41 = vld [vmem:[#allocation5 + $0x198] sm:$0xff]  }
  0x47   :  { %1570 = vmatmul.mubr.bf16.gmra.mxu0 %v4830_v30  ;;  %1666 = vmatmul.mubr.bf16.gmra.mxu1 %v4831_v31  ;;  %v4900_v30 = vld [vmem:[#allocation2 + $0x288] ss:$36 sps:$4 sm:$0xff]   ;;  %v4901_v31 = vld [vmem:[#allocation2 + $0x170] ss:$36 sps:$4 sm:$0xff]  }
  0x48   :  { %4361 = vmatpush3.bf16.msra.mxu1 %v4833_v33  ;;  %1577 = vmatprep.mubr.bf16.mxu0 %v4838_v35  ;;  %v4906_v33 = vld [vmem:[#allocation2 + $0x1bc] ss:$36 sps:$4 sm:$0xff]  }
  0x49   :  { %4362 = vmatprep.subr.bf16.mxu1 %v4834_v34  ;;  %1673 = vmatprep.mubr.bf16.mxu1 %v4840_v36  ;;  %v4957_v34 = vld [vmem:[#allocation5 + $0x1e0] sm:$0xff]   ;;  %v4908_v36 = vld [vmem:[#allocation2 + $0x2d0] ss:$36 sps:$4 sm:$0xff]  }
  0x4a   :  { %4473 = vmatpush3.bf16.msra.mxu0 %v4857_v44  ;;  %v4958_v35 = vld [vmem:[#allocation5 + $0x1a0] sm:$0xff]  }
  0x4b   :  { %4474 = vmatprep.subr.bf16.mxu0 %v4866_v50  ;;  %v4919_v44 = vld [vmem:[#allocation2 + $0x200] ss:$36 sps:$4 sm:$0xff]  }
  0x4c   :  { %4363 = vmatpush3.bf16.msra.mxu1 %v4836_v37  ;;  %v4909_v37 = vld [vmem:[#allocation2 + $0x1b8] ss:$36 sps:$4 sm:$0xff]   ;;  %v4984_v50 = vld [vmem:[#allocation5 + $0x1c0] sm:$0xff]  }
  0x4d   :  { %4364 = vmatprep.subr.bf16.mxu1 %v4844_v38  ;;  %v4914_v38 = vld [vmem:[#allocation2 + $0x31c] ss:$36 sps:$4 sm:$0xff]  }
  0x4e   :  { %4475 = vmatpush3.bf16.msra.mxu0 %v4867_v51  ;;  %v4985_v51 = vld [vmem:[#allocation5 + $0x180] sm:$0xff]  }
  0x4f   :  { %1578 = vmatmul.mubr.bf16.gmra.mxu0 %v4842_v39  ;;  %1674 = vmatmul.mubr.bf16.gmra.mxu1 %v4843_v40  ;;  %v4971_v39 = vld [vmem:[#allocation5 + $0x1d8] sm:$0xff]   ;;  %v4916_v40 = vld [vmem:[#allocation2 + $0x204] ss:$36 sps:$4 sm:$0xff]  }
  0x50   :  { %4365 = vmatpush3.bf16.msra.mxu1 %v4845_v42  ;;  %1585 = vmatprep.mubr.bf16.mxu0 %v4848_v45  ;;  %v4974_v42 = vld [vmem:[#allocation5 + $0x1d0] sm:$0xff]  }
  0x51   :  { %4366 = vmatprep.subr.bf16.mxu1 %v4846_v43  ;;  %1681 = vmatprep.mubr.bf16.mxu1 %v4850_v46  ;;  %v4918_v43 = vld [vmem:[#allocation2 + $0x318] ss:$36 sps:$4 sm:$0xff]   ;;  %v4975_v45 = vld [vmem:[#allocation5 + $0x190] sm:$0xff]  }
  0x52   :  { %4476 = vmatprep.subr.bf16.mxu0 %v4880_v58  ;;  %v4920_v46 = vld [vmem:[#allocation2 + $0x24c] ss:$36 sps:$4 sm:$0xff]  }
  0x53   :  { %4477 = vmatpush3.bf16.msra.mxu0 %v4881_v59  ;;  %v4956_v58 = vld [vmem:[#allocation5 + $0x228] sm:$0xff]   ;;  %v4933_v59 = vld [vmem:[#allocation2 + $0x290] ss:$36 sps:$4 sm:$0xff]  }
  0x54   :  { %4367 = vmatpush3.bf16.msra.mxu1 %v4847_v47  ;;  %4478 = vmatprep.subr.bf16.mxu0 %v4888_v0  ;;  %v4982_v47 = vld [vmem:[#allocation5 + $0x1c8] sm:$0xff]   ;;  %v4972_v0 = vld [vmem:[#allocation5 + $0x220] sm:$0xff]  }
  0x55   :  { %4368 = vmatprep.subr.bf16.mxu1 %v4854_v48  ;;  %v4924_v48 = vld [vmem:[#allocation2 + $0x14] ss:$36 sps:$4 sm:$0xff]  }
  0x57   :  { %1586 = vmatmul.mubr.bf16.gmra.mxu0 %v4852_v49  ;;  %1682 = vmatmul.mubr.bf16.gmra.mxu1 %v4853_v52  ;;  %v4983_v49 = vld [vmem:[#allocation5 + $0x188] sm:$0xff]   ;;  %v4922_v52 = vld [vmem:[#allocation2 + $0x10] ss:$36 sps:$4 sm:$0xff]  }
  0x58   :  { %4369 = vmatpush3.bf16.msra.mxu1 %v4856_v53  ;;  %1593 = vmatprep.mubr.bf16.mxu0 %v4860_v55  ;;  %v4925_v53 = vld [vmem:[#allocation2 + $0x248] ss:$36 sps:$4 sm:$0xff]   ;;  %v4931_v55 = vld [vmem:[#allocation2 + $0x5c] ss:$36 sps:$4 sm:$0xff]  }
  0x59   :  { %4370 = vmatprep.subr.bf16.mxu1 %v4858_v54  ;;  %1722 = vmatprep.mubr.bf16.mxu1 %v4864_v56  ;;  %v4929_v54 = vld [vmem:[#allocation2 + $0x294] ss:$36 sps:$4 sm:$0xff]  }
  0x5a   :  { %4479 = vmatpush3.bf16.msra.mxu0 %v4889_v1  ;;  %v4941_v56 = vld [vmem:[#allocation5 + $0x230] sm:$0xff]  }
  0x5b   :  { %4480 = vmatprep.subr.bf16.mxu0 %v4902_v6  ;;  %v2692_v1 = vld [vmem:[%s7148_s3 + $0x30] sm:$0xff]  ;;  %v2693_v6 = vld [vmem:[%s7148_s3 + $0x38] sm:$0xff] }
  0x5c   :  { %4371 = vmatpush3.bf16.msra.mxu1 %v4859_v57  ;;  %v2686_v57 = vld [vmem:[%s7148_s3] sm:$0xff] }
  0x5d   :  { %4580 = vmatprep.subr.bf16.mxu1 %v4910_v10  ;;  %2721 = vperm.xlu0 %4796, %v2686_v57   ;;  %v4948_v10 = vld [vmem:[#allocation2 + $0x320] ss:$36 sps:$4 sm:$0xff]   ;;  %v5001_v57 = vld [vmem:[#allocation2 + $0xac] ss:$36 sps:$4 sm:$0xff]  }
  0x5e   :  { %4481 = vmatpush3.bf16.msra.mxu0 %v4903_v7  ;;  %v4946_v7 = vld [vmem:[#allocation2 + $0xec] ss:$36 sps:$4 sm:$0xff]  }
  0x5f   :  { %1594 = vmatmul.mubr.bf16.gmra.mxu0 %v4865_v61  ;;  %1723 = vmatmul.mubr.bf16.vlgmr.msra.gmra.mxu1 %v4862_v60  ;;  %v4934_v60 = vld [vmem:[#allocation2 + $0x58] ss:$36 sps:$4 sm:$0xff]  }
  0x60   :  { %1601 = vmatprep.mubr.bf16.mxu0 %v4868_v62  ;;  %1730 = vmatprep.mubr.bf16.mxu1 %v4870_v63  ;;  %v4935_v61 = vld [vmem:[#allocation2 + $0x2dc] ss:$36 sps:$4 sm:$0xff]   ;;  %v4937_v63 = vld [vmem:[#allocation2 + $0xa4] ss:$36 sps:$4 sm:$0xff]  }
  0x61   :  { %4581 = vmatpush3.bf16.msra.mxu1 %v4911_v13  ;;  %4482 = vmatprep.subr.bf16.mxu0 %v4912_v14  ;;  %v2689_v62 = vld [vmem:[%s7148_s3 + $0x18] sm:$0xff]  ;;  %v2695_v13 = vld [vmem:[%s7148_s3 + $0x48] sm:$0xff] }
  0x62   :  { %4483 = vmatpush3.bf16.msra.mxu0 %v4913_v15  ;;  %4582 = vmatprep.subr.bf16.mxu1 %v4927_v22  ;;  %v4950_v14 = vld [vmem:[#allocation2 + $0x36c] ss:$36 sps:$4 sm:$0xff]   ;;  %v4952_v15 = vld [vmem:[#allocation2 + $0x134] ss:$36 sps:$4 sm:$0xff]   ;;  %v4961_v22 = vld [vmem:[#allocation2 + $0x17c] ss:$36 sps:$4 sm:$0xff]  }
  0x63   :  { %4716 = vmatprep.subr.bf16.mxu0 %v5384_v21  ;;  %2730 = vperm.xlu0 %4796, %v2689_v62   ;;  %v5006_v62 = vld [vmem:[#allocation2 + $0x32c] ss:$36 sps:$4 sm:$0xff]  }
  0x65   :  { %4583 = vmatpush3.bf16.msra.mxu1 %v4928_v23  ;;  %v2698_v23 = vld [vmem:[%s7148_s3 + $0x60] sm:$0xff] }
  0x66   :  { %4584 = vmatprep.subr.bf16.mxu1 %v4942_v28  ;;  %v4967_v28 = vld [vmem:[#allocation2 + $0x1c4] ss:$36 sps:$4 sm:$0xff]  }
  0x67   :  { %1602 = vmatmul.mubr.bf16.gmra.mxu0 %v4872_v2  ;;  %1731 = vmatmul.mubr.bf16.gmra.mxu1 %v4873_v3  ;;  %v4939_v2 = vld [vmem:[#allocation2 + $0x2d8] ss:$36 sps:$4 sm:$0xff]  }
  0x68   :  { %1609 = vmatprep.mubr.bf16.mxu0 %v4874_v4  ;;  %1738 = vmatprep.mubr.bf16.mxu1 %v4876_v5  ;;  %v4992_v3 = vld [vmem:[#allocation5 + $0x218] sm:$0xff]   ;;  %v4940_v4 = vld [vmem:[#allocation2 + $0xa0] ss:$36 sps:$4 sm:$0xff]  }
  0x69   :  { %4585 = vmatpush3.bf16.msra.mxu1 %v4943_v29  ;;  %2739 = vperm.xlu0 %4796, %v2692_v1   ;;  %v4944_v5 = vld [vmem:[#allocation2 + $0x324] ss:$36 sps:$4 sm:$0xff]   ;;  %v2700_v29 = vld [vmem:[%s7148_s3 + $0x70] sm:$0xff] }
  0x6a   :  { %4586 = vmatprep.subr.bf16.mxu1 %v4957_v34  ;;  %v4978_v34 = vld [vmem:[#allocation2 + $0x20c] ss:$36 sps:$4 sm:$0xff]  }
  0x6b   :  { %v5010_v1 = vld [vmem:[#allocation2 + $0x328] ss:$36 sps:$4 sm:$0xff]  }
  0x6d   :  { %4587 = vmatpush3.bf16.msra.mxu1 %v4958_v35  ;;  %2742 = vperm.xlu0 %4796, %v2693_v6   ;;  %v2702_v35 = vld [vmem:[%s7148_s3 + $0x80] sm:$0xff]  ;;  %v2712_v6 = vld [vmem:[%s7148_s3 + $0xd0] sm:$0xff] }
  0x6e   :  { %4588 = vmatprep.subr.bf16.mxu1 %v4971_v39  ;;  %v2703_v39 = vld [vmem:[%s7148_s3 + $0x88] sm:$0xff] }
  0x6f   :  { %1610 = vmatmul.mubr.bf16.gmra.mxu0 %v4878_v8  ;;  %1739 = vmatmul.mubr.bf16.gmra.mxu1 %v4879_v9  ;;  %v5005_v8 = vld [vmem:[#allocation5 + $0x210] sm:$0xff]   ;;  %v2694_v9 = vld [vmem:[%s7148_s3 + $0x40] sm:$0xff] }
  0x70   :  { %1617 = vmatprep.mubr.bf16.mxu0 %v4882_v11  ;;  %1746 = vmatprep.mubr.bf16.mxu1 %v4884_v12  ;;  %v5018_v11 = vld [vmem:[#allocation5 + $0x208] sm:$0xff]  }
  0x71   :  { %4589 = vmatpush3.bf16.msra.mxu1 %v4973_v41  ;;  %2745 = vperm.xlu0 %4796, %v2694_v9   ;;  %v4949_v12 = vld [vmem:[#allocation2 + $0xe8] ss:$36 sps:$4 sm:$0xff]   ;;  %v4990_v41 = vld [vmem:[#allocation2 + $0x1c] ss:$36 sps:$4 sm:$0xff]  }
  0x72   :  { %4590 = vmatprep.subr.bf16.mxu1 %v4974_v42  ;;  %v2688_v42 = vld [vmem:[%s7148_s3 + $0x10] sm:$0xff]  ;;  %v2714_v9 = vld [vmem:[%s7148_s3 + $0xe0] sm:$0xff] }
  0x75   :  { %4591 = vmatpush3.bf16.msra.mxu1 %v4975_v45  ;;  %2748 = vperm.xlu0 %4796, %v2695_v13   ;;  %v4988_v45 = vld [vmem:[#allocation2 + $0x18] ss:$36 sps:$4 sm:$0xff]  }
  0x76   :  { %4592 = vmatprep.subr.bf16.mxu1 %v4982_v47  ;;  %v2705_v47 = vld [vmem:[%s7148_s3 + $0x98] sm:$0xff] }
  0x77   :  { %1618 = vmatmul.mubr.bf16.gmra.mxu0 %v4886_v16  ;;  %1747 = vmatmul.mubr.bf16.gmra.mxu1 %v4887_v17  ;;  %v5031_v16 = vld [vmem:[#allocation5 + $0x200] sm:$0xff]   ;;  %v2696_v17 = vld [vmem:[%s7148_s3 + $0x50] sm:$0xff] }
  0x78   :  { %1625 = vmatprep.mubr.bf16.mxu0 %v4890_v19  ;;  %1754 = vmatprep.mubr.bf16.mxu1 %v4892_v20  ;;  %v4955_v19 = vld [vmem:[#allocation2 + $0x130] ss:$36 sps:$4 sm:$0xff]   ;;  %v2697_v20 = vld [vmem:[%s7148_s3 + $0x58] sm:$0xff] }
  0x79   :  { %4593 = vmatpush3.bf16.msra.mxu1 %v4983_v49  ;;  %2751 = vperm.xlu0 %4796, %v2696_v17   ;;  %v4995_v49 = vld [vmem:[#allocation2 + $0x64] ss:$36 sps:$4 sm:$0xff]  }
  0x7a   :  { %4594 = vmatprep.subr.bf16.mxu1 %v4984_v50  ;;  %v2691_v50 = vld [vmem:[%s7148_s3 + $0x28] sm:$0xff] }
  0x7d   :  { %4595 = vmatpush3.bf16.msra.mxu1 %v4985_v51  ;;  %2754 = vperm.xlu0 %4796, %v2697_v20   ;;  %v2706_v51 = vld [vmem:[%s7148_s3 + $0xa0] sm:$0xff] }
  0x7f   :  { %1626 = vmatmul.mubr.bf16.gmra.mxu0 %v4894_v24  ;;  %1755 = vmatmul.mubr.bf16.gmra.mxu1 %v4895_v25  ;;  %v4963_v24 = vld [vmem:[#allocation2 + $0x3b0] ss:$36 sps:$4 sm:$0xff]   ;;  %v4964_v25 = vld [vmem:[#allocation2 + $0x178] ss:$36 sps:$4 sm:$0xff]  }
  0x80   :  { %1633 = vmatprep.mubr.bf16.mxu0 %v4896_v26  ;;  %1762 = vmatprep.mubr.bf16.mxu1 %v4898_v27  ;;  %v2699_v26 = vld [vmem:[%s7148_s3 + $0x68] sm:$0xff]  ;;  %v4965_v27 = vld [vmem:[#allocation2 + $0x3fc] ss:$36 sps:$4 sm:$0xff]  }
  0x81   :  { %2757 = vperm.xlu0 %4796, %v2698_v23   ;;  %v2716_v23 = vld [vmem:[%s7148_s3 + $0xf0] sm:$0xff] }
  0x85   :  { %2760 = vperm.xlu0 %4796, %v2699_v26  }
  0x87   :  { %1634 = vmatmul.mubr.bf16.gmra.mxu0 %v4900_v30  ;;  %1763 = vmatmul.mubr.bf16.gmra.mxu1 %v4901_v31  ;;  %v4969_v30 = vld [vmem:[#allocation2 + $0x3f8] ss:$36 sps:$4 sm:$0xff]   ;;  %v4970_v31 = vld [vmem:[#allocation2 + $0x1c0] ss:$36 sps:$4 sm:$0xff]  }
  0x88   :  { %1641 = vmatprep.mubr.bf16.mxu0 %v4904_v32  ;;  %1770 = vmatprep.mubr.bf16.mxu1 %v4906_v33  ;;  %v4976_v32 = vld [vmem:[#allocation2 + $0x444] ss:$36 sps:$4 sm:$0xff]   ;;  %v2701_v33 = vld [vmem:[%s7148_s3 + $0x78] sm:$0xff] }
  0x89   :  { %2763 = vperm.xlu0 %4796, %v2700_v29  }
  0x8d   :  { %2766 = vperm.xlu0 %4796, %v2701_v33  }
  0x8f   :  { %1642 = vmatmul.mubr.bf16.gmra.mxu0 %v4908_v36  ;;  %1771 = vmatmul.mubr.bf16.gmra.mxu1 %v4909_v37  ;;  %v2687_v36 = vld [vmem:[%s7148_s3 + $0x8] sm:$0xff]  ;;  %v4980_v37 = vld [vmem:[#allocation2 + $0x440] ss:$36 sps:$4 sm:$0xff]  }
  0x90   :  { %1649 = vmatprep.mubr.bf16.mxu0 %v4914_v38  ;;  %1778 = vmatprep.mubr.bf16.mxu1 %v4916_v40  ;;  %v4981_v38 = vld [vmem:[#allocation2 + $0x208] ss:$36 sps:$4 sm:$0xff]   ;;  %v4986_v40 = vld [vmem:[#allocation2 + $0x254] ss:$36 sps:$4 sm:$0xff]  }
  0x91   :  { %2724 = vperm.xlu1 %4797, %v2687_v36   ;;  %2769 = vperm.xlu0 %4796, %v2702_v35  }
  0x95   :  { %2727 = vperm.xlu1 %4797, %v2688_v42   ;;  %2772 = vperm.xlu0 %4796, %v2703_v39   ;;  %v5029_v39 = vld [vmem:[#allocation2 + $0x400] ss:$36 sps:$4 sm:$0xff]   ;;  %v5034_v42 = vld [vmem:[#allocation2 + $0x214] ss:$36 sps:$4 sm:$0xff]  }
  0x97   :  { %1650 = vmatmul.mubr.bf16.gmra.mxu0 %v4918_v43  ;;  %1779 = vmatmul.mubr.bf16.gmra.mxu1 %v4919_v44  ;;  %v2704_v43 = vld [vmem:[%s7148_s3 + $0x90] sm:$0xff]  ;;  %v2690_v44 = vld [vmem:[%s7148_s3 + $0x20] sm:$0xff] }
  0x98   :  { %1786 = vmatprep.mubr.bf16.mxu1 %v4920_v46  ;;  %1883 = vmatprep.mubr.bf16.mxu0 %v4924_v48  ;;  %v4991_v46 = vld [vmem:[#allocation2 + $0x250] ss:$36 sps:$4 sm:$0xff]   ;;  %v4993_v48 = vld [vmem:[#allocation2 + $0x29c] ss:$36 sps:$4 sm:$0xff]  }
  0x99   :  { %2733 = vperm.xlu1 %4797, %v2690_v44   ;;  %2775 = vperm.xlu0 %4796, %v2704_v43  }
  0x9d   :  { %2736 = vperm.xlu1 %4797, %v2691_v50   ;;  %2778 = vperm.xlu0 %4796, %v2705_v47  }
  0x9f   :  { %1787 = vmatmul.mubr.bf16.gmra.mxu1 %v4925_v53  ;;  %1884 = vmatmul.mubr.bf16.vlgmr.msra.gmra.mxu0 %v4922_v52  ;;  %v2713_v52 = vld [vmem:[%s7148_s3 + $0xd8] sm:$0xff] }
  0xa0   :  { %4717 = vmatpush3.bf16.msra.mxu0 %v5384_v21  ;;  %1794 = vmatprep.mubr.bf16.mxu1 %v4929_v54  ;;  %v4959_v21 = vld [vmem:[#allocation2 + $0x3b4] ss:$36 sps:$4 sm:$0xff]   ;;  %v4998_v54 = vld [vmem:[#allocation2 + $0x60] ss:$36 sps:$4 sm:$0xff]  }
  0xa1   :  { %1891 = vmatprep.mubr.bf16.mxu0 %v4931_v55  ;;  %4718 = vmatprep.subr.bf16.mxu0 %v4941_v56  ;;  %v4997_v53 = vld [vmem:[#allocation2 + $0x298] ss:$36 sps:$4 sm:$0xff]   ;;  %v2707_v55 = vld [vmem:[%s7148_s3 + $0xa8] sm:$0xff] }
  0xa2   :  { %2802 = vperm.xlu1 %4797, %v2713_v52   ;;  %2781 = vperm.xlu0 %4796, %v2706_v51  }
  0xa4   :  { %4719 = vmatpush3.bf16.msra.mxu0 %v4941_v56  ;;  %v4999_v56 = vld [vmem:[#allocation2 + $0x2e4] ss:$36 sps:$4 sm:$0xff]  }
  0xa5   :  { %4720 = vmatprep.subr.bf16.mxu0 %v4956_v58 }
  0xa6   :  { %2784 = vperm.xlu0 %4796, %v2707_v55   ;;  %v5036_v55 = vld [vmem:[#allocation2 + $0x448] ss:$36 sps:$4 sm:$0xff]  }
  0xa7   :  { %1795 = vmatmul.mubr.bf16.gmra.mxu1 %v4933_v59  ;;  %1892 = vmatmul.mubr.bf16.gmra.mxu0 %v4934_v60  ;;  %v5003_v59 = vld [vmem:[#allocation2 + $0x2e0] ss:$36 sps:$4 sm:$0xff]   ;;  %v5004_v60 = vld [vmem:[#allocation2 + $0xa8] ss:$36 sps:$4 sm:$0xff]  }
  0xa8   :  { %1802 = vmatprep.mubr.bf16.mxu1 %v4935_v61  ;;  %1899 = vmatprep.mubr.bf16.mxu0 %v4937_v63  ;;  %v2709_v61 = vld [vmem:[%s7148_s3 + $0xb8] sm:$0xff] }
  0xa9   :  { %4721 = vmatpush3.bf16.msra.mxu0 %v4956_v58  ;;  %v2708_v58 = vld [vmem:[%s7148_s3 + $0xb0] sm:$0xff] }
  0xaa   :  { %4722 = vmatprep.subr.bf16.mxu0 %v4972_v0  ;;  %2787 = vperm.xlu0 %4796, %v2708_v58   ;;  %v5008_v63 = vld [vmem:[#allocation2 + $0xf4] ss:$36 sps:$4 sm:$0xff]   ;;  %v5041_v58 = vld [vmem:[#allocation2 + $0x20] ss:$36 sps:$4 sm:$0xff]  }
  0xad   :  { %4723 = vmatpush3.bf16.msra.mxu0 %v4972_v0  ;;  %v2710_v0 = vld [vmem:[%s7148_s3 + $0xc0] sm:$0xff] }
  0xae   :  { %4724 = vmatprep.subr.bf16.mxu0 %v4992_v3  ;;  %2790 = vperm.xlu0 %4796, %v2709_v61  }
  0xaf   :  { %1803 = vmatmul.mubr.bf16.gmra.mxu1 %v4939_v2  ;;  %1900 = vmatmul.mubr.bf16.gmra.mxu0 %v4940_v4  ;;  %v5011_v2 = vld [vmem:[#allocation2 + $0xf0] ss:$36 sps:$4 sm:$0xff]  }
  0xb0   :  { %1810 = vmatprep.mubr.bf16.mxu1 %v4944_v5  ;;  %1907 = vmatprep.mubr.bf16.mxu0 %v4946_v7  ;;  %v5012_v4 = vld [vmem:[#allocation2 + $0x374] ss:$36 sps:$4 sm:$0xff]   ;;  %v5014_v5 = vld [vmem:[#allocation2 + $0x13c] ss:$36 sps:$4 sm:$0xff]  }
  0xb1   :  { %4725 = vmatpush3.bf16.msra.mxu0 %v4992_v3  ;;  %v2711_v3 = vld [vmem:[%s7148_s3 + $0xc8] sm:$0xff]  ;;  %v5016_v7 = vld [vmem:[#allocation2 + $0x370] ss:$36 sps:$4 sm:$0xff]  }
  0xb2   :  { %4726 = vmatprep.subr.bf16.mxu0 %v5005_v8  ;;  %2793 = vperm.xlu0 %4796, %v2710_v0  }
  0xb5   :  { %4727 = vmatpush3.bf16.msra.mxu0 %v5005_v8  ;;  %v5017_v8 = vld [vmem:[#allocation2 + $0x138] ss:$36 sps:$4 sm:$0xff]  }
  0xb6   :  { %4728 = vmatprep.subr.bf16.mxu0 %v5018_v11  ;;  %2796 = vperm.xlu0 %4796, %v2711_v3  }
  0xb7   :  { %1811 = vmatmul.mubr.bf16.gmra.mxu1 %v4948_v10  ;;  %1908 = vmatmul.mubr.bf16.gmra.mxu0 %v4949_v12  ;;  %v5019_v10 = vld [vmem:[#allocation2 + $0x3bc] ss:$36 sps:$4 sm:$0xff]  }
  0xb8   :  { %1818 = vmatprep.mubr.bf16.mxu1 %v4950_v14  ;;  %1915 = vmatprep.mubr.bf16.mxu0 %v4952_v15  ;;  %v2715_v14 = vld [vmem:[%s7148_s3 + $0xe8] sm:$0xff] }
  0xb9   :  { %4729 = vmatpush3.bf16.msra.mxu0 %v5018_v11  ;;  %v5021_v11 = vld [vmem:[#allocation2 + $0x184] ss:$36 sps:$4 sm:$0xff]  }
  0xba   :  { %4730 = vmatprep.subr.bf16.mxu0 %v5031_v16  ;;  %2799 = vperm.xlu0 %4796, %v2712_v6  }
  0xbd   :  { %4731 = vmatpush3.bf16.msra.mxu0 %v5031_v16 }
  0xbe   :  { %2805 = vperm.xlu0 %4796, %v2714_v9   ;;  %v5045_v9 = vld [vmem:[#allocation2 + $0x2a4] ss:$36 sps:$4 sm:$0xff]  }
  0xbf   :  { %1819 = vmatmul.mubr.bf16.gmra.mxu1 %v4954_v18  ;;  %1916 = vmatmul.mubr.bf16.gmra.mxu0 %v4955_v19 }
  0xc0   :  { %1826 = vmatprep.mubr.bf16.mxu1 %v4959_v21  ;;  %1923 = vmatprep.mubr.bf16.mxu0 %v4961_v22  ;;  %v5023_v21 = vld [vmem:[#allocation2 + $0x3b8] ss:$36 sps:$4 sm:$0xff]   ;;  %v5024_v22 = vld [vmem:[#allocation2 + $0x180] ss:$36 sps:$4 sm:$0xff]  }
  0xc2   :  { %2808 = vperm.xlu0 %4796, %v2715_v14  }
  0xc6   :  { %2811 = vperm.xlu0 %4796, %v2716_v23  }
  0xc7   :  { %1827 = vmatmul.mubr.bf16.gmra.mxu1 %v4963_v24  ;;  %1924 = vmatmul.mubr.bf16.gmra.mxu0 %v4964_v25  ;;  %v5025_v24 = vld [vmem:[#allocation2 + $0x404] ss:$36 sps:$4 sm:$0xff]   ;;  %v5027_v25 = vld [vmem:[#allocation2 + $0x1cc] ss:$36 sps:$4 sm:$0xff]  }
  0xc8   :  { %1834 = vmatprep.mubr.bf16.mxu1 %v4965_v27  ;;  %1931 = vmatprep.mubr.bf16.mxu0 %v4967_v28 }
  0xcf   :  { %1835 = vmatmul.mubr.bf16.gmra.mxu1 %v4969_v30  ;;  %1932 = vmatmul.mubr.bf16.gmra.mxu0 %v4970_v31 }
  0xd0   :  { %1842 = vmatprep.mubr.bf16.mxu1 %v4976_v32  ;;  %1939 = vmatprep.mubr.bf16.mxu0 %v4978_v34  ;;  %v2717_v32 = vld [vmem:[%s7148_s3 + $0xf8] sm:$0xff] }
  0xd1   :  { %2814 = vperm.xlu0 %4796, %v2717_v32   ;;  %v5050_v32 = vld [vmem:[#allocation2 + $0x2ec] ss:$36 sps:$4 sm:$0xff]  }
  0xd7   :  { %1843 = vmatmul.mubr.bf16.gmra.mxu1 %v4980_v37  ;;  %1940 = vmatmul.mubr.bf16.gmra.mxu0 %v4981_v38 }
  0xd8   :  { %1947 = vmatprep.mubr.bf16.mxu0 %v4986_v40  ;;  %2044 = vmatprep.mubr.bf16.mxu1 %v4990_v41  ;;  %v5030_v40 = vld [vmem:[#allocation2 + $0x1c8] ss:$36 sps:$4 sm:$0xff]  }
  0xd9   :  { %v5032_v41 = vld [vmem:[#allocation2 + $0x44c] ss:$36 sps:$4 sm:$0xff]  }
  0xdf   :  { %1948 = vmatmul.mubr.bf16.gmra.mxu0 %v4991_v46  ;;  %2045 = vmatmul.mubr.bf16.vlgmr.msra.gmra.mxu1 %v4988_v45 }
  0xe0   :  { %1955 = vmatprep.mubr.bf16.mxu0 %v4993_v48  ;;  %2052 = vmatprep.mubr.bf16.mxu1 %v4995_v49 }
  0xe7   :  { %1956 = vmatmul.mubr.bf16.gmra.mxu0 %v4997_v53  ;;  %2053 = vmatmul.mubr.bf16.gmra.mxu1 %v4998_v54 }
  0xe8   :  { %1963 = vmatprep.mubr.bf16.mxu0 %v4999_v56  ;;  %2060 = vmatprep.mubr.bf16.mxu1 %v5001_v57  ;;  %v5037_v56 = vld [vmem:[#allocation2 + $0x210] ss:$36 sps:$4 sm:$0xff]   ;;  %v5040_v57 = vld [vmem:[#allocation2 + $0x25c] ss:$36 sps:$4 sm:$0xff]  }
  0xef   :  { %1964 = vmatmul.mubr.bf16.gmra.mxu0 %v5003_v59  ;;  %2061 = vmatmul.mubr.bf16.gmra.mxu1 %v5004_v60 }
  0xf0   :  { %1971 = vmatprep.mubr.bf16.mxu0 %v5006_v62  ;;  %2068 = vmatprep.mubr.bf16.mxu1 %v5008_v63 }
  0xf7   :  { %1972 = vmatmul.mubr.bf16.gmra.mxu0 %v5010_v1  ;;  %2069 = vmatmul.mubr.bf16.gmra.mxu1 %v5011_v2 }
  0xf8   :  { %1979 = vmatprep.mubr.bf16.mxu0 %v5012_v4  ;;  %2076 = vmatprep.mubr.bf16.mxu1 %v5014_v5 }
  0xff   :  { %v4260_v12 = vpop.f32.mrf.mxu0  ;;  %v4332_v13 = vpop.f32.mrf.mxu1  ;;  %1980 = vmatmul.mubr.bf16.gmra.mxu0 %v5016_v7  ;;  %2077 = vmatmul.mubr.bf16.gmra.mxu1 %v5017_v8  ;;  %v5038_v7 = vld [vmem:[#allocation2 + $0x258] ss:$36 sps:$4 sm:$0xff]   ;;  %v5042_v8 = vld [vmem:[#allocation2 + $0x68] ss:$36 sps:$4 sm:$0xff]  }
 0x100   :  { %1987 = vmatprep.mubr.bf16.mxu0 %v5019_v10  ;;  %2084 = vmatprep.mubr.bf16.mxu1 %v5021_v11  ;;  %v5046_v10 = vld [vmem:[#allocation2 + $0xb0] ss:$36 sps:$4 sm:$0xff]  }
 0x101   :  { %v4261_v15 = vpop.f32.mrf.mxu0  ;;  %v4333_v16 = vpop.f32.mrf.mxu1 }
 0x102   :  { %v5478_v17 = vadd.f32 %v4261_v15, %v4260_v12  ;;  %v5480_v18 = vadd.f32 %v4333_v16, %v4332_v13  ;;  %v5519_v15 = vld [vmem:[%s7147_s2] ss:$0 sm:$0xff] }
 0x103   :  { %v4263_v19 = vpop.f32.mrf.mxu0  ;;  %v4335_v20 = vpop.f32.mrf.mxu1 }
 0x105   :  { %v4264_v26 = vpop.f32.mrf.mxu0  ;;  %v4336_v27 = vpop.f32.mrf.mxu1 }
 0x106   :  { %v5485_v28 = vadd.f32 %v4264_v26, %v4263_v19  ;;  %v5487_v29 = vadd.f32 %v4336_v27, %v4335_v20  ;;  %v5043_v27 = vld [vmem:[#allocation2 + $0x2a0] ss:$36 sps:$4 sm:$0xff]  }
 0x107   :  { %v4266_v30 = vpop.f32.mrf.mxu0  ;;  %v4338_v31 = vpop.f32.mrf.mxu1  ;;  %1988 = vmatmul.mubr.bf16.gmra.mxu0 %v5023_v21  ;;  %2085 = vmatmul.mubr.bf16.gmra.mxu1 %v5024_v22  ;;  %v1564_v22 = vadd.f32 %v5478_v17, %v5519_v15 }
 0x108   :  { %1995 = vmatprep.mubr.bf16.mxu0 %v5025_v24  ;;  %2092 = vmatprep.mubr.bf16.mxu1 %v5027_v25 }
 0x109   :  { %v4267_v33 = vpop.f32.mrf.mxu0  ;;  %v4339_v34 = vpop.f32.mrf.mxu1 }
 0x10a   :  { %v5492_v35 = vadd.f32 %v4267_v33, %v4266_v30  ;;  %v5494_v36 = vadd.f32 %v4339_v34, %v4338_v31  ;;  %v5047_v30 = vld [vmem:[#allocation2 + $0xf8] ss:$36 sps:$4 sm:$0xff]   ;;  %v5051_v33 = vld [vmem:[#allocation2 + $0x140] ss:$36 sps:$4 sm:$0xff]  }
 0x10b   :  { %v4269_v37 = vpop.f32.mrf.mxu0  ;;  %v4341_v38 = vpop.f32.mrf.mxu1 }
 0x10d   :  { %v4270_v43 = vpop.f32.mrf.mxu0  ;;  %v4342_v44 = vpop.f32.mrf.mxu1 }
 0x10e   :  { %v5496_v45 = vadd.f32 %v4270_v43, %v4269_v37  ;;  %v5498_v46 = vadd.f32 %v4342_v44, %v4341_v38  ;;  %v1567_v38 = vadd.f32 %v5485_v28, %v5519_v15 }
 0x10f   :  { %v4272_v47 = vpop.f32.mrf.mxu0  ;;  %v4344_v48 = vpop.f32.mrf.mxu1  ;;  %1996 = vmatmul.mubr.bf16.gmra.mxu0 %v5029_v39  ;;  %2093 = vmatmul.mubr.bf16.gmra.mxu1 %v5030_v40 }
 0x110   :  { %2003 = vmatprep.mubr.bf16.mxu0 %v5032_v41  ;;  %2100 = vmatprep.mubr.bf16.mxu1 %v5034_v42 }
 0x111   :  { %v4273_v49 = vpop.f32.mrf.mxu0  ;;  %v4345_v50 = vpop.f32.mrf.mxu1 }
 0x112   :  { %v5500_v51 = vadd.f32 %v4273_v49, %v4272_v47  ;;  %v5502_v52 = vadd.f32 %v4345_v50, %v4344_v48  ;;  %v1572_v47 = vadd.f32 %v5492_v35, %v5519_v15 }
 0x113   :  { %v4275_v53 = vpop.f32.mrf.mxu0  ;;  %v4347_v54 = vpop.f32.mrf.mxu1 }
 0x115   :  { %v4276_v59 = vpop.f32.mrf.mxu0  ;;  %v4348_v60 = vpop.f32.mrf.mxu1 }
 0x116   :  { %v5504_v61 = vadd.f32 %v4276_v59, %v4275_v53  ;;  %v5506_v62 = vadd.f32 %v4348_v60, %v4347_v54  ;;  %v5048_v53 = vld [vmem:[#allocation2 + $0x2e8] ss:$36 sps:$4 sm:$0xff]   ;;  %v1575_v60 = vadd.f32 %v5496_v45, %v5519_v15 }
 0x117   :  { %v4278_v63 = vpop.f32.mrf.mxu0  ;;  %v4350_v0 = vpop.f32.mrf.mxu1  ;;  %2004 = vmatmul.mubr.bf16.gmra.mxu0 %v5036_v55  ;;  %2101 = vmatmul.mubr.bf16.gmra.mxu1 %v5037_v56  ;;  %v5052_v54 = vld [vmem:[#allocation2 + $0x188] ss:$36 sps:$4 sm:$0xff]   ;;  %v5055_v56 = vld [vmem:[#allocation2 + $0x334] ss:$36 sps:$4 sm:$0xff]  }
 0x118   :  { %2108 = vmatprep.mubr.bf16.mxu1 %v5040_v57  ;;  %4732 = vmatprep.mubr.bf16.mxu0 %v5041_v58  ;;  %v5056_v57 = vld [vmem:[#allocation2 + $0x1d0] ss:$36 sps:$4 sm:$0xff]  }
 0x119   :  { %v4279_v1 = vpop.f32.mrf.mxu0  ;;  %v4351_v2 = vpop.f32.mrf.mxu1 }
 0x11a   :  { %v5508_v3 = vadd.f32 %v4279_v1, %v4278_v63  ;;  %v5510_v4 = vadd.f32 %v4351_v2, %v4350_v0 }
 0x11b   :  { %v4281_v5 = vpop.f32.mrf.mxu0  ;;  %v4353_v6 = vpop.f32.mrf.mxu1 }
 0x11d   :  { %v4282_v11 = vpop.f32.mrf.mxu0  ;;  %v4354_v12 = vpop.f32.mrf.mxu1 }
 0x11e   :  { %v5512_v13 = vadd.f32 %v4282_v11, %v4281_v5  ;;  %v5514_v14 = vadd.f32 %v4354_v12, %v4353_v6  ;;  %v5053_v11 = vld [vmem:[#allocation2 + $0x330] ss:$36 sps:$4 sm:$0xff]   ;;  %v5057_v12 = vld [vmem:[#allocation2 + $0x218] ss:$36 sps:$4 sm:$0xff]  }
 0x11f   :  { %v4284_v16 = vpop.f32.mrf.mxu0  ;;  %v4372_v19 = vpop.f32.mrf.mxu1  ;;  %2109 = vmatmul.mubr.bf16.gmra.mxu1 %v5038_v7  ;;  %4733 = vmatmul.mubr.bf16.vlgmr.msra.gmra.mxu0 %v5042_v8  ;;  %v1580_v7 = vadd.f32 %v5500_v51, %v5519_v15 }
 0x120   :  { %2116 = vmatprep.mubr.bf16.mxu1 %v5045_v9  ;;  %4736 = vmatprep.mubr.bf16.mxu0 %v5046_v10 }
 0x121   :  { %v4285_v20 = vpop.f32.mrf.mxu0  ;;  %v4373_v21 = vpop.f32.mrf.mxu1 }
 0x122   :  { %v5523_v23 = vadd.f32 %v4285_v20, %v4284_v16  ;;  %v4374_v24 = vadd.f32 %v4373_v21, %v4372_v19  ;;  %v5060_v19 = vld [vmem:[#allocation2 + $0x37c] ss:$36 sps:$4 sm:$0xff]  }
 0x123   :  { %v4287_v25 = vpop.f32.mrf.mxu0  ;;  %v4375_v26 = vpop.f32.mrf.mxu1  ;;  %v5061_v20 = vld [vmem:[#allocation2 + $0x260] ss:$36 sps:$4 sm:$0xff]  }
 0x124   :  { %v5525_v31 = vadd.f32 %v4374_v24, %v1564_v22  ;;  %v1583_v24 = vadd.f32 %v5504_v61, %v5519_v15 }
 0x125   :  { %v4288_v34 = vpop.f32.mrf.mxu0  ;;  %v4376_v37 = vpop.f32.mrf.mxu1 }
 0x126   :  { %v5529_v39 = vadd.f32 %v4288_v34, %v4287_v25  ;;  %v4377_v40 = vadd.f32 %v4376_v37, %v4375_v26  ;;  %v1588_v34 = vadd.f32 %v5508_v3, %v5519_v15 }
 0x127   :  { %v4290_v17 = vpop.f32.mrf.mxu0  ;;  %v4378_v41 = vpop.f32.mrf.mxu1  ;;  %2117 = vmatmul.mubr.bf16.gmra.mxu1 %v5043_v27  ;;  %4737 = vmatmul.mubr.bf16.gmra.mxu0 %v5047_v30 }
 0x128   :  { %v5531_v42 = vadd.f32 %v4377_v40, %v1567_v38  ;;  %2124 = vmatprep.mubr.bf16.mxu1 %v5050_v32  ;;  %4740 = vmatprep.mubr.bf16.mxu0 %v5051_v33 }
 0x129   :  { %v4291_v43 = vpop.f32.mrf.mxu0  ;;  %v4379_v44 = vpop.f32.mrf.mxu1 }
 0x12a   :  { %v5535_v48 = vadd.f32 %v4291_v43, %v4290_v17  ;;  %v4380_v49 = vadd.f32 %v4379_v44, %v4378_v41  ;;  %v5058_v17 = vld [vmem:[#allocation2 + $0x378] ss:$36 sps:$4 sm:$0xff]   ;;  %v5062_v41 = vld [vmem:[#allocation2 + $0x2a8] ss:$36 sps:$4 sm:$0xff]  }
 0x12b   :  { %v4293_v28 = vpop.f32.mrf.mxu0  ;;  %v4381_v50 = vpop.f32.mrf.mxu1  ;;  %v5065_v44 = vld [vmem:[#allocation2 + $0x3c4] ss:$36 sps:$4 sm:$0xff]  }
 0x12c   :  { %v5537_v55 = vadd.f32 %v4380_v49, %v1572_v47  ;;  %v5066_v47 = vld [vmem:[#allocation2 + $0x2f0] ss:$36 sps:$4 sm:$0xff]  }
 0x12d   :  { %v4294_v58 = vpop.f32.mrf.mxu0  ;;  %v4382_v59 = vpop.f32.mrf.mxu1 }
 0x12e   :  { %v5541_v63 = vadd.f32 %v4294_v58, %v4293_v28  ;;  %v4383_v0 = vadd.f32 %v4382_v59, %v4381_v50  ;;  %v1591_v50 = vadd.f32 %v5512_v13, %v5519_v15 }
 0x12f   :  { %v4296_v35 = vpop.f32.mrf.mxu0  ;;  %v4384_v1 = vpop.f32.mrf.mxu1  ;;  %2125 = vmatmul.mubr.bf16.gmra.mxu1 %v5048_v53  ;;  %4741 = vmatmul.mubr.bf16.gmra.mxu0 %v5052_v54 }
 0x130   :  { %v5543_v2 = vadd.f32 %v4383_v0, %v1575_v60  ;;  %2132 = vmatprep.mubr.bf16.mxu1 %v5055_v56  ;;  %4744 = vmatprep.mubr.bf16.mxu0 %v5056_v57  ;;  %v1596_v60 = vadd.f32 %v5523_v23, %v5519_v15 }
 0x131   :  { %v4297_v5 = vpop.f32.mrf.mxu0  ;;  %v4385_v6 = vpop.f32.mrf.mxu1 }
 0x132   :  { %v5547_v8 = vadd.f32 %v4297_v5, %v4296_v35  ;;  %v4386_v9 = vadd.f32 %v4385_v6, %v4384_v1  ;;  %v5063_v5 = vld [vmem:[#allocation2 + $0x3c0] ss:$36 sps:$4 sm:$0xff]   ;;  %v5067_v6 = vld [vmem:[#allocation2 + $0x338] ss:$36 sps:$4 sm:$0xff]  }
 0x133   :  { %v4299_v45 = vpop.f32.mrf.mxu0  ;;  %v4387_v10 = vpop.f32.mrf.mxu1 }
 0x134   :  { %v5549_v16 = vadd.f32 %v4386_v9, %v1580_v7  ;;  %v5070_v9 = vld [vmem:[#allocation2 + $0x40c] ss:$36 sps:$4 sm:$0xff]  }
 0x135   :  { %v4300_v21 = vpop.f32.mrf.mxu0  ;;  %v4388_v22 = vpop.f32.mrf.mxu1 }
 0x136   :  { %v5553_v25 = vadd.f32 %v4300_v21, %v4299_v45  ;;  %v4389_v26 = vadd.f32 %v4388_v22, %v4387_v10  ;;  %v5071_v45 = vld [vmem:[#allocation2 + $0x380] ss:$36 sps:$4 sm:$0xff]  }
 0x137   :  { %v4302_v51 = vpop.f32.mrf.mxu0  ;;  %v4390_v27 = vpop.f32.mrf.mxu1  ;;  %2133 = vmatmul.mubr.bf16.gmra.mxu1 %v5053_v11  ;;  %4745 = vmatmul.mubr.bf16.gmra.mxu0 %v5057_v12  ;;  %v1599_v12 = vadd.f32 %v5529_v39, %v5519_v15 }
 0x138   :  { %v5555_v30 = vadd.f32 %v4389_v26, %v1583_v24  ;;  %2140 = vmatprep.mubr.bf16.mxu1 %v5060_v19  ;;  %4748 = vmatprep.mubr.bf16.mxu0 %v5061_v20 }
 0x139   :  { %v4303_v32 = vpop.f32.mrf.mxu0  ;;  %v4391_v33 = vpop.f32.mrf.mxu1 }
 0x13a   :  { %v5559_v37 = vadd.f32 %v4303_v32, %v4302_v51  ;;  %v4392_v38 = vadd.f32 %v4391_v33, %v4390_v27  ;;  %v1604_v51 = vadd.f32 %v5535_v48, %v5519_v15 }
 0x13b   :  { %v4305_v61 = vpop.f32.mrf.mxu0  ;;  %v4393_v40 = vpop.f32.mrf.mxu1 }
 0x13c   :  { %v5561_v43 = vadd.f32 %v4392_v38, %v1588_v34  ;;  %v5068_v34 = vld [vmem:[#allocation2 + $0x408] ss:$36 sps:$4 sm:$0xff]  }
 0x13d   :  { %v4306_v49 = vpop.f32.mrf.mxu0  ;;  %v4394_v28 = vpop.f32.mrf.mxu1  ;;  %v5072_v38 = vld [vmem:[#allocation2 + $0x3c8] ss:$36 sps:$4 sm:$0xff]  }
 0x13e   :  { %v5565_v53 = vadd.f32 %v4306_v49, %v4305_v61  ;;  %v4395_v54 = vadd.f32 %v4394_v28, %v4393_v40  ;;  %v5075_v40 = vld [vmem:[#allocation2 + $0x454] ss:$36 sps:$4 sm:$0xff]  }
 0x13f   :  { %v4308_v3 = vpop.f32.mrf.mxu0  ;;  %v4396_v56 = vpop.f32.mrf.mxu1  ;;  %2141 = vmatmul.mubr.bf16.gmra.mxu1 %v5058_v17  ;;  %4749 = vmatmul.mubr.bf16.gmra.mxu0 %v5062_v41  ;;  %v5076_v17 = vld [vmem:[#allocation2 + $0x410] ss:$36 sps:$4 sm:$0xff]  }
 0x140   :  { %v5567_v57 = vadd.f32 %v4395_v54, %v1591_v50  ;;  %2148 = vmatprep.mubr.bf16.mxu1 %v5065_v44  ;;  %4752 = vmatprep.mubr.bf16.mxu0 %v5066_v47  ;;  %v1607_v47 = vadd.f32 %v5541_v63, %v5519_v15 }
 0x141   :  { %v4309_v58 = vpop.f32.mrf.mxu0  ;;  %v4397_v59 = vpop.f32.mrf.mxu1 }
 0x142   :  { %v5571_v0 = vadd.f32 %v4309_v58, %v4308_v3  ;;  %v4398_v35 = vadd.f32 %v4397_v59, %v4396_v56  ;;  %v1612_v58 = vadd.f32 %v5547_v8, %v5519_v15 }
 0x143   :  { %v4311_v13 = vpop.f32.mrf.mxu0  ;;  %v4399_v1 = vpop.f32.mrf.mxu1 }
 0x144   :  { %v5573_v7 = vadd.f32 %v4398_v35, %v1596_v60 }
 0x145   :  { %v4312_v10 = vpop.f32.mrf.mxu0  ;;  %v4400_v11 = vpop.f32.mrf.mxu1 }
 0x146   :  { %v5577_v19 = vadd.f32 %v4312_v10, %v4311_v13  ;;  %v4401_v20 = vadd.f32 %v4400_v11, %v4399_v1  ;;  %v5073_v13 = vld [vmem:[#allocation2 + $0x450] ss:$36 sps:$4 sm:$0xff]   ;;  %v5077_v1 = vld [vmem:[#allocation2 + $0x458] ss:$36 sps:$4 sm:$0xff]  }
 0x147   :  { %v4314_v23 = vpop.f32.mrf.mxu0  ;;  %v4402_v21 = vpop.f32.mrf.mxu1  ;;  %2149 = vmatmul.mubr.bf16.gmra.mxu1 %v5063_v5  ;;  %4753 = vmatmul.mubr.bf16.gmra.mxu0 %v5067_v6 }
 0x148   :  { %v5579_v22 = vadd.f32 %v4401_v20, %v1599_v12  ;;  %2156 = vmatprep.mubr.bf16.mxu1 %v5070_v9  ;;  %4756 = vmatprep.mubr.bf16.mxu0 %v5071_v45  ;;  %v1615_v45 = vadd.f32 %v5553_v25, %v5519_v15 }
 0x149   :  { %v4315_v24 = vpop.f32.mrf.mxu0  ;;  %v4403_v26 = vpop.f32.mrf.mxu1 }
 0x14a   :  { %v5583_v27 = vadd.f32 %v4315_v24, %v4314_v23  ;;  %v4404_v32 = vadd.f32 %v4403_v26, %v4402_v21  ;;  %v1620_v24 = vadd.f32 %v5559_v37, %v5519_v15 }
 0x14b   :  { %v4317_v39 = vpop.f32.mrf.mxu0  ;;  %v4405_v33 = vpop.f32.mrf.mxu1 }
 0x14c   :  { %v5585_v61 = vadd.f32 %v4404_v32, %v1604_v51 }
 0x14d   :  { %v4318_v41 = vpop.f32.mrf.mxu0  ;;  %v4406_v44 = vpop.f32.mrf.mxu1 }
 0x14e   :  { %v5589_v49 = vadd.f32 %v4318_v41, %v4317_v39  ;;  %v4407_v28 = vadd.f32 %v4406_v44, %v4405_v33 }
 0x14f   :  { %v4320_v48 = vpop.f32.mrf.mxu0  ;;  %v4408_v50 = vpop.f32.mrf.mxu1  ;;  %2157 = vmatmul.mubr.bf16.gmra.mxu1 %v5068_v34  ;;  %4757 = vmatmul.mubr.bf16.gmra.mxu0 %v5072_v38  ;;  %v1623_v38 = vadd.f32 %v5565_v53, %v5519_v15 }
 0x150   :  { %v5591_v54 = vadd.f32 %v4407_v28, %v1607_v47  ;;  %2164 = vmatprep.mubr.bf16.mxu1 %v5075_v40  ;;  %4760 = vmatprep.mubr.bf16.mxu0 %v5076_v17 }
 0x151   :  { %v4321_v3 = vpop.f32.mrf.mxu0  ;;  %v4409_v56 = vpop.f32.mrf.mxu1 }
 0x152   :  { %v5595_v59 = vadd.f32 %v4321_v3, %v4320_v48  ;;  %v4410_v60 = vadd.f32 %v4409_v56, %v4408_v50  ;;  %v1628_v48 = vadd.f32 %v5571_v0, %v5519_v15 }
 0x153   :  { %v4323_v63 = vpop.f32.mrf.mxu0  ;;  %v4411_v35 = vpop.f32.mrf.mxu1 }
 0x154   :  { %v5597_v5 = vadd.f32 %v4410_v60, %v1612_v58 }
 0x155   :  { %v4324_v6 = vpop.f32.mrf.mxu0  ;;  %v4412_v9 = vpop.f32.mrf.mxu1 }
 0x156   :  { %v5601_v10 = vadd.f32 %v4324_v6, %v4323_v63  ;;  %v4413_v11 = vadd.f32 %v4412_v9, %v4411_v35 }
 0x157   :  { %v4326_v12 = vpop.f32.mrf.mxu0  ;;  %v4414_v20 = vpop.f32.mrf.mxu1  ;;  %2165 = vmatmul.mubr.bf16.gmra.mxu1 %v5073_v13  ;;  %4761 = vmatmul.mubr.bf16.gmra.mxu0 %v5077_v1  ;;  %v1631_v13 = vadd.f32 %v5577_v19, %v5519_v15 }
 0x158   :  { %v5603_v8 = vadd.f32 %v4413_v11, %v1615_v45 }
 0x159   :  { %v4327_v23 = vpop.f32.mrf.mxu0  ;;  %v4415_v21 = vpop.f32.mrf.mxu1 }
 0x15a   :  { %v5607_v26 = vadd.f32 %v4327_v23, %v4326_v12  ;;  %v4416_v51 = vadd.f32 %v4415_v21, %v4414_v20 }
 0x15b   :  { %v4329_v32 = vpop.f32.mrf.mxu0  ;;  %v4417_v39 = vpop.f32.mrf.mxu1 }
 0x15c   :  { %v5609_v25 = vadd.f32 %v4416_v51, %v1620_v24 }
 0x15d   :  { %v4330_v33 = vpop.f32.mrf.mxu0  ;;  %v4418_v34 = vpop.f32.mrf.mxu1 }
 0x15e   :  { %v5613_v40 = vadd.f32 %v4330_v33, %v4329_v32  ;;  %v4419_v17 = vadd.f32 %v4418_v34, %v4417_v39 }
 0x15f   :  { %v4420_v41 = vpop.f32.mrf.mxu1  ;;  %v4484_v44 = vpop.f32.mrf.mxu0 }
 0x160   :  { %v5615_v47 = vadd.f32 %v4419_v17, %v1623_v38 }
 0x161   :  { %v4421_v37 = vpop.f32.mrf.mxu1  ;;  %v4485_v28 = vpop.f32.mrf.mxu0 }
 0x162   :  { %v4422_v50 = vadd.f32 %v4421_v37, %v4420_v41  ;;  %v4486_v3 = vadd.f32 %v4485_v28, %v4484_v44 }
 0x163   :  { %v4423_v56 = vpop.f32.mrf.mxu1  ;;  %v4487_v58 = vpop.f32.mrf.mxu0 }
 0x164   :  { %v5619_v60 = vadd.f32 %v4422_v50, %v1628_v48  ;;  %v5622_v53 = vadd.f32 %v4486_v3, %v5525_v31  ;;  %v1636_v31 = vadd.f32 %v5583_v27, %v5519_v15 }
 0x165   :  { %v4424_v63 = vpop.f32.mrf.mxu1  ;;  %v4488_v35 = vpop.f32.mrf.mxu0 }
 0x166   :  { %v4425_v1 = vadd.f32 %v4424_v63, %v4423_v56  ;;  %v4489_v6 = vadd.f32 %v4488_v35, %v4487_v58 }
 0x167   :  { %v4426_v9 = vpop.f32.mrf.mxu1  ;;  %v4490_v45 = vpop.f32.mrf.mxu0 }
 0x168   :  { %v5626_v11 = vadd.f32 %v4425_v1, %v1631_v13  ;;  %v5629_v0 = vadd.f32 %v4489_v6, %v5531_v42  ;;  %v1639_v42 = vadd.f32 %v5589_v49, %v5519_v15 }
 0x169   :  { %v4427_v12 = vpop.f32.mrf.mxu1  ;;  %v4491_v20 = vpop.f32.mrf.mxu0 }
 0x16a   :  { %v4428_v23 = vadd.f32 %v4427_v12, %v4426_v9  ;;  %v4492_v21 = vadd.f32 %v4491_v20, %v4490_v45 }
 0x16b   :  { %v4429_v24 = vpop.f32.mrf.mxu1  ;;  %v4493_v51 = vpop.f32.mrf.mxu0 }
 0x16c   :  { %v5633_v32 = vadd.f32 %v4428_v23, %v1636_v31  ;;  %v5636_v19 = vadd.f32 %v4492_v21, %v5537_v55  ;;  %v1644_v55 = vadd.f32 %v5595_v59, %v5519_v15 }
 0x16d   :  { %v4430_v39 = vpop.f32.mrf.mxu1  ;;  %v4494_v33 = vpop.f32.mrf.mxu0 }
 0x16e   :  { %v4431_v34 = vadd.f32 %v4430_v39, %v4429_v24  ;;  %v4495_v38 = vadd.f32 %v4494_v33, %v4493_v51 }
 0x16f   :  { %v4432_v17 = vpop.f32.mrf.mxu1  ;;  %v4496_v41 = vpop.f32.mrf.mxu0 }
 0x170   :  { %v5640_v44 = vadd.f32 %v4431_v34, %v1639_v42  ;;  %v5643_v27 = vadd.f32 %v4495_v38, %v5543_v2  ;;  %v1647_v2 = vadd.f32 %v5601_v10, %v5519_v15 }
 0x171   :  { %v4433_v37 = vpop.f32.mrf.mxu1  ;;  %v4497_v28 = vpop.f32.mrf.mxu0 }
 0x172   :  { %v4434_v48 = vadd.f32 %v4433_v37, %v4432_v17  ;;  %v4498_v50 = vadd.f32 %v4497_v28, %v4496_v41 }
 0x173   :  { %v4435_v3 = vpop.f32.mrf.mxu1  ;;  %v4499_v56 = vpop.f32.mrf.mxu0 }
 0x174   :  { %v5647_v58 = vadd.f32 %v4434_v48, %v1644_v55  ;;  %v5650_v49 = vadd.f32 %v4498_v50, %v5549_v16  ;;  %v1652_v16 = vadd.f32 %v5607_v26, %v5519_v15 }
 0x175   :  { %v4436_v63 = vpop.f32.mrf.mxu1  ;;  %v4500_v35 = vpop.f32.mrf.mxu0 }
 0x176   :  { %v4437_v13 = vadd.f32 %v4436_v63, %v4435_v3  ;;  %v4501_v1 = vadd.f32 %v4500_v35, %v4499_v56 }
 0x177   :  { %v4438_v6 = vpop.f32.mrf.mxu1  ;;  %v4502_v9 = vpop.f32.mrf.mxu0 }
 0x178   :  { %v5654_v45 = vadd.f32 %v4437_v13, %v1647_v2  ;;  %v5657_v59 = vadd.f32 %v4501_v1, %v5555_v30  ;;  %v1655_v30 = vadd.f32 %v5613_v40, %v5519_v15 }
 0x179   :  { %v4439_v12 = vpop.f32.mrf.mxu1  ;;  %v4503_v20 = vpop.f32.mrf.mxu0 }
 0x17a   :  { %v4440_v31 = vadd.f32 %v4439_v12, %v4438_v6  ;;  %v4504_v23 = vadd.f32 %v4503_v20, %v4502_v9 }
 0x17b   :  { %v4441_v21 = vpop.f32.mrf.mxu1  ;;  %v4505_v24 = vpop.f32.mrf.mxu0 }
 0x17c   :  { %v5661_v51 = vadd.f32 %v4440_v31, %v1652_v16  ;;  %v5664_v10 = vadd.f32 %v4504_v23, %v5561_v43  ;;  %v1660_v43 = vadd.f32 %v5480_v18, %v5519_v15 }
 0x17d   :  { %v4442_v39 = vpop.f32.mrf.mxu1  ;;  %v4506_v33 = vpop.f32.mrf.mxu0 }
 0x17e   :  { %v4443_v42 = vadd.f32 %v4442_v39, %v4441_v21  ;;  %v4507_v34 = vadd.f32 %v4506_v33, %v4505_v24 }
 0x17f   :  { %v4444_v38 = vpop.f32.mrf.mxu1  ;;  %v4508_v17 = vpop.f32.mrf.mxu0 }
 0x180   :  { %v5668_v41 = vadd.f32 %v4443_v42, %v1655_v30  ;;  %v5671_v26 = vadd.f32 %v4507_v34, %v5567_v57  ;;  %v1663_v57 = vadd.f32 %v5487_v29, %v5519_v15 }
 0x181   :  { %v4445_v37 = vpop.f32.mrf.mxu1  ;;  %v4509_v28 = vpop.f32.mrf.mxu0 }
 0x182   :  { %v4446_v55 = vadd.f32 %v4445_v37, %v4444_v38  ;;  %v4510_v48 = vadd.f32 %v4509_v28, %v4508_v17 }
 0x183   :  { %v4447_v50 = vpop.f32.mrf.mxu1  ;;  %v4511_v3 = vpop.f32.mrf.mxu0 }
 0x184   :  { %v5675_v56 = vadd.f32 %v4446_v55, %v1660_v43  ;;  %v5678_v40 = vadd.f32 %v4510_v48, %v5573_v7  ;;  %v1668_v7 = vadd.f32 %v5494_v36, %v5519_v15 }
 0x185   :  { %v4448_v63 = vpop.f32.mrf.mxu1  ;;  %v4512_v35 = vpop.f32.mrf.mxu0 }
 0x186   :  { %v4449_v2 = vadd.f32 %v4448_v63, %v4447_v50  ;;  %v4513_v13 = vadd.f32 %v4512_v35, %v4511_v3 }
 0x187   :  { %v4450_v1 = vpop.f32.mrf.mxu1  ;;  %v4514_v6 = vpop.f32.mrf.mxu0 }
 0x188   :  { %v5682_v9 = vadd.f32 %v4449_v2, %v1663_v57  ;;  %v5685_v18 = vadd.f32 %v4513_v13, %v5579_v22  ;;  %v1671_v22 = vadd.f32 %v5498_v46, %v5519_v15 }
 0x189   :  { %v4451_v12 = vpop.f32.mrf.mxu1  ;;  %v4515_v20 = vpop.f32.mrf.mxu0 }
 0x18a   :  { %v4452_v16 = vadd.f32 %v4451_v12, %v4450_v1  ;;  %v4516_v31 = vadd.f32 %v4515_v20, %v4514_v6 }
 0x18b   :  { %v4453_v23 = vpop.f32.mrf.mxu1  ;;  %v4517_v21 = vpop.f32.mrf.mxu0 }
 0x18c   :  { %v5689_v24 = vadd.f32 %v4452_v16, %v1668_v7  ;;  %v5692_v29 = vadd.f32 %v4516_v31, %v5585_v61  ;;  %v1676_v61 = vadd.f32 %v5502_v52, %v5519_v15 }
 0x18d   :  { %v4454_v39 = vpop.f32.mrf.mxu1  ;;  %v4518_v33 = vpop.f32.mrf.mxu0 }
 0x18e   :  { %v4455_v30 = vadd.f32 %v4454_v39, %v4453_v23  ;;  %v4519_v42 = vadd.f32 %v4518_v33, %v4517_v21 }
 0x18f   :  { %v4456_v34 = vpop.f32.mrf.mxu1  ;;  %v4520_v38 = vpop.f32.mrf.mxu0 }
 0x190   :  { %v5696_v17 = vadd.f32 %v4455_v30, %v1671_v22  ;;  %v5699_v36 = vadd.f32 %v4519_v42, %v5591_v54  ;;  %v1679_v54 = vadd.f32 %v5506_v62, %v5519_v15 }
 0x191   :  { %v4457_v37 = vpop.f32.mrf.mxu1  ;;  %v4521_v28 = vpop.f32.mrf.mxu0 }
 0x192   :  { %v4458_v43 = vadd.f32 %v4457_v37, %v4456_v34  ;;  %v4522_v55 = vadd.f32 %v4521_v28, %v4520_v38 }
 0x193   :  { %v4459_v48 = vpop.f32.mrf.mxu1  ;;  %v4523_v50 = vpop.f32.mrf.mxu0 }
 0x194   :  { %v5703_v3 = vadd.f32 %v4458_v43, %v1676_v61  ;;  %v5706_v46 = vadd.f32 %v4522_v55, %v5597_v5  ;;  %v1684_v5 = vadd.f32 %v5510_v4, %v5519_v15 }
 0x195   :  { %v4460_v63 = vpop.f32.mrf.mxu1  ;;  %v4524_v35 = vpop.f32.mrf.mxu0 }
 0x196   :  { %v4461_v57 = vadd.f32 %v4460_v63, %v4459_v48  ;;  %v4525_v2 = vadd.f32 %v4524_v35, %v4523_v50 }
 0x197   :  { %v4462_v13 = vpop.f32.mrf.mxu1  ;;  %v4526_v1 = vpop.f32.mrf.mxu0 }
 0x198   :  { %v5710_v6 = vadd.f32 %v4461_v57, %v1679_v54  ;;  %v5713_v52 = vadd.f32 %v4525_v2, %v5603_v8  ;;  %v1687_v8 = vadd.f32 %v5514_v14, %v5519_v15 }
 0x199   :  { %v4463_v12 = vpop.f32.mrf.mxu1  ;;  %v4527_v20 = vpop.f32.mrf.mxu0 }
 0x19a   :  { %7222 = vst [vmem:[#allocation14_spill] sm:$0xff] %v5713_v52  ;;  %v4464_v7 = vadd.f32 %v4463_v12, %v4462_v13  ;;  %v4528_v16 = vadd.f32 %v4527_v20, %v4526_v1 }
 0x19b   :  { %v4465_v31 = vpop.f32.mrf.mxu1  ;;  %v4529_v23 = vpop.f32.mrf.mxu0 }
 0x19c   :  { %v5717_v21 = vadd.f32 %v4464_v7, %v1684_v5  ;;  %v5720_v62 = vadd.f32 %v4528_v16, %v5609_v25 }
 0x19d   :  { %v4466_v39 = vpop.f32.mrf.mxu1  ;;  %v4530_v33 = vpop.f32.mrf.mxu0 }
 0x19e   :  { %v4467_v22 = vadd.f32 %v4466_v39, %v4465_v31  ;;  %v4531_v30 = vadd.f32 %v4530_v33, %v4529_v23 }
 0x19f   :  { %v4532_v42 = vpop.f32.mrf.mxu0  ;;  %v5724_v34 = vpop.f32.mrf.mxu1 }
 0x1a0   :  { %v5726_v4 = vadd.f32 %v4467_v22, %v1687_v8  ;;  %v5729_v38 = vadd.f32 %v4531_v30, %v5615_v47 }
 0x1a1   :  { %v4533_v37 = vpop.f32.mrf.mxu0  ;;  %v5731_v28 = vpop.f32.mrf.mxu1 }
 0x1a2   :  { %v4534_v25 = vadd.f32 %v4533_v37, %v4532_v42 }
 0x1a3   :  { %v4535_v61 = vpop.f32.mrf.mxu0  ;;  %v5733_v43 = vpop.f32.mrf.mxu1 }
 0x1a4   :  { %v5736_v55 = vadd.f32 %v4534_v25, %v5619_v60 }
 0x1a5   :  { %v4536_v14 = vpop.f32.mrf.mxu0  ;;  %v5738_v15 = vpop.f32.mrf.mxu1 }
 0x1a6   :  { %7223 = vst [vmem:[#allocation15_spill] sm:$0xff] %v5736_v55  ;;  %v4537_v48 = vadd.f32 %v4536_v14, %v4535_v61 }
 0x1a7   :  { %v4538_v50 = vpop.f32.mrf.mxu0  ;;  %v5740_v63 = vpop.f32.mrf.mxu1 }
 0x1a8   :  { %v5743_v47 = vadd.f32 %v4537_v48, %v5626_v11 }
 0x1a9   :  { %v4539_v35 = vpop.f32.mrf.mxu0  ;;  %v5745_v54 = vpop.f32.mrf.mxu1 }
 0x1aa   :  { %7224 = vst [vmem:[#allocation16_spill] sm:$0xff] %v5743_v47  ;;  %v4540_v57 = vadd.f32 %v4539_v35, %v4538_v50 }
 0x1ab   :  { %v4541_v2 = vpop.f32.mrf.mxu0  ;;  %v5747_v13 = vpop.f32.mrf.mxu1 }
 0x1ac   :  { %v5750_v60 = vadd.f32 %v4540_v57, %v5633_v32 }
 0x1ad   :  { %v4542_v1 = vpop.f32.mrf.mxu0  ;;  %v5752_v12 = vpop.f32.mrf.mxu1 }
 0x1ae   :  { %7225 = vst [vmem:[#allocation17_spill] sm:$0xff] %v5750_v60  ;;  %v4543_v20 = vadd.f32 %v4542_v1, %v4541_v2 }
 0x1af   :  { %v4544_v5 = vpop.f32.mrf.mxu0  ;;  %v5754_v7 = vpop.f32.mrf.mxu1 }
 0x1b0   :  { %v5757_v11 = vadd.f32 %v4543_v20, %v5640_v44 }
 0x1b1   :  { %v4545_v16 = vpop.f32.mrf.mxu0  ;;  %v5759_v31 = vpop.f32.mrf.mxu1 }
 0x1b2   :  { %7226 = vst [vmem:[#allocation18_spill] sm:$0xff] %v5757_v11  ;;  %v4546_v23 = vadd.f32 %v4545_v16, %v4544_v5 }
 0x1b3   :  { %v4547_v39 = vpop.f32.mrf.mxu0  ;;  %v5761_v33 = vpop.f32.mrf.mxu1 }
 0x1b4   :  { %v5764_v32 = vadd.f32 %v4546_v23, %v5647_v58 }
 0x1b5   :  { %v4548_v8 = vpop.f32.mrf.mxu0  ;;  %v5766_v22 = vpop.f32.mrf.mxu1 }
 0x1b6   :  { %7227 = vst [vmem:[#allocation19_spill] sm:$0xff] %v5764_v32  ;;  %v4549_v30 = vadd.f32 %v4548_v8, %v4547_v39 }
 0x1b7   :  { %v4550_v42 = vpop.f32.mrf.mxu0  ;;  %v5768_v37 = vpop.f32.mrf.mxu1 }
 0x1b8   :  { %v5771_v44 = vadd.f32 %v4549_v30, %v5654_v45 }
 0x1b9   :  { %v4551_v25 = vpop.f32.mrf.mxu0  ;;  %v5773_v61 = vpop.f32.mrf.mxu1 }
 0x1ba   :  { %7228 = vst [vmem:[#allocation20_spill] sm:$0xff] %v5771_v44  ;;  %v4552_v14 = vadd.f32 %v4551_v25, %v4550_v42 }
 0x1bb   :  { %v4553_v48 = vpop.f32.mrf.mxu0  ;;  %v5775_v50 = vpop.f32.mrf.mxu1 }
 0x1bc   :  { %v5778_v58 = vadd.f32 %v4552_v14, %v5661_v51 }
 0x1bd   :  { %v4554_v35 = vpop.f32.mrf.mxu0  ;;  %v5780_v57 = vpop.f32.mrf.mxu1 }
 0x1be   :  { %7229 = vst [vmem:[#allocation21_spill] sm:$0xff] %v5778_v58  ;;  %v4555_v2 = vadd.f32 %v4554_v35, %v4553_v48 }
 0x1bf   :  { %v4556_v1 = vpop.f32.mrf.mxu0  ;;  %v5782_v20 = vpop.f32.mrf.mxu1 }
 0x1c0   :  { %v5785_v45 = vadd.f32 %v4555_v2, %v5668_v41 }
 0x1c1   :  { %v4557_v5 = vpop.f32.mrf.mxu0  ;;  %v5787_v16 = vpop.f32.mrf.mxu1 }
 0x1c2   :  { %7230 = vst [vmem:[#allocation22_spill] sm:$0xff] %v5785_v45  ;;  %v4558_v23 = vadd.f32 %v4557_v5, %v4556_v1  ;;  %v5805_v45 = vpop.permute.xlu0 %2721 }
 0x1c3   :  { %v4559_v39 = vpop.f32.mrf.mxu0  ;;  %v5789_v8 = vpop.f32.mrf.mxu1 }
 0x1c4   :  { %v5792_v51 = vadd.f32 %v4558_v23, %v5675_v56 }
 0x1c5   :  { %v4560_v30 = vpop.f32.mrf.mxu0  ;;  %v5794_v42 = vpop.f32.mrf.mxu1 }
 0x1c6   :  { %7231 = vst [vmem:[#allocation23_spill] sm:$0xff] %v5792_v51  ;;  %v4561_v25 = vadd.f32 %v4560_v30, %v4559_v39 }
 0x1c7   :  { %v4562_v14 = vpop.f32.mrf.mxu0  ;;  %v5796_v48 = vpop.f32.mrf.mxu1 }
 0x1c8   :  { %v5799_v41 = vadd.f32 %v4561_v25, %v5682_v9 }
 0x1c9   :  { %v4563_v35 = vpop.f32.mrf.mxu0  ;;  %v5801_v2 = vpop.f32.mrf.mxu1 }
 0x1ca   :  { %7232 = vst [vmem:[#allocation24_spill] sm:$0xff] %v5799_v41  ;;  %v4564_v1 = vadd.f32 %v4563_v35, %v4562_v14  ;;  %v5819_v35 = vpop.permute.xlu0 %2730 }
 0x1cb   :  { %v4565_v5 = vpop.f32.mrf.mxu0  ;;  %v5803_v44 = vpop.f32.mrf.mxu1 }
 0x1cc   :  { %v5808_v56 = vadd.f32 %v4564_v1, %v5689_v24 }
 0x1cd   :  { %v4566_v23 = vpop.f32.mrf.mxu0  ;;  %v5810_v39 = vpop.f32.mrf.mxu1 }
 0x1ce   :  { %7233 = vst [vmem:[#allocation25_spill] sm:$0xff] %v5808_v56  ;;  %v4567_v30 = vadd.f32 %v4566_v23, %v4565_v5 }
 0x1cf   :  { %v4568_v51 = vpop.f32.mrf.mxu0  ;;  %v5812_v32 = vpop.f32.mrf.mxu1 }
 0x1d0   :  { %v5815_v9 = vadd.f32 %v4567_v30, %v5696_v17  ;;  %v5830_v17 = vpop.permute.xlu0 %2739 }
 0x1d1   :  { %v4569_v25 = vpop.f32.mrf.mxu0  ;;  %v5817_v14 = vpop.f32.mrf.mxu1 }
 0x1d2   :  { %7234 = vst [vmem:[#allocation26_spill] sm:$0xff] %v5815_v9  ;;  %v4570_v41 = vadd.f32 %v4569_v25, %v4568_v51  ;;  %v4604_v25 = vadd.f32 %v5745_v54, %v5740_v63  ;;  %v4607_v63 = vadd.f32 %v5752_v12, %v5747_v13  ;;  %v4616_v12 = vadd.f32 %v5773_v61, %v5768_v37 }
 0x1d3   :  { %v4571_v58 = vpop.f32.mrf.mxu0  ;;  %v5821_v47 = vpop.f32.mrf.mxu1  ;;  %v4610_v37 = vadd.f32 %v5759_v31, %v5754_v7 }
 0x1d4   :  { %v5824_v24 = vadd.f32 %v4570_v41, %v5703_v3  ;;  %v5839_v3 = vpop.permute.xlu1 %2724  ;;  %v2071_v7 = vadd.f32 %v4616_v12, %v5664_v10 }
 0x1d5   :  { %v4572_v1 = vpop.f32.mrf.mxu0  ;;  %v5826_v5 = vpop.f32.mrf.mxu1 }
 0x1d6   :  { %7235 = vst [vmem:[#allocation27_spill] sm:$0xff] %v5824_v24  ;;  %v4573_v23 = vadd.f32 %v4572_v1, %v4571_v58  ;;  %v7151_v24 = vlaneseq  ;;  %v4598_v1 = vadd.f32 %v5731_v28, %v5724_v34 }
 0x1d7   :  { %v4574_v56 = vpop.f32.mrf.mxu0  ;;  %v5828_v11 = vpop.f32.mrf.mxu1 }
 0x1d8   :  { %v5833_v30 = vadd.f32 %v4573_v23, %v5710_v6  ;;  %v2728_v28 = vpop.permute.xlu1 %2727  ;;  %v2047_v13 = vadd.f32 %v4598_v1, %v5622_v53 }
 0x1d9   :  { %v4575_v9 = vpop.f32.mrf.mxu0  ;;  %v5835_v51 = vpop.f32.mrf.mxu1 }
 0x1da   :  { %7236 = vst [vmem:[#allocation28_spill] sm:$0xff] %v5833_v30  ;;  %v4576_v41 = vadd.f32 %v4575_v9, %v4574_v56  ;;  %v5850_v30 = vpop.permute.xlu0 %2742  ;;  %v2055_v56 = vadd.f32 %v4604_v25, %v5636_v19  ;;  %v5856_v9 = vand.u32 127, %v7151_v24 }
 0x1db   :  { %v4577_v55 = vpop.f32.mrf.mxu0  ;;  %v5841_v58 = vpop.f32.mrf.mxu1 }
 0x1dc   :  { %v5846_v60 = vadd.f32 %v4576_v41, %v5717_v21  ;;  %v4601_v21 = vadd.f32 %v5738_v15, %v5733_v43  ;;  %vm2818_vm0 = vcmp.eq.s32.totalorder %v5856_v9, %v2728_v28  ;;  %vm2816_vm1 = vcmp.eq.s32.totalorder %v5856_v9, %v5805_v45 }
 0x1dd   :  { %v4578_v6 = vpop.f32.mrf.mxu0  ;;  %v5848_v23 = vpop.f32.mrf.mxu1  ;;  %vm2819_vm2 = vcmp.eq.s32.totalorder %v5856_v9, %v5819_v35  ;;  %v4622_v35 = vadd.f32 %v5787_v16, %v5782_v20  ;;  %vm2817_vm3 = vcmp.eq.s32.totalorder %v5856_v9, %v5839_v3  ;;  %v4634_v3 = vadd.f32 %v5817_v14, %v5812_v32 }
 0x1de   :  { %7237 = vst [vmem:[#allocation29_spill] sm:$0xff] %v5846_v60  ;;  %v4579_v54 = vadd.f32 %v4578_v6, %v4577_v55  ;;  %v5883_v1 = vpop.permute.xlu0 %2745  ;;  %vm2822_vm4 = vcmp.eq.s32.totalorder %v5856_v9, %v5830_v17  ;;  %vm2823_vm6 = vcmp.eq.s32.totalorder %v5856_v9, %v5850_v30 }
 0x1df   :  { %v5858_v52 = vpop.f32.mrf.mxu1  ;;  %v4734_v34 = vpop.f32.mrf.mxu0  ;;  %vm2824_vm9 = vcmp.eq.s32.totalorder %v5856_v9, %v5883_v1 }
 0x1e0   :  { %v5863_v41 = vadd.f32 %v4579_v54, %v5726_v4  ;;  %v5865_v60 = vadd.f32 %v4734_v34, %v2055_v56  ;;  %v2058_v4 = vadd.f32 %v4607_v63, %v5643_v27  ;;  %v2050_v27 = vadd.f32 %v4601_v21, %v5629_v0 }
 0x1e1   :  { %v5868_v55 = vpop.f32.mrf.mxu1  ;;  %v2207_v19 = vpop.f32.mrf.mxu0  ;;  %v4619_v56 = vadd.f32 %v5780_v57, %v5775_v50  ;;  %v4613_v0 = vadd.f32 %v5766_v22, %v5761_v33  ;;  %v2063_v50 = vadd.f32 %v4610_v37, %v5650_v49 }
 0x1e2   :  { %2336 = vst [vmem:[#allocation7 + $0x10] sm:$0xff] %v5865_v60  ;;  %v5874_v25 = vadd.f32 %v2207_v19, %v2047_v13  ;;  %2370 = vmax.xlane.f32.xlu1 %v5865_v60  ;;  %v2850_v43 = vsel %vm2818_vm0, %v5865_v60, 0.0  ;;  %v5913_v10 = vpop.permute.xlu0 %2748  ;;  %v4628_v13 = vadd.f32 %v5801_v2, %v5796_v48  ;;  %v4646_v17 = vadd.f32 %v5868_v55, %v5858_v52 }
 0x1e3   :  { %v5879_v15 = vpop.f32.mrf.mxu1  ;;  %v4735_v53 = vpop.f32.mrf.mxu0  ;;  %2884 = vadd.xlane.f32.xlu0 %v2850_v43  ;;  %v2074_v22 = vadd.f32 %v4619_v56, %v5671_v26  ;;  %v2066_v2 = vadd.f32 %v4613_v0, %v5657_v59  ;;  %v4631_v26 = vadd.f32 %v5810_v39, %v5803_v44  ;;  %v2079_v39 = vadd.f32 %v4622_v35, %v5678_v40 }
 0x1e4   :  { %2334 = vst [vmem:[#allocation7] sm:$0xff] %v5874_v25  ;;  %v5888_v61 = vadd.f32 %v4735_v53, %v2058_v4  ;;  %v2848_v6 = vsel %vm2816_vm1, %v5874_v25, 0.0  ;;  %v2087_v20 = vadd.f32 %v4628_v13, %v5692_v29  ;;  %v4640_v29 = vadd.f32 %v5835_v51, %v5828_v11 }
 0x1e5   :  { %v5892_v63 = vpop.f32.mrf.mxu1  ;;  %v2210_v54 = vpop.f32.mrf.mxu0  ;;  %vm2825_vm11 = vcmp.eq.s32.totalorder %v5856_v9, %v5913_v10 }
 0x1e6   :  { %2337 = vst [vmem:[#allocation7 + $0x18] sm:$0xff] %v5888_v61  ;;  %v5897_v45 = vadd.f32 %v2210_v54, %v2050_v27  ;;  %2880 = vadd.xlane.f32.xlu1 %v2848_v6  ;;  %v2851_v49 = vsel %vm2819_vm2, %v5888_v61, 0.0  ;;  %v5943_v59 = vpop.permute.xlu0 %2751  ;;  %v4625_v27 = vadd.f32 %v5794_v42, %v5789_v8  ;;  %v2090_v8 = vadd.f32 %v4631_v26, %v5699_v36 }
 0x1e7   :  { %v5900_v31 = vpop.f32.mrf.mxu1  ;;  %v4738_v34 = vpop.f32.mrf.mxu0  ;;  %2366 = vmax.xlane.f32.xlu0 %v5874_v25  ;;  %v4643_v36 = vadd.f32 %v5848_v23, %v5841_v58  ;;  %v2103_v32 = vadd.f32 %v4640_v29, %v5720_v62  ;;  %v2095_v58 = vadd.f32 %v4634_v3, %v5706_v46  ;;  %v4649_v29 = vadd.f32 %v5892_v63, %v5879_v15  ;;  %v7241_v15 = vld [vmem:[#allocation18_spill] sm:$0xff] }
 0x1e8   :  { %2335 = vst [vmem:[#allocation7 + $0x8] sm:$0xff] %v5897_v45  ;;  %v5906_v21 = vadd.f32 %v4738_v34, %v2071_v7  ;;  %v2849_v42 = vsel %vm2817_vm3, %v5897_v45, 0.0  ;;  %v2082_v51 = vadd.f32 %v4625_v27, %v5685_v18  ;;  %v4637_v18 = vadd.f32 %v5826_v5, %v5821_v47  ;;  %v7239_v27 = vld [vmem:[#allocation17_spill] sm:$0xff] }
 0x1e9   :  { %v5909_v57 = vpop.f32.mrf.mxu1  ;;  %v2223_v28 = vpop.f32.mrf.mxu0  ;;  %v2106_v47 = vadd.f32 %v4643_v36, %v5729_v38  ;;  %vm2826_vm8 = vcmp.eq.s32.totalorder %v5856_v9, %v5943_v59  ;;  %v7250_v59 = vld [vmem:[#allocation24_spill] sm:$0xff] }
 0x1ea   :  { %2340 = vst [vmem:[#allocation7 + $0x30] sm:$0xff] %v5906_v21  ;;  %v5918_v33 = vadd.f32 %v2223_v28, %v2063_v50  ;;  %2372 = vmax.xlane.f32.xlu1 %v5888_v61  ;;  %v5973_v50 = vpop.permute.xlu0 %2754  ;;  %v4652_v62 = vadd.f32 %v5909_v57, %v5900_v31  ;;  %v2854_v5 = vsel %vm2822_vm4, %v5906_v21, 0.0  ;;  %v7238_v57 = vld [vmem:[#allocation14_spill] sm:$0xff] }
 0x1eb   :  { %v5923_v19 = vpop.f32.mrf.mxu1  ;;  %v4739_v12 = vpop.f32.mrf.mxu0  ;;  %2886 = vadd.xlane.f32.xlu0 %v2851_v49  ;;  %vm2827_vm10 = vcmp.eq.s32.totalorder %v5856_v9, %v5973_v50 }
 0x1ec   :  { %2338 = vst [vmem:[#allocation7 + $0x20] sm:$0xff] %v5918_v33  ;;  %v5928_v48 = vadd.f32 %v4739_v12, %v2074_v22 }
 0x1ed   :  { %v5931_v4 = vpop.f32.mrf.mxu1  ;;  %v2226_v43 = vpop.f32.mrf.mxu0 }
 0x1ee   :  { %2341 = vst [vmem:[#allocation7 + $0x38] sm:$0xff] %v5928_v48  ;;  %v5936_v53 = vadd.f32 %v2226_v43, %v2066_v2  ;;  %2380 = vmax.xlane.f32.xlu1 %v5928_v48  ;;  %v5999_v2 = vpop.permute.xlu0 %2757  ;;  %v2098_v43 = vadd.f32 %v4637_v18, %v7238_v57  ;;  %v4655_v38 = vadd.f32 %v5931_v4, %v5923_v19  ;;  %v7240_v19 = vld [vmem:[#allocation15_spill] sm:$0xff] }
 0x1ef   :  { %v5940_v16 = vpop.f32.mrf.mxu1  ;;  %v4742_v37 = vpop.f32.mrf.mxu0  ;;  %2368 = vmax.xlane.f32.xlu0 %v5897_v45  ;;  %v2111_v4 = vadd.f32 %v4646_v17, %v7240_v19  ;;  %vm2828_vm12 = vcmp.eq.s32.totalorder %v5856_v9, %v5999_v2 }
 0x1f0   :  { %2339 = vst [vmem:[#allocation7 + $0x28] sm:$0xff] %v5936_v53  ;;  %v5948_v44 = vadd.f32 %v4742_v37, %v2087_v20  ;;  %v2122_v63 = vadd.f32 %v4655_v38, %v7241_v15  ;;  %v7246_v15 = vld [vmem:[#allocation20_spill] sm:$0xff] }
 0x1f1   :  { %v5951_v6 = vpop.f32.mrf.mxu1  ;;  %v2239_v54 = vpop.f32.mrf.mxu0 }
 0x1f2   :  { %2344 = vst [vmem:[#allocation7 + $0x50] sm:$0xff] %v5948_v44  ;;  %v5958_v56 = vadd.f32 %v2239_v54, %v2079_v39  ;;  %2376 = vmax.xlane.f32.xlu1 %v5936_v53  ;;  %v2119_v39 = vadd.f32 %v4652_v62, %v7239_v27  ;;  %v2734_v54 = vpop.permute.xlu1 %2733  ;;  %v6022_v3 = vpop.permute.xlu0 %2760  ;;  %v4658_v18 = vadd.f32 %v5951_v6, %v5940_v16  ;;  %v2855_v6 = vsel %vm2823_vm6, %v5928_v48, 0.0 }
 0x1f3   :  { %v5963_v40 = vpop.f32.mrf.mxu1  ;;  %v4743_v7 = vpop.f32.mrf.mxu0  ;;  %2882 = vadd.xlane.f32.xlu0 %v2849_v42  ;;  %vm2820_vm5 = vcmp.eq.s32.totalorder %v5856_v9, %v2734_v54  ;;  %vm2829_vm13 = vcmp.eq.s32.totalorder %v5856_v9, %v6022_v3 }
 0x1f4   :  { %2342 = vst [vmem:[#allocation7 + $0x40] sm:$0xff] %v5958_v56  ;;  %v5968_v11 = vadd.f32 %v4743_v7, %v2090_v8  ;;  %v2852_v36 = vsel %vm2820_vm5, %v5918_v33, 0.0 }
 0x1f5   :  { %v5971_v34 = vpop.f32.mrf.mxu1  ;;  %v2242_v0 = vpop.f32.mrf.mxu0 }
 0x1f6   :  { %2345 = vst [vmem:[#allocation7 + $0x58] sm:$0xff] %v5968_v11  ;;  %v5978_v28 = vadd.f32 %v2242_v0, %v2082_v51  ;;  %2388 = vmax.xlane.f32.xlu1 %v5968_v11  ;;  %v4661_v30 = vadd.f32 %v5971_v34, %v5963_v40 }
 0x1f7   :  { %v4662_v14 = vpop.f32.mrf.mxu1  ;;  %v4746_v13 = vpop.f32.mrf.mxu0  ;;  %2378 = vmax.xlane.f32.xlu0 %v5906_v21 }
 0x1f8   :  { %2343 = vst [vmem:[#allocation7 + $0x48] sm:$0xff] %v5978_v28  ;;  %v5986_v22 = vadd.f32 %v4746_v13, %v2103_v32 }
 0x1f9   :  { %v4663_v23 = vpop.f32.mrf.mxu1  ;;  %v2255_v49 = vpop.f32.mrf.mxu0 }
 0x1fa   :  { %2348 = vst [vmem:[#allocation7 + $0x70] sm:$0xff] %v5986_v22  ;;  %v5994_v12 = vadd.f32 %v2255_v49, %v2095_v58  ;;  %2384 = vmax.xlane.f32.xlu1 %v5978_v28  ;;  %v4664_v51 = vadd.f32 %v4663_v23, %v4662_v14  ;;  %v7242_v14 = vld [vmem:[#allocation16_spill] sm:$0xff] }
 0x1fb   :  { %v4665_v35 = vpop.f32.mrf.mxu1  ;;  %v4747_v46 = vpop.f32.mrf.mxu0  ;;  %2892 = vadd.xlane.f32.xlu0 %v2854_v5  ;;  %v2114_v23 = vadd.f32 %v4649_v29, %v7242_v14  ;;  %v7245_v29 = vld [vmem:[#allocation22_spill] sm:$0xff] }
 0x1fc   :  { %2346 = vst [vmem:[#allocation7 + $0x60] sm:$0xff] %v5994_v12  ;;  %v6004_v31 = vadd.f32 %v4747_v46, %v2106_v47  ;;  %v7243_v46 = vld [vmem:[#allocation21_spill] sm:$0xff] }
 0x1fd   :  { %v4666_v26 = vpop.f32.mrf.mxu1  ;;  %v2258_v20 = vpop.f32.mrf.mxu0  ;;  %v2135_v16 = vadd.f32 %v4664_v51, %v7243_v46 }
 0x1fe   :  { %2349 = vst [vmem:[#allocation7 + $0x78] sm:$0xff] %v6004_v31  ;;  %v6010_v37 = vadd.f32 %v2258_v20, %v2098_v43  ;;  %2396 = vmax.xlane.f32.xlu1 %v6004_v31  ;;  %v4667_v47 = vadd.f32 %v4666_v26, %v4665_v35  ;;  %v6044_v43 = vpop.permute.xlu0 %2763  ;;  %v2737_v20 = vpop.permute.xlu1 %2736  ;;  %v7244_v26 = vld [vmem:[#allocation19_spill] sm:$0xff] }
 0x1ff   :  { %v4668_v52 = vpop.f32.mrf.mxu1  ;;  %v4750_v55 = vpop.f32.mrf.mxu0  ;;  %2374 = vmax.xlane.f32.xlu0 %v5918_v33  ;;  %v2127_v38 = vadd.f32 %v4658_v18, %v7244_v26  ;;  %vm2821_vm7 = vcmp.eq.s32.totalorder %v5856_v9, %v2737_v20  ;;  %v7249_v26 = vld [vmem:[#allocation26_spill] sm:$0xff]  ;;  %vm2830_vm14 = vcmp.eq.s32.totalorder %v5856_v9, %v6044_v43 }
 0x200   :  { %2347 = vst [vmem:[#allocation7 + $0x68] sm:$0xff] %v6010_v37  ;;  %v6018_v8 = vadd.f32 %v4750_v55, %v2119_v39  ;;  %v2138_v19 = vadd.f32 %v4667_v47, %v7245_v29  ;;  %v2853_v40 = vsel %vm2821_vm7, %v5936_v53, 0.0 }
 0x201   :  { %v4669_v42 = vpop.f32.mrf.mxu1  ;;  %v2271_v7 = vpop.f32.mrf.mxu0 }
 0x202   :  { %2352 = vst [vmem:[#allocation7 + $0x90] sm:$0xff] %v6018_v8  ;;  %v6025_v0 = vadd.f32 %v2271_v7, %v2111_v4  ;;  %2392 = vmax.xlane.f32.xlu1 %v6010_v37  ;;  %v4670_v7 = vadd.f32 %v4669_v42, %v4668_v52  ;;  %v6063_v18 = vpop.permute.xlu0 %2766 }
 0x203   :  { %v4671_v32 = vpop.f32.mrf.mxu1  ;;  %v4751_v13 = vpop.f32.mrf.mxu0  ;;  %2888 = vadd.xlane.f32.xlu0 %v2852_v36 }
 0x204   :  { %2350 = vst [vmem:[#allocation7 + $0x80] sm:$0xff] %v6025_v0  ;;  %v6033_v58 = vadd.f32 %v4751_v13, %v2122_v63  ;;  %v2130_v63 = vadd.f32 %v4661_v30, %v7246_v15 }
 0x205   :  { %v4672_v49 = vpop.f32.mrf.mxu1  ;;  %v2274_v62 = vpop.f32.mrf.mxu0 }
 0x206   :  { %2353 = vst [vmem:[#allocation7 + $0x98] sm:$0xff] %v6033_v58  ;;  %v6039_v5 = vadd.f32 %v2274_v62, %v2114_v23  ;;  %2404 = vmax.xlane.f32.xlu1 %v6033_v58  ;;  %v7247_v62 = vld [vmem:[#allocation25_spill] sm:$0xff]  ;;  %v4673_v46 = vadd.f32 %v4672_v49, %v4671_v32  ;;  %v2858_v32 = vsel %vm2826_vm8, %v5948_v44, 0.0 }
 0x207   :  { %v4674_v17 = vpop.f32.mrf.mxu1  ;;  %v4754_v57 = vpop.f32.mrf.mxu0  ;;  %2894 = vadd.xlane.f32.xlu0 %v2855_v6  ;;  %v7248_v6 = vld [vmem:[#allocation23_spill] sm:$0xff] }
 0x208   :  { %2351 = vst [vmem:[#allocation7 + $0x88] sm:$0xff] %v6039_v5  ;;  %v6049_v35 = vadd.f32 %v4754_v57, %v2135_v16 }
 0x209   :  { %v4675_v27 = vpop.f32.mrf.mxu1  ;;  %v2287_v39 = vpop.f32.mrf.mxu0 }
 0x20a   :  { %2356 = vst [vmem:[#allocation7 + $0xb0] sm:$0xff] %v6049_v35  ;;  %v4676_v55 = vadd.f32 %v4675_v27, %v4674_v17  ;;  %v6054_v54 = vadd.f32 %v2287_v39, %v2127_v38  ;;  %2400 = vmax.xlane.f32.xlu1 %v6039_v5  ;;  %v2143_v17 = vadd.f32 %v4670_v7, %v7248_v6  ;;  %v6083_v39 = vpop.permute.xlu0 %2769 }
 0x20b   :  { %v4677_v34 = vpop.f32.mrf.mxu1  ;;  %v4755_v4 = vpop.f32.mrf.mxu0  ;;  %2890 = vadd.xlane.f32.xlu0 %v2853_v40 }
 0x20c   :  { %2354 = vst [vmem:[#allocation7 + $0xa0] sm:$0xff] %v6054_v54  ;;  %v6060_v51 = vadd.f32 %v4755_v4, %v2138_v19  ;;  %v2151_v47 = vadd.f32 %v4676_v55, %v7247_v62  ;;  %v2146_v19 = vadd.f32 %v4673_v46, %v7250_v59  ;;  %v2856_v46 = vsel %vm2824_vm9, %v5958_v56, 0.0 }
 0x20d   :  { %v4678_v36 = vpop.f32.mrf.mxu1  ;;  %v2290_v13 = vpop.f32.mrf.mxu0  ;;  %v2859_v59 = vsel %vm2827_vm10, %v5968_v11, 0.0 }
 0x20e   :  { %2357 = vst [vmem:[#allocation7 + $0xb8] sm:$0xff] %v6060_v51  ;;  %v4679_v14 = vadd.f32 %v4678_v36, %v4677_v34  ;;  %v6066_v23 = vadd.f32 %v2290_v13, %v2130_v63  ;;  %2412 = vmax.xlane.f32.xlu1 %v6060_v51  ;;  %v7251_v36 = vld [vmem:[#allocation27_spill] sm:$0xff] }
 0x20f   :  { %v4680_v52 = vpop.f32.mrf.mxu1  ;;  %v4758_v42 = vpop.f32.mrf.mxu0  ;;  %2386 = vmax.xlane.f32.xlu0 %v5948_v44 }
 0x210   :  { %2355 = vst [vmem:[#allocation7 + $0xa8] sm:$0xff] %v6066_v23  ;;  %v6072_v16 = vadd.f32 %v4758_v42, %v2151_v47  ;;  %v2154_v38 = vadd.f32 %v4679_v14, %v7249_v26  ;;  %v6098_v47 = vpop.permute.xlu0 %2772  ;;  %v7253_v26 = vld [vmem:[#allocation28_spill] sm:$0xff] }
 0x211   :  { %v4681_v57 = vpop.f32.mrf.mxu1  ;;  %v2303_v20 = vpop.f32.mrf.mxu0 }
 0x212   :  { %2360 = vst [vmem:[#allocation7 + $0xd0] sm:$0xff] %v6072_v16  ;;  %v6078_v30 = vadd.f32 %v2303_v20, %v2143_v17  ;;  %2408 = vmax.xlane.f32.xlu1 %v6066_v23  ;;  %v4682_v55 = vadd.f32 %v4681_v57, %v4680_v52  ;;  %v7252_v57 = vld [vmem:[#allocation29_spill] sm:$0xff] }
 0x213   :  { %v4683_v49 = vpop.f32.mrf.mxu1  ;;  %v4759_v27 = vpop.f32.mrf.mxu0  ;;  %2900 = vadd.xlane.f32.xlu0 %v2858_v32 }
 0x214   :  { %2358 = vst [vmem:[#allocation7 + $0xc0] sm:$0xff] %v6078_v30  ;;  %v6086_v29 = vadd.f32 %v4759_v27, %v2154_v38  ;;  %v2159_v13 = vadd.f32 %v4682_v55, %v7251_v36 }
 0x215   :  { %v4684_v40 = vpop.f32.mrf.mxu1  ;;  %v2306_v34 = vpop.f32.mrf.mxu0 }
 0x216   :  { %2361 = vst [vmem:[#allocation7 + $0xd8] sm:$0xff] %v6086_v29  ;;  %v6090_v4 = vadd.f32 %v2306_v34, %v2146_v19  ;;  %2420 = vmax.xlane.f32.xlu1 %v6086_v29  ;;  %v4685_v63 = vadd.f32 %v4684_v40, %v4683_v49  ;;  %v6114_v19 = vpop.permute.xlu0 %2775  ;;  %v2857_v34 = vsel %vm2825_vm11, %v5978_v28, 0.0 }
 0x217   :  { %v4686_v7 = vpop.f32.mrf.mxu1  ;;  %v4762_v15 = vpop.f32.mrf.mxu0  ;;  %2382 = vmax.xlane.f32.xlu0 %v5958_v56 }
 0x218   :  { %2359 = vst [vmem:[#allocation7 + $0xc8] sm:$0xff] %v6090_v4  ;;  %v2162_v38 = vadd.f32 %v4685_v63, %v7253_v26 }
 0x219   :  { %v4687_v14 = vpop.f32.mrf.mxu1  ;;  %v2319_v62 = vpop.f32.mrf.mxu0 }
 0x21a   :  { %v4688_v52 = vadd.f32 %v4687_v14, %v4686_v7  ;;  %v6100_v42 = vadd.f32 %v2319_v62, %v2159_v13  ;;  %2416 = vmax.xlane.f32.xlu1 %v6090_v4  ;;  %v6127_v7 = vpop.permute.xlu0 %2778  ;;  %v2860_v13 = vsel %vm2828_vm12, %v5994_v12, 0.0 }
 0x21b   :  { %v4689_v6 = vpop.f32.mrf.mxu1  ;;  %v4763_v17 = vpop.f32.mrf.mxu0  ;;  %2896 = vadd.xlane.f32.xlu0 %v2856_v46  ;;  %v2862_v46 = vsel %vm2830_vm14, %v5986_v22, 0.0 }
 0x21c   :  { %v2167_v20 = vadd.f32 %v4688_v52, %v7252_v57  ;;  %2362 = vst [vmem:[#allocation7 + $0xe0] sm:$0xff] %v6100_v42  ;;  %v2861_v52 = vsel %vm2829_vm13, %v6010_v37, 0.0  ;;  %v6168_v57 = vpop.permute.xlu1 %2802 }
 0x21d   :  { %v4690_v32 = vpop.f32.mrf.mxu1  ;;  %v2322_v1 = vpop.f32.mrf.mxu0  ;;  %7258 = vst [vmem:[#allocation16_spill] sm:$0xff] %v6168_v57 }
 0x21e   :  { %v6109_v49 = vadd.f32 %v4762_v15, %v2167_v20  ;;  %v4691_v27 = vadd.f32 %v4690_v32, %v4689_v6  ;;  %v6111_v55 = vadd.f32 %v2322_v1, %v2162_v38 }
 0x21f   :  { %2902 = vadd.xlane.f32.xlu0 %v2859_v59 }
 0x220   :  { %2364 = vst [vmem:[#allocation7 + $0xf0] sm:$0xff] %v6109_v49  ;;  %v2170_v40 = vadd.f32 %v4691_v27, %v5863_v41  ;;  %2363 = vst [vmem:[#allocation7 + $0xe8] sm:$0xff] %v6111_v55  ;;  %2424 = vmax.xlane.f32.xlu1 %v6111_v55  ;;  %v6131_v41 = vpop.permute.xlu0 %2781 }
 0x222   :  { %v6122_v50 = vadd.f32 %v4763_v17, %v2170_v40 }
 0x223   :  { %2898 = vadd.xlane.f32.xlu0 %v2857_v34 }
 0x224   :  { %2365 = vst [vmem:[#allocation7 + $0xf8] sm:$0xff] %v6122_v50  ;;  %2428 = vmax.xlane.f32.xlu1 %v6122_v50  ;;  %v6134_v10 = vpop.permute.xlu0 %2784 }
 0x227   :  { %2394 = vmax.xlane.f32.xlu0 %v5986_v22 }
 0x228   :  { %v6138_v15 = vpop.permute.xlu0 %2787 }
 0x22b   :  { %2390 = vmax.xlane.f32.xlu0 %v5994_v12 }
 0x22c   :  { %v6141_v63 = vpop.permute.xlu0 %2790 }
 0x22f   :  { %2402 = vmax.xlane.f32.xlu0 %v6018_v8 }
 0x230   :  { %v6145_v36 = vpop.permute.xlu0 %2793 }
 0x233   :  { %2398 = vmax.xlane.f32.xlu0 %v6025_v0 }
 0x234   :  { %v6150_v14 = vpop.permute.xlu0 %2796 }
 0x237   :  { %2410 = vmax.xlane.f32.xlu0 %v6049_v35 }
 0x238   :  { %v6154_v62 = vpop.permute.xlu0 %2799 }
 0x239   :  { %7254 = vst [vmem:[#allocation14_spill] sm:$0xff] %v6154_v62 }
 0x23b   :  { %2406 = vmax.xlane.f32.xlu0 %v6054_v54 }
 0x23c   :  { %v6161_v2 = vpop.permute.xlu0 %2805 }
 0x23d   :  { %7255 = vst [vmem:[#allocation17_spill] sm:$0xff] %v6161_v2 }
 0x23f   :  { %2418 = vmax.xlane.f32.xlu0 %v6072_v16 }
 0x240   :  { %v6164_v6 = vpop.permute.xlu0 %2808 }
 0x241   :  { %7256 = vst [vmem:[#allocation15_spill] sm:$0xff] %v6164_v6 }
 0x243   :  { %2414 = vmax.xlane.f32.xlu0 %v6078_v30 }
 0x244   :  { %v6166_v17 = vpop.permute.xlu0 %2811 }
 0x245   :  { %7257 = vst [vmem:[#allocation18_spill] sm:$0xff] %v6166_v17 }
 0x247   :  { %2904 = vadd.xlane.f32.xlu0 %v2860_v13 }
 0x248   :  { %v6170_v20 = vpop.permute.xlu0 %2814 }
 0x249   :  { %7259 = vst [vmem:[#allocation21_spill] sm:$0xff] %v6170_v20 }
 0x24b   :  { %2422 = vmax.xlane.f32.xlu0 %v6100_v42 }
 0x24f   :  { %2426 = vmax.xlane.f32.xlu0 %v6109_v49 }
 0x253   :  { %2906 = vadd.xlane.f32.xlu0 %v2861_v52 }
 0x257   :  { %2908 = vadd.xlane.f32.xlu0 %v2862_v46 }
 0x26b   :  { %v6172_v3 = vpop.xlane.xlu1 %2370 }
 0x26c   :  { %v2432_v26 = vsub.f32 %v5865_v60, %v6172_v3  ;;  %v6176_v38 = vpop.xlane.xlu0 %2884  ;;  %vm2978_vm15 = vcmp.eq.f32.partialorder %v5865_v60, %v6172_v3 }
 0x26d   :  { %7260 = vst [vmem:[#allocation19_spill] sm:$0xff] %v6176_v38  ;;  %v6181_v43 = vsel %vm2978_vm15, %v5856_v9, 128 }
 0x26e   :  { %v2466_v32 = vmul.f32 1.442695, %v2432_v26  ;;  %v3069_v1 = vshra.s32 %v6181_v43, 16 }
 0x26f   :  { %v6184_v27 = vpop.xlane.xlu1 %2880 }
 0x270   :  { %5078 = vpow2.f32 %v2466_v32  ;;  %v6186_v59 = vpop.xlane.xlu0 %2366  ;;  %v6188_v40 = vcvt.s32.f32 %v3069_v1 }
 0x271   :  { %v2430_v34 = vsub.f32 %v5874_v25, %v6186_v59  ;;  %vm2976_vm0 = vcmp.eq.f32.partialorder %v5874_v25, %v6186_v59 }
 0x272   :  { %3072 = vmin.xlane.f32.xlu1 %v6188_v40  ;;  %v6196_v60 = vsel %vm2976_vm0, %v5856_v9, 128 }
 0x273   :  { %v6198_v13 = vpop.xlane.xlu1 %2372  ;;  %v3041_v52 = vshra.s32 %v6196_v60, 16  ;;  %v2462_v46 = vmul.f32 1.442695, %v2430_v34 }
 0x274   :  { %7261 = vst [vmem:[#allocation22_spill] sm:$0xff] %v6198_v13  ;;  %v6201_v26 = vpop.xlane.xlu0 %2886  ;;  %vm2979_vm1 = vcmp.eq.f32.partialorder %v5888_v61, %v6198_v13 }
 0x275   :  { %7262 = vst [vmem:[#allocation20_spill] sm:$0xff] %v6201_v26  ;;  %v6205_v32 = vcvt.s32.f32 %v3041_v52  ;;  %v6208_v1 = vsel %vm2979_vm1, %v5856_v9, 128  ;;  %5080 = vpow2.f32 %v2462_v46 }
 0x276   :  { %7264 = vst [vmem:[#allocation23_spill] sm:$0xff] %v6208_v1  ;;  %v3083_v25 = vshra.s32 %v6208_v1, 16  ;;  %v2433_v1 = vsub.f32 %v5888_v61, %v6198_v13 }
 0x277   :  { %7263 = vst [vmem:[#allocation25_spill] sm:$0xff] %v6205_v32  ;;  %3044 = vmin.xlane.f32.xlu1 %v6205_v32  ;;  %v6212_v24 = vpop.xlane.xlu1 %2380 }
 0x278   :  { %7265 = vst [vmem:[#allocation26_spill] sm:$0xff] %v6212_v24  ;;  %vm2983_vm2 = vcmp.eq.f32.partialorder %v5928_v48, %v6212_v24  ;;  %v6216_v34 = vpop.xlane.xlu0 %2368  ;;  %v6218_v20 = vcvt.s32.f32 %v3083_v25 }
 0x279   :  { %7266 = vst [vmem:[#allocation24_spill] sm:$0xff] %v6216_v34  ;;  %vm2977_vm3 = vcmp.eq.f32.partialorder %v5897_v45, %v6216_v34  ;;  %v6223_v52 = vsel %vm2983_vm2, %v5856_v9, 128 }
 0x27a   :  { %7267 = vst [vmem:[#allocation27_spill] sm:$0xff] %v6218_v20  ;;  %7268 = vst [vmem:[#allocation29_spill] sm:$0xff] %v6223_v52  ;;  %v6226_v26 = vsel %vm2977_vm3, %v5856_v9, 128  ;;  %v3139_v6 = vshra.s32 %v6223_v52, 16 }
 0x27b   :  { %3086 = vmin.xlane.f32.xlu1 %v6218_v20  ;;  %v3055_v46 = vshra.s32 %v6226_v26, 16 }
 0x27c   :  { %v6230_v17 = vpop.xlane.xlu0 %2882  ;;  %v6238_v62 = vcvt.s32.f32 %v3139_v6  ;;  %v2468_v6 = vmul.f32 1.442695, %v2433_v1 }
 0x27d   :  { %7269 = vst [vmem:[#allocation28_spill] sm:$0xff] %v6230_v17  ;;  %v5079_v2 = vpop.eup %5078  ;;  %v6233_v25 = vcvt.s32.f32 %v3055_v46  ;;  %v2431_v17 = vsub.f32 %v5897_v45, %v6216_v34 }
 0x27e   :  { %2530 = vadd.xlane.f32.xlu0 %v5079_v2  ;;  %7271 = vst [vmem:[#allocation31_spill] sm:$0xff] %v6238_v62  ;;  %v6249_v2 = vpop.xlane.xlu1 %2376  ;;  %5082 = vpow2.f32 %v2468_v6 }
 0x27f   :  { %3058 = vmin.xlane.f32.xlu1 %v6233_v25  ;;  %7273 = vst [vmem:[#allocation33_spill] sm:$0xff] %v6249_v2  ;;  %vm2981_vm5 = vcmp.eq.f32.partialorder %v5936_v53, %v6249_v2 }
 0x280   :  { %v6236_v57 = vpop.xlane.xlu0 %2378  ;;  %v6268_v45 = vsel %vm2981_vm5, %v5856_v9, 128 }
 0x281   :  { %7270 = vst [vmem:[#allocation30_spill] sm:$0xff] %v6236_v57  ;;  %vm2982_vm4 = vcmp.eq.f32.partialorder %v5906_v21, %v6236_v57 }
 0x282   :  { %3142 = vmin.xlane.f32.xlu0 %v6238_v62  ;;  %v6246_v52 = vsel %vm2982_vm4, %v5856_v9, 128  ;;  %v5081_v32 = vpop.eup %5080  ;;  %v2464_v62 = vmul.f32 1.442695, %v2431_v17  ;;  %v3111_v17 = vshra.s32 %v6268_v45, 16 }
 0x283   :  { %7272 = vst [vmem:[#allocation32_spill] sm:$0xff] %v6246_v52  ;;  %v3125_v46 = vshra.s32 %v6246_v52, 16 }
 0x284   :  { %v6251_v20 = vpop.xlane.xlu0 %2892  ;;  %5084 = vpow2.f32 %v2464_v62  ;;  %v6283_v34 = vcvt.s32.f32 %v3111_v17 }
 0x285   :  { %7274 = vst [vmem:[#allocation34_spill] sm:$0xff] %v6251_v20  ;;  %v6255_v61 = vcvt.s32.f32 %v3125_v46  ;;  %v2436_v20 = vsub.f32 %v5906_v21, %v6236_v57 }
 0x286   :  { %2526 = vadd.xlane.f32.xlu0 %v5081_v32 }
 0x287   :  { %7275 = vst [vmem:[#allocation35_spill] sm:$0xff] %v6255_v61  ;;  %3128 = vmin.xlane.f32.xlu1 %v6255_v61  ;;  %v2474_v52 = vmul.f32 1.442695, %v2436_v20  ;;  %v6294_v20 = vpop.xlane.xlu1 %2388 }
 0x288   :  { %v6260_v13 = vpop.xlane.xlu0 %2374  ;;  %7280 = vst [vmem:[#allocation40_spill] sm:$0xff] %v6294_v20  ;;  %vm2987_vm8 = vcmp.eq.f32.partialorder %v5968_v11, %v6294_v20 }
 0x289   :  { %vm2980_vm6 = vcmp.eq.f32.partialorder %v5918_v33, %v6260_v13  ;;  %v2434_v38 = vsub.f32 %v5918_v33, %v6260_v13  ;;  %5086 = vpow2.f32 %v2474_v52  ;;  %v2437_v52 = vsub.f32 %v5928_v48, %v6212_v24 }
 0x28a   :  { %v6265_v1 = vsel %vm2980_vm6, %v5856_v9, 128 }
 0x28b   :  { %v3097_v32 = vshra.s32 %v6265_v1, 16  ;;  %v2470_v21 = vmul.f32 1.442695, %v2434_v38 }
 0x28c   :  { %v6271_v46 = vpop.xlane.xlu0 %2888 }
 0x28d   :  { %7276 = vst [vmem:[#allocation36_spill] sm:$0xff] %v6271_v46  ;;  %v6275_v61 = vcvt.s32.f32 %v3097_v32  ;;  %v5083_v32 = vpop.eup %5082  ;;  %5088 = vpow2.f32 %v2470_v21 }
 0x28f   :  { %3100 = vmin.xlane.f32.xlu1 %v6275_v61 }
 0x290   :  { %v6279_v6 = vpop.xlane.xlu0 %2894 }
 0x291   :  { %7277 = vst [vmem:[#allocation37_spill] sm:$0xff] %v6279_v6  ;;  %v5085_v33 = vpop.eup %5084 }
 0x293   :  { %3114 = vmin.xlane.f32.xlu1 %v6283_v34 }
 0x294   :  { %v6286_v62 = vpop.xlane.xlu0 %2890 }
 0x295   :  { %7278 = vst [vmem:[#allocation38_spill] sm:$0xff] %v6286_v62 }
 0x296   :  { %v5087_v48 = vpop.eup %5086 }
 0x297   :  { %2532 = vadd.xlane.f32.xlu1 %v5083_v32 }
 0x298   :  { %v6288_v57 = vpop.xlane.xlu0 %2386 }
 0x299   :  { %7279 = vst [vmem:[#allocation39_spill] sm:$0xff] %v6288_v57  ;;  %v2440_v6 = vsub.f32 %v5948_v44, %v6288_v57  ;;  %vm2986_vm7 = vcmp.eq.f32.partialorder %v5948_v44, %v6288_v57  ;;  %v2476_v44 = vmul.f32 1.442695, %v2437_v52  ;;  %v6309_v57 = vpop.xlane.xlu1 %2384 }
 0x29a   :  { %v6297_v17 = vsel %vm2986_vm7, %v5856_v9, 128  ;;  %7283 = vst [vmem:[#allocation43_spill] sm:$0xff] %v6309_v57  ;;  %vm2985_vm10 = vcmp.eq.f32.partialorder %v5978_v28, %v6309_v57 }
 0x29b   :  { %v2482_v62 = vmul.f32 1.442695, %v2440_v6  ;;  %2528 = vadd.xlane.f32.xlu1 %v5085_v33  ;;  %v3181_v38 = vshra.s32 %v6297_v17, 16 }
 0x29c   :  { %v6302_v21 = vpop.xlane.xlu0 %2900 }
 0x29d   :  { %7281 = vst [vmem:[#allocation41_spill] sm:$0xff] %v6302_v21  ;;  %5090 = vpow2.f32 %v2482_v62  ;;  %v6304_v32 = vcvt.s32.f32 %v3181_v38  ;;  %v6321_v38 = vsel %vm2987_vm8, %v5856_v9, 128 }
 0x29e   :  { %7286 = vst [vmem:[#allocation46_spill] sm:$0xff] %v6321_v38  ;;  %5092 = vpow2.f32 %v2476_v44  ;;  %v3195_v46 = vshra.s32 %v6321_v38, 16 }
 0x29f   :  { %7282 = vst [vmem:[#allocation42_spill] sm:$0xff] %v6304_v32  ;;  %3184 = vmin.xlane.f32.xlu0 %v6304_v32  ;;  %v5089_v32 = vpop.eup %5088 }
 0x2a0   :  { %v6311_v6 = vpop.xlane.xlu0 %2382 }
 0x2a1   :  { %7284 = vst [vmem:[#allocation44_spill] sm:$0xff] %v6311_v6  ;;  %v2438_v33 = vsub.f32 %v5958_v56, %v6311_v6  ;;  %vm2984_vm9 = vcmp.eq.f32.partialorder %v5958_v56, %v6311_v6  ;;  %v2435_v56 = vsub.f32 %v5936_v53, %v6249_v2 }
 0x2a2   :  { %v6318_v62 = vsel %vm2984_vm9, %v5856_v9, 128 }
 0x2a3   :  { %7285 = vst [vmem:[#allocation45_spill] sm:$0xff] %v6318_v62  ;;  %v2478_v21 = vmul.f32 1.442695, %v2438_v33  ;;  %2538 = vadd.xlane.f32.xlu0 %v5087_v48  ;;  %v3153_v52 = vshra.s32 %v6318_v62, 16  ;;  %v6334_v33 = vsel %vm2985_vm10, %v5856_v9, 128  ;;  %v6339_v62 = vcvt.s32.f32 %v3195_v46 }
 0x2a4   :  { %v6326_v24 = vpop.xlane.xlu0 %2896  ;;  %7288 = vst [vmem:[#allocation48_spill] sm:$0xff] %v6334_v33  ;;  %v2472_v44 = vmul.f32 1.442695, %v2435_v56 }
 0x2a5   :  { %7287 = vst [vmem:[#allocation47_spill] sm:$0xff] %v6326_v24  ;;  %5094 = vpow2.f32 %v2478_v21  ;;  %v6330_v6 = vcvt.s32.f32 %v3153_v52  ;;  %7290 = vst [vmem:[#allocation50_spill] sm:$0xff] %v6339_v62  ;;  %v3167_v24 = vshra.s32 %v6334_v33, 16 }
 0x2a6   :  { %5096 = vpow2.f32 %v2472_v44 }
 0x2a7   :  { %2534 = vadd.xlane.f32.xlu0 %v5089_v32  ;;  %3156 = vmin.xlane.f32.xlu1 %v6330_v6  ;;  %v6345_v52 = vcvt.s32.f32 %v3167_v24 }
 0x2a8   :  { %v6337_v48 = vpop.xlane.xlu0 %2902 }
 0x2a9   :  { %7289 = vst [vmem:[#allocation49_spill] sm:$0xff] %v6337_v48  ;;  %7292 = vst [vmem:[#allocation52_spill] sm:$0xff] %v6345_v52 }
 0x2aa   :  { %v5091_v53 = vpop.eup %5090 }
 0x2ab   :  { %2546 = vadd.xlane.f32.xlu0 %v5091_v53  ;;  %3198 = vmin.xlane.f32.xlu1 %v6339_v62  ;;  %v5093_v2 = vpop.eup %5092  ;;  %v6354_v53 = vpop.xlane.xlu1 %2396 }
 0x2ac   :  { %v6343_v21 = vpop.xlane.xlu0 %2898  ;;  %7294 = vst [vmem:[#allocation54_spill] sm:$0xff] %v6354_v53  ;;  %vm2991_vm13 = vcmp.eq.f32.partialorder %v6004_v31, %v6354_v53 }
 0x2ad   :  { %7291 = vst [vmem:[#allocation51_spill] sm:$0xff] %v6343_v21  ;;  %v2441_v21 = vsub.f32 %v5968_v11, %v6294_v20  ;;  %v6384_v20 = vsel %vm2991_vm13, %v5856_v9, 128  ;;  %vm2831_vm13 = vcmp.eq.s32.totalorder %v5856_v9, %v6063_v18 }
 0x2ae   :  { %7301 = vst [vmem:[#allocation61_spill] sm:$0xff] %v6384_v20 }
 0x2af   :  { %3170 = vmin.xlane.f32.xlu1 %v6345_v52  ;;  %v2484_v11 = vmul.f32 1.442695, %v2441_v21  ;;  %v2439_v21 = vsub.f32 %v5978_v28, %v6309_v57 }
 0x2b0   :  { %v6348_v32 = vpop.xlane.xlu0 %2394 }
 0x2b1   :  { %7293 = vst [vmem:[#allocation53_spill] sm:$0xff] %v6348_v32  ;;  %v2444_v46 = vsub.f32 %v5986_v22, %v6348_v32  ;;  %vm2990_vm11 = vcmp.eq.f32.partialorder %v5986_v22, %v6348_v32 }
 0x2b2   :  { %v5095_v56 = vpop.eup %5094  ;;  %v6357_v48 = vsel %vm2990_vm11, %v5856_v9, 128 }
 0x2b3   :  { %7295 = vst [vmem:[#allocation55_spill] sm:$0xff] %v6357_v48  ;;  %v2490_v44 = vmul.f32 1.442695, %v2444_v46  ;;  %2542 = vadd.xlane.f32.xlu0 %v5095_v56  ;;  %2540 = vadd.xlane.f32.xlu1 %v5093_v2  ;;  %v3237_v24 = vshra.s32 %v6357_v48, 16  ;;  %v6376_v56 = vpop.xlane.xlu1 %2392  ;;  %v3251_v48 = vshra.s32 %v6384_v20, 16 }
 0x2b4   :  { %v6362_v52 = vpop.xlane.xlu0 %2390  ;;  %7299 = vst [vmem:[#allocation59_spill] sm:$0xff] %v6376_v56  ;;  %vm2989_vm14 = vcmp.eq.f32.partialorder %v6010_v37, %v6376_v56 }
 0x2b5   :  { %7296 = vst [vmem:[#allocation56_spill] sm:$0xff] %v6362_v52  ;;  %5098 = vpow2.f32 %v2490_v44  ;;  %v2442_v22 = vsub.f32 %v5994_v12, %v6362_v52  ;;  %vm2988_vm12 = vcmp.eq.f32.partialorder %v5994_v12, %v6362_v52  ;;  %v6368_v32 = vcvt.s32.f32 %v3237_v24  ;;  %v5097_v52 = vpop.eup %5096 }
 0x2b6   :  { %v6371_v46 = vsel %vm2988_vm12, %v5856_v9, 128 }
 0x2b7   :  { %7297 = vst [vmem:[#allocation57_spill] sm:$0xff] %v6368_v32  ;;  %7298 = vst [vmem:[#allocation58_spill] sm:$0xff] %v6371_v46  ;;  %v2486_v2 = vmul.f32 1.442695, %v2442_v22  ;;  %3240 = vmin.xlane.f32.xlu1 %v6368_v32  ;;  %v3209_v24 = vshra.s32 %v6371_v46, 16 }
 0x2b8   :  { %v6378_v44 = vpop.xlane.xlu0 %2402 }
 0x2b9   :  { %7300 = vst [vmem:[#allocation60_spill] sm:$0xff] %v6378_v44  ;;  %5100 = vpow2.f32 %v2486_v2  ;;  %v2448_v12 = vsub.f32 %v6018_v8, %v6378_v44  ;;  %v6394_v46 = vcvt.s32.f32 %v3209_v24  ;;  %vm2994_vm15 = vcmp.eq.f32.partialorder %v6018_v8, %v6378_v44 }
 0x2ba   :  { %5102 = vpow2.f32 %v2484_v11  ;;  %v2480_v11 = vmul.f32 1.442695, %v2439_v21 }
 0x2bb   :  { %v2498_v22 = vmul.f32 1.442695, %v2448_v12  ;;  %2536 = vadd.xlane.f32.xlu1 %v5097_v52  ;;  %7303 = vst [vmem:[#allocation63_spill] sm:$0xff] %v6394_v46  ;;  %v6398_v12 = vsel %vm2989_vm14, %v5856_v9, 128 }
 0x2bc   :  { %v6390_v32 = vpop.xlane.xlu0 %2398  ;;  %7304 = vst [vmem:[#allocation64_spill] sm:$0xff] %v6398_v12  ;;  %v3223_v24 = vshra.s32 %v6398_v12, 16  ;;  %v6418_v12 = vsel %vm2994_vm15, %v5856_v9, 128  ;;  %vm2832_vm15 = vcmp.eq.s32.totalorder %v5856_v9, %v6083_v39 }
 0x2bd   :  { %7302 = vst [vmem:[#allocation62_spill] sm:$0xff] %v6390_v32  ;;  %5104 = vpow2.f32 %v2498_v22  ;;  %v2446_v2 = vsub.f32 %v6025_v0, %v6390_v32  ;;  %v6405_v22 = vcvt.s32.f32 %v3251_v48  ;;  %7309 = vst [vmem:[#allocation69_spill] sm:$0xff] %v6418_v12  ;;  %vm2992_vm0 = vcmp.eq.f32.partialorder %v6025_v0, %v6390_v32 }
 0x2bf   :  { %v2494_v52 = vmul.f32 1.442695, %v2446_v2  ;;  %3212 = vmin.xlane.f32.xlu1 %v6394_v46  ;;  %7306 = vst [vmem:[#allocation66_spill] sm:$0xff] %v6405_v22 }
 0x2c0   :  { %v6401_v33 = vpop.xlane.xlu0 %2410 }
 0x2c1   :  { %7305 = vst [vmem:[#allocation65_spill] sm:$0xff] %v6401_v33  ;;  %5106 = vpow2.f32 %v2494_v52  ;;  %v2452_v28 = vsub.f32 %v6049_v35, %v6401_v33  ;;  %v6415_v52 = vcvt.s32.f32 %v3223_v24  ;;  %v6426_v24 = vpop.xlane.xlu1 %2404  ;;  %vm2998_vm3 = vcmp.eq.f32.partialorder %v6049_v35, %v6401_v33 }
 0x2c2   :  { %v5099_v57 = vpop.eup %5098  ;;  %5108 = vpow2.f32 %v2480_v11  ;;  %v3293_v11 = vshra.s32 %v6418_v12, 16  ;;  %7311 = vst [vmem:[#allocation71_spill] sm:$0xff] %v6426_v24  ;;  %vm2995_vm1 = vcmp.eq.f32.partialorder %v6033_v58, %v6426_v24 }
 0x2c3   :  { %v2506_v20 = vmul.f32 1.442695, %v2452_v28  ;;  %2554 = vadd.xlane.f32.xlu0 %v5099_v57  ;;  %3254 = vmin.xlane.f32.xlu1 %v6405_v22  ;;  %7308 = vst [vmem:[#allocation68_spill] sm:$0xff] %v6415_v52  ;;  %v6439_v22 = vsel %vm2992_vm0, %v5856_v9, 128 }
 0x2c4   :  { %v6411_v21 = vpop.xlane.xlu0 %2406  ;;  %7314 = vst [vmem:[#allocation74_spill] sm:$0xff] %v6439_v22 }
 0x2c5   :  { %7307 = vst [vmem:[#allocation67_spill] sm:$0xff] %v6411_v21  ;;  %5110 = vpow2.f32 %v2506_v20  ;;  %v2450_v2 = vsub.f32 %v6054_v54, %v6411_v21  ;;  %vm2996_vm4 = vcmp.eq.f32.partialorder %v6054_v54, %v6411_v21 }
 0x2c6   :  { %v5101_v48 = vpop.eup %5100 }
 0x2c7   :  { %v2502_v46 = vmul.f32 1.442695, %v2450_v2  ;;  %2550 = vadd.xlane.f32.xlu0 %v5101_v48  ;;  %3226 = vmin.xlane.f32.xlu1 %v6415_v52  ;;  %v5103_v57 = vpop.eup %5102  ;;  %v2445_v48 = vsub.f32 %v6004_v31, %v6354_v53  ;;  %v6436_v52 = vcvt.s32.f32 %v3293_v11  ;;  %v3265_v11 = vshra.s32 %v6439_v22, 16 }
 0x2c8   :  { %v6421_v8 = vpop.xlane.xlu0 %2418  ;;  %v6450_v53 = vsel %vm2995_vm1, %v5856_v9, 128  ;;  %vm2833_vm1 = vcmp.eq.s32.totalorder %v5856_v9, %v6098_v47 }
 0x2c9   :  { %7310 = vst [vmem:[#allocation70_spill] sm:$0xff] %v6421_v8  ;;  %5112 = vpow2.f32 %v2502_v46  ;;  %v2456_v20 = vsub.f32 %v6072_v16, %v6421_v8  ;;  %7313 = vst [vmem:[#allocation73_spill] sm:$0xff] %v6436_v52  ;;  %vm3002_vm7 = vcmp.eq.f32.partialorder %v6072_v16, %v6421_v8 }
 0x2ca   :  { %v5105_v28 = vpop.eup %5104  ;;  %7317 = vst [vmem:[#allocation77_spill] sm:$0xff] %v6450_v53 }
 0x2cb   :  { %v2514_v44 = vmul.f32 1.442695, %v2456_v20  ;;  %2562 = vadd.xlane.f32.xlu0 %v5105_v28  ;;  %2548 = vadd.xlane.f32.xlu1 %v5103_v57  ;;  %v6444_v57 = vpop.xlane.xlu1 %2400  ;;  %v2492_v28 = vmul.f32 1.442695, %v2445_v48  ;;  %v6460_v48 = vcvt.s32.f32 %v3265_v11 }
 0x2cc   :  { %v6430_v2 = vpop.xlane.xlu0 %2414  ;;  %7315 = vst [vmem:[#allocation75_spill] sm:$0xff] %v6444_v57  ;;  %vm2993_vm2 = vcmp.eq.f32.partialorder %v6039_v5, %v6444_v57 }
 0x2cd   :  { %7312 = vst [vmem:[#allocation72_spill] sm:$0xff] %v6430_v2  ;;  %5114 = vpow2.f32 %v2514_v44  ;;  %v2454_v46 = vsub.f32 %v6078_v30, %v6430_v2  ;;  %vm3000_vm8 = vcmp.eq.f32.partialorder %v6078_v30, %v6430_v2 }
 0x2ce   :  { %v5107_v12 = vpop.eup %5106 }
 0x2cf   :  { %v2510_v62 = vmul.f32 1.442695, %v2454_v46  ;;  %2558 = vadd.xlane.f32.xlu0 %v5107_v12  ;;  %3296 = vmin.xlane.f32.xlu1 %v6436_v52  ;;  %v5109_v44 = vpop.eup %5108  ;;  %v2443_v12 = vsub.f32 %v6010_v37, %v6376_v56  ;;  %v6474_v38 = vpop.xlane.xlu1 %2412 }
 0x2d0   :  { %v6446_v20 = vpop.xlane.xlu0 %2904  ;;  %7321 = vst [vmem:[#allocation81_spill] sm:$0xff] %v6474_v38  ;;  %vm2999_vm5 = vcmp.eq.f32.partialorder %v6060_v51, %v6474_v38 }
 0x2d1   :  { %7316 = vst [vmem:[#allocation76_spill] sm:$0xff] %v6446_v20  ;;  %5116 = vpow2.f32 %v2510_v62  ;;  %v3307_v20 = vshra.s32 %v6450_v53, 16  ;;  %v2488_v52 = vmul.f32 1.442695, %v2443_v12 }
 0x2d2   :  { %v5111_v32 = vpop.eup %5110  ;;  %5118 = vpow2.f32 %v2492_v28 }
 0x2d3   :  { %2570 = vadd.xlane.f32.xlu0 %v5111_v32  ;;  %2544 = vadd.xlane.f32.xlu1 %v5109_v44  ;;  %v6464_v32 = vsel %vm2993_vm2, %v5856_v9, 128  ;;  %v6471_v56 = vcvt.s32.f32 %v3307_v20  ;;  %v6482_v20 = vsel %vm2998_vm3, %v5856_v9, 128  ;;  %vm2834_vm3 = vcmp.eq.s32.totalorder %v5856_v9, %v6114_v19 }
 0x2d4   :  { %v6456_v46 = vpop.xlane.xlu0 %2422  ;;  %7319 = vst [vmem:[#allocation79_spill] sm:$0xff] %v6464_v32  ;;  %v3279_v11 = vshra.s32 %v6464_v32, 16  ;;  %7322 = vst [vmem:[#allocation82_spill] sm:$0xff] %v6482_v20  ;;  %v3349_v32 = vshra.s32 %v6482_v20, 16 }
 0x2d5   :  { %7318 = vst [vmem:[#allocation78_spill] sm:$0xff] %v6456_v46  ;;  %v2458_v62 = vsub.f32 %v6100_v42, %v6456_v46  ;;  %vm3004_vm14 = vcmp.eq.f32.partialorder %v6100_v42, %v6456_v46 }
 0x2d6   :  { %v5113_v22 = vpop.eup %5112  ;;  %v6479_v12 = vcvt.s32.f32 %v3279_v11  ;;  %v6495_v11 = vsel %vm2996_vm4, %v5856_v9, 128  ;;  %v6598_v18 = vsel %vm3004_vm14, %v5856_v9, 128  ;;  %vm2835_vm4 = vcmp.eq.s32.totalorder %v5856_v9, %v6127_v7 }
 0x2d7   :  { %v2518_v44 = vmul.f32 1.442695, %v2458_v62  ;;  %2566 = vadd.xlane.f32.xlu0 %v5113_v22  ;;  %3268 = vmin.xlane.f32.xlu1 %v6460_v48  ;;  %7325 = vst [vmem:[#allocation85_spill] sm:$0xff] %v6495_v11 }
 0x2d8   :  { %v6467_v37 = vpop.xlane.xlu0 %2426 }
 0x2d9   :  { %7320 = vst [vmem:[#allocation80_spill] sm:$0xff] %v6467_v37  ;;  %5120 = vpow2.f32 %v2518_v44  ;;  %v2460_v28 = vsub.f32 %v6109_v49, %v6467_v37  ;;  %v6485_v44 = vpop.xlane.xlu1 %2408  ;;  %vm3006_vm2 = vcmp.eq.f32.partialorder %v6109_v49, %v6467_v37  ;;  %v7380_v37 = vld [vmem:[#allocation69_spill] sm:$0xff] }
 0x2da   :  { %v5115_v53 = vpop.eup %5114  ;;  %5122 = vpow2.f32 %v2488_v52  ;;  %7323 = vst [vmem:[#allocation83_spill] sm:$0xff] %v6485_v44  ;;  %v6492_v52 = vcvt.s32.f32 %v3349_v32  ;;  %vm2997_vm6 = vcmp.eq.f32.partialorder %v6066_v23, %v6485_v44  ;;  %v2447_v32 = vsub.f32 %v6039_v5, %v6444_v57 }
 0x2db   :  { %v2522_v22 = vmul.f32 1.442695, %v2460_v28  ;;  %2578 = vadd.xlane.f32.xlu0 %v5115_v53  ;;  %3310 = vmin.xlane.f32.xlu1 %v6471_v56  ;;  %v2449_v53 = vsub.f32 %v6033_v58, %v6426_v24  ;;  %v6504_v58 = vsel %vm2999_vm5, %v5856_v9, 128  ;;  %v3068_v57 = vand.u32 65535, %v6181_v43 }
 0x2dc   :  { %7324 = vst [vmem:[#allocation84_spill] sm:$0xff] %v6492_v52  ;;  %v2453_v43 = vsub.f32 %v6060_v51, %v6474_v38  ;;  %vm2836_vm5 = vcmp.eq.s32.totalorder %v5856_v9, %v6131_v41 }
 0x2dd   :  { %5124 = vpow2.f32 %v2522_v22  ;;  %v6499_v22 = vpop.xlane.xlu1 %2420  ;;  %v2500_v33 = vmul.f32 1.442695, %v2449_v53  ;;  %v3363_v53 = vshra.s32 %v6504_v58, 16 }
 0x2de   :  { %v5117_v62 = vpop.eup %5116  ;;  %7326 = vst [vmem:[#allocation86_spill] sm:$0xff] %v6499_v22  ;;  %vm3003_vm10 = vcmp.eq.f32.partialorder %v6086_v29, %v6499_v22 }
 0x2df   :  { %2574 = vadd.xlane.f32.xlu0 %v5117_v62  ;;  %3282 = vmin.xlane.f32.xlu1 %v6479_v12  ;;  %v5119_v35 = vpop.eup %5118  ;;  %5126 = vpow2.f32 %v2500_v33 }
 0x2e3   :  { %2556 = vadd.xlane.f32.xlu1 %v5119_v35  ;;  %v3321_v35 = vshra.s32 %v6495_v11, 16  ;;  %v6516_v11 = vsel %vm2997_vm6, %v5856_v9, 128 }
 0x2e4   :  { %7328 = vst [vmem:[#allocation88_spill] sm:$0xff] %v6516_v11  ;;  %v3335_v33 = vshra.s32 %v6516_v11, 16 }
 0x2e5   :  { %v6512_v24 = vcvt.s32.f32 %v3321_v35  ;;  %v6530_v35 = vsel %vm3002_vm7, %v5856_v9, 128  ;;  %vm2837_vm7 = vcmp.eq.s32.totalorder %v5856_v9, %v6134_v10  ;;  %v5208_v10 = vld [vmem:[#allocation7 + $0xb0] sm:$0xff] }
 0x2e6   :  { %v5121_v28 = vpop.eup %5120 }
 0x2e7   :  { %2582 = vadd.xlane.f32.xlu0 %v5121_v28  ;;  %3352 = vmin.xlane.f32.xlu1 %v6492_v52  ;;  %v5123_v62 = vpop.eup %5122  ;;  %v6510_v28 = vpop.xlane.xlu1 %2416  ;;  %v2496_v52 = vmul.f32 1.442695, %v2447_v32 }
 0x2e8   :  { %7327 = vst [vmem:[#allocation87_spill] sm:$0xff] %v6510_v28  ;;  %vm3001_vm11 = vcmp.eq.f32.partialorder %v6090_v4, %v6510_v28 }
 0x2e9   :  { %5128 = vpow2.f32 %v2496_v52  ;;  %v3070_v52 = vcvt.s32.f32 %v3068_v57  ;;  %v2508_v57 = vmul.f32 1.442695, %v2453_v43 }
 0x2ea   :  { %v5125_v21 = vpop.eup %5124 }
 0x2eb   :  { %2586 = vadd.xlane.f32.xlu0 %v5125_v21  ;;  %2552 = vadd.xlane.f32.xlu1 %v5123_v62  ;;  %v6519_v20 = vpop.xlane.xlu1 %2424  ;;  %v6521_v21 = vcvt.s32.f32 %v3363_v53  ;;  %v6527_v62 = vcvt.s32.f32 %v3335_v33  ;;  %v3405_v53 = vshra.s32 %v6530_v35, 16  ;;  %5130 = vpow2.f32 %v2508_v57 }
 0x2ec   :  { %v5127_v11 = vpop.eup %5126  ;;  %vm3005_vm0 = vcmp.eq.f32.partialorder %v6111_v55, %v6519_v20  ;;  %v2459_v49 = vsub.f32 %v6111_v55, %v6519_v20 }
 0x2ed   :  { %7329 = vst [vmem:[#allocation89_spill] sm:$0xff] %v6527_v62  ;;  %v6545_v8 = vcvt.s32.f32 %v3405_v53  ;;  %v6559_v53 = vsel %vm3003_vm10, %v5856_v9, 128  ;;  %vm2840_vm10 = vcmp.eq.s32.totalorder %v5856_v9, %v6145_v36  ;;  %v7337_v36 = vld [vmem:[#allocation24_spill] sm:$0xff] }
 0x2ee   :  { %7334 = vst [vmem:[#allocation94_spill] sm:$0xff] %v6559_v53 }
 0x2ef   :  { %3324 = vmin.xlane.f32.xlu1 %v6512_v24  ;;  %v6533_v32 = vpop.xlane.xlu1 %2428  ;;  %7332 = vst [vmem:[#allocation92_spill] sm:$0xff] %v6545_v8 }
 0x2f0   :  { %7330 = vst [vmem:[#allocation90_spill] sm:$0xff] %v6533_v32  ;;  %v2461_v55 = vsub.f32 %v6122_v50, %v6533_v32  ;;  %vm3007_vm6 = vcmp.eq.f32.partialorder %v6122_v50, %v6533_v32 }
 0x2f3   :  { %3366 = vmin.xlane.f32.xlu1 %v6521_v21 }
 0x2f7   :  { %3338 = vmin.xlane.f32.xlu1 %v6527_v62  ;;  %v6548_v62 = vsel %vm3000_vm8, %v5856_v9, 128  ;;  %vm2838_vm8 = vcmp.eq.s32.totalorder %v5856_v9, %v6138_v15 }
 0x2f8   :  { %7333 = vst [vmem:[#allocation93_spill] sm:$0xff] %v6548_v62  ;;  %v3377_v51 = vshra.s32 %v6548_v62, 16  ;;  %v6572_v62 = vsel %vm3001_vm11, %v5856_v9, 128  ;;  %vm2841_vm11 = vcmp.eq.s32.totalorder %v5856_v9, %v6150_v14 }
 0x2f9   :  { %v3391_v57 = vshra.s32 %v6572_v62, 16 }
 0x2fa   :  { %v6568_v38 = vcvt.s32.f32 %v3377_v51 }
 0x2fb   :  { %2564 = vadd.xlane.f32.xlu1 %v5127_v11  ;;  %v6539_v16 = vpop.xlane.xlu1 %3072 }
 0x2fc   :  { %7331 = vst [vmem:[#allocation91_spill] sm:$0xff] %v6539_v16  ;;  %vm3074_vm9 = vcmp.eq.f32.partialorder %v6188_v40, %v6539_v16  ;;  %v2451_v40 = vsub.f32 %v6066_v23, %v6485_v44  ;;  %v6564_v16 = vpop.xlane.xlu0 %2906  ;;  %v3419_v44 = vshra.s32 %v6559_v53, 16  ;;  %v6587_v53 = vcvt.s32.f32 %v3391_v57 }
 0x2fd   :  { %v3075_v33 = vsel %vm3074_vm9, %v3070_v52, inf  ;;  %v5129_v52 = vpop.eup %5128  ;;  %v3433_v57 = vshra.s32 %v6598_v18, 16  ;;  %vm2839_vm9 = vcmp.eq.s32.totalorder %v5856_v9, %v6141_v63  ;;  %v2872_v63 = vsel %vm2840_vm10, %v6078_v30, 0.0 }
 0x2fe   :  { %3076 = vmin.xlane.f32.xlu0 %v3075_v33  ;;  %v3054_v33 = vand.u32 65535, %v6226_v26  ;;  %v2504_v43 = vmul.f32 1.442695, %v2451_v40  ;;  %v6577_v26 = vcvt.s32.f32 %v3419_v44  ;;  %v2863_v44 = vsel %vm2831_vm13, %v6004_v31, 0.0 }
 0x2ff   :  { %3408 = vmin.xlane.f32.xlu1 %v6545_v8  ;;  %v2455_v31 = vsub.f32 %v6090_v4, %v6510_v28  ;;  %v6622_v47 = vcvt.s32.f32 %v3433_v57  ;;  %v5207_v57 = vld [vmem:[#allocation7 + $0x98] sm:$0xff]  ;;  %v2873_v30 = vsel %vm2841_vm11, %v6090_v4, 0.0  ;;  %vm3779_vm13 = vcmask 7168  }
 0x300   :  { %v6553_v11 = vpop.xlane.xlu1 %3044  ;;  %5132 = vpow2.f32 %v2504_v43  ;;  %v6582_v40 = vpop.xlane.xlu0 %2908 }
 0x301   :  { %v5131_v43 = vpop.eup %5130 }
 0x303   :  { %2560 = vadd.xlane.f32.xlu1 %v5129_v52  ;;  %v3056_v52 = vcvt.s32.f32 %v3054_v33 }
 0x304   :  { %v6566_v2 = vpop.xlane.xlu1 %3086 }
 0x307   :  { %3380 = vmin.xlane.f32.xlu1 %v6568_v38  ;;  %v2531_v33 = vpop.xlane.xlu0 %2530 }
 0x308   :  { %v6575_v8 = vpop.xlane.xlu1 %3058 }
 0x309   :  { %vm3060_vm12 = vcmp.eq.f32.partialorder %v6233_v25, %v6575_v8  ;;  %v2457_v25 = vsub.f32 %v6086_v29, %v6499_v22  ;;  %v5206_v22 = vld [vmem:[#allocation7 + $0x90] sm:$0xff] }
 0x30a   :  { %v3061_v51 = vsel %vm3060_vm12, %v3056_v52, inf  ;;  %v2864_v52 = vsel %vm2832_vm15, %v6025_v0, 0.0  ;;  %v2865_v0 = vsel %vm2833_vm1, %v6039_v5, 0.0  ;;  %v6626_v5 = vsel %vm3006_vm2, %v5856_v9, 128 }
 0x30b   :  { %3422 = vmin.xlane.f32.xlu1 %v6577_v26  ;;  %3062 = vmin.xlane.f32.xlu0 %v3061_v51  ;;  %v6605_v42 = vpop.xlane.xlu0 %3142  ;;  %v2516_v29 = vmul.f32 1.442695, %v2457_v25  ;;  %v2866_v28 = vsel %vm2834_vm3, %v5206_v22, 0.0  ;;  %v2520_v22 = vmul.f32 1.442695, %v2459_v49 }
 0x30d   :  { %v5133_v51 = vpop.eup %5132  ;;  %5134 = vpow2.f32 %v2516_v29  ;;  %v3461_v29 = vshra.s32 %v6626_v5, 16 }
 0x30f   :  { %3394 = vmin.xlane.f32.xlu1 %v6587_v53  ;;  %2910 = vadd.xlane.f32.xlu0 %v2863_v44  ;;  %v6614_v44 = vsel %vm3005_vm0, %v5856_v9, 128  ;;  %v2527_v46 = vpop.xlane.xlu0 %2526  ;;  %v6643_v7 = vcvt.s32.f32 %v3461_v29 }
 0x310   :  { %v6607_v39 = vpop.xlane.xlu1 %3128  ;;  %v3447_v25 = vshra.s32 %v6614_v44, 16 }
 0x312   :  { %v6635_v19 = vcvt.s32.f32 %v3447_v25  ;;  %v6653_v25 = vsel %vm3007_vm6, %v5856_v9, 128 }
 0x313   :  { %2572 = vadd.xlane.f32.xlu1 %v5131_v43  ;;  %2912 = vadd.xlane.f32.xlu0 %v2864_v52  ;;  %v2512_v43 = vmul.f32 1.442695, %v2455_v31  ;;  %v3475_v50 = vshra.s32 %v6653_v25, 16 }
 0x315   :  { %5136 = vpow2.f32 %v2512_v43  ;;  %v2869_v43 = vsel %vm2837_vm7, %v6066_v23, 0.0 }
 0x316   :  { %5138 = vlog2.f32 %v2527_v46  ;;  %v2868_v46 = vsel %vm2836_vm5, %v6054_v54, 0.0 }
 0x317   :  { %2568 = vadd.xlane.f32.xlu1 %v5133_v51  ;;  %2914 = vadd.xlane.f32.xlu0 %v2865_v0  ;;  %v2867_v51 = vsel %vm2835_vm4, %v5207_v57, 0.0  ;;  %5140 = vlog2.f32 %v2531_v33  ;;  %v2524_v0 = vmul.f32 1.442695, %v2461_v55  ;;  %v2870_v57 = vsel %vm2838_vm8, %v5208_v10, 0.0  ;;  %v5209_v55 = vld [vmem:[#allocation7 + $0xb8] sm:$0xff] }
 0x318   :  { %v6618_v52 = vpop.xlane.xlu1 %3100  ;;  %5142 = vpow2.f32 %v2520_v22  ;;  %v6662_v22 = vcvt.s32.f32 %v3475_v50  ;;  %v3040_v10 = vand.u32 65535, %v6196_v60  ;;  %v7340_v60 = vld [vmem:[#allocation25_spill] sm:$0xff] }
 0x319   :  { %vm3046_vm12 = vcmp.eq.f32.partialorder %v7340_v60, %v6553_v11  ;;  %vm3102_vm3 = vcmp.eq.f32.partialorder %v6275_v61, %v6618_v52  ;;  %v3110_v61 = vand.u32 65535, %v6268_v45 }
 0x31a   :  { %v5135_v41 = vpop.eup %5134 }
 0x31b   :  { %3436 = vmin.xlane.f32.xlu1 %v6622_v47  ;;  %2916 = vadd.xlane.f32.xlu0 %v2866_v28  ;;  %v3112_v45 = vcvt.s32.f32 %v3110_v61  ;;  %v7360_v61 = vld [vmem:[#allocation20_spill] sm:$0xff] }
 0x31c   :  { %v6631_v31 = vpop.xlane.xlu1 %3114 }
 0x31d   :  { %vm3116_vm7 = vcmp.eq.f32.partialorder %v6283_v34, %v6631_v31 }
 0x31f   :  { %3450 = vmin.xlane.f32.xlu1 %v6635_v19  ;;  %2918 = vadd.xlane.f32.xlu0 %v2867_v51 }
 0x320   :  { %v2533_v28 = vpop.xlane.xlu1 %2532 }
 0x322   :  { %v5137_v54 = vpop.eup %5136 }
 0x323   :  { %3464 = vmin.xlane.f32.xlu1 %v6643_v7  ;;  %2920 = vadd.xlane.f32.xlu0 %v2868_v46  ;;  %v5139_v49 = vpop.eup %5138  ;;  %v2871_v46 = vsel %vm2839_vm9, %v5209_v55, 0.0 }
 0x324   :  { %v2529_v33 = vpop.xlane.xlu1 %2528  ;;  %v5141_v23 = vpop.eup %5140  ;;  %v2591_v51 = vmul.f32 0.6931472, %v5139_v49 }
 0x325   :  { %5144 = vlog2.f32 %v2529_v33  ;;  %v2595_v15 = vmul.f32 0.6931472, %v5141_v23 }
 0x326   :  { %5146 = vpow2.f32 %v2524_v0 }
 0x327   :  { %2580 = vadd.xlane.f32.xlu1 %v5135_v41  ;;  %2922 = vadd.xlane.f32.xlu0 %v2869_v43  ;;  %v5143_v41 = vpop.eup %5142  ;;  %v2654_v43 = vadd.f32 %v2591_v51, %v6186_v59  ;;  %v2656_v50 = vadd.f32 %v2595_v15, %v6172_v3  ;;  %v7339_v15 = vld [vmem:[#allocation28_spill] sm:$0xff]  ;;  %5148 = vlog2.f32 %v2533_v28  ;;  %v7344_v28 = vld [vmem:[#allocation27_spill] sm:$0xff] }
 0x328   :  { %v6658_v29 = vpop.xlane.xlu0 %3184  ;;  %vm3088_vm15 = vcmp.eq.f32.partialorder %v7344_v28, %v6566_v2 }
 0x329   :  { %7335 = vst [vmem:[#allocation95_spill] sm:$0xff] %v6658_v29  ;;  %v2944_v23 = vsub.f32 %v2654_v43, %v6184_v27  ;;  %v3042_v27 = vcvt.s32.f32 %v3040_v10  ;;  %v7343_v43 = vld [vmem:[#allocation14_spill] sm:$0xff]  ;;  %v7345_v10 = vld [vmem:[#allocation32_spill] sm:$0xff] }
 0x32a   :  { %vm2842_vm14 = vcmp.eq.s32.totalorder %v5856_v9, %v7343_v43  ;;  %v3096_v43 = vand.u32 65535, %v6265_v1 }
 0x32b   :  { %2576 = vadd.xlane.f32.xlu1 %v5137_v54  ;;  %2924 = vadd.xlane.f32.xlu0 %v2870_v57  ;;  %v3780_v4 = vsel %vm3779_vm13, %v2944_v23, 0.0 }
 0x32c   :  { %v2539_v33 = vpop.xlane.xlu0 %2538 }
 0x32f   :  { %3478 = vmin.xlane.f32.xlu1 %v6662_v22  ;;  %2926 = vadd.xlane.f32.xlu0 %v2871_v46  ;;  %v7338_v46 = vld [vmem:[#allocation19_spill] sm:$0xff] }
 0x330   :  { %v6665_v0 = vpop.xlane.xlu1 %3156  ;;  %v2535_v51 = vpop.xlane.xlu0 %2534  ;;  %v2946_v3 = vsub.f32 %v2656_v50, %v7338_v46  ;;  %v3124_v46 = vand.u32 65535, %v7345_v10  ;;  %v7351_v10 = vld [vmem:[#allocation15_spill] sm:$0xff] }
 0x331   :  { %5150 = vlog2.f32 %v2535_v51  ;;  %vm2845_vm4 = vcmp.eq.s32.totalorder %v5856_v9, %v7351_v10  ;;  %vm3158_vm9 = vcmp.eq.f32.partialorder %v6330_v6, %v6665_v0 }
 0x332   :  { %v5145_v54 = vpop.eup %5144  ;;  %5152 = vlog2.f32 %v2539_v33 }
 0x333   :  { %v2593_v49 = vmul.f32 0.6931472, %v5145_v54  ;;  %2584 = vadd.xlane.f32.xlu1 %v5143_v41  ;;  %2928 = vadd.xlane.f32.xlu0 %v2872_v63  ;;  %v5147_v59 = vpop.eup %5146  ;;  %v7341_v54 = vld [vmem:[#allocation23_spill] sm:$0xff] }
 0x334   :  { %v6673_v57 = vpop.xlane.xlu1 %3198  ;;  %v3082_v63 = vand.u32 65535, %v7341_v54  ;;  %v7346_v54 = vld [vmem:[#allocation16_spill] sm:$0xff]  ;;  %v5149_v1 = vpop.eup %5148 }
 0x335   :  { %7336 = vst [vmem:[#allocation96_spill] sm:$0xff] %v6673_v57  ;;  %v2655_v55 = vadd.f32 %v2593_v49, %v7337_v36  ;;  %v3047_v36 = vsel %vm3046_vm12, %v3042_v27, inf  ;;  %vm2843_vm0 = vcmp.eq.s32.totalorder %v5856_v9, %v7346_v54 }
 0x336   :  { %v3084_v23 = vcvt.s32.f32 %v3082_v63  ;;  %v5212_v63 = vld [vmem:[#allocation7 + $0xe0] sm:$0xff] }
 0x337   :  { %v2945_v41 = vsub.f32 %v2655_v55, %v7339_v15  ;;  %2588 = vadd.xlane.f32.xlu1 %v5147_v59  ;;  %2930 = vadd.xlane.f32.xlu0 %v2873_v30  ;;  %v5210_v55 = vld [vmem:[#allocation7 + $0xd0] sm:$0xff]  ;;  %v3783_v30 = vsel %vm3779_vm13, %v2946_v3, 0.0 }
 0x338   :  { %v6685_v14 = vpop.xlane.xlu1 %3170  ;;  %v2874_v59 = vsel %vm2842_vm14, %v5210_v55, 0.0  ;;  %v3089_v51 = vsel %vm3088_vm15, %v3084_v23, inf  ;;  %v7347_v3 = vld [vmem:[#allocation35_spill] sm:$0xff]  ;;  %v5213_v23 = vld [vmem:[#allocation7 + $0xe8] sm:$0xff] }
 0x339   :  { %7342 = vst [vmem:[#allocation24_spill] sm:$0xff] %v6685_v14  ;;  %v3781_v50 = vsel %vm3779_vm13, %v2945_v41, 0.0  ;;  %v5211_v41 = vld [vmem:[#allocation7 + $0xd8] sm:$0xff]  ;;  %vm3130_vm1 = vcmp.eq.f32.partialorder %v7347_v3, %v6607_v39  ;;  %v7354_v3 = vld [vmem:[#allocation18_spill] sm:$0xff] }
 0x33a   :  { %v3782_v49 = vadd.f32 %v3781_v50, %v3780_v4  ;;  %v2875_v27 = vsel %vm2843_vm0, %v5211_v41, 0.0  ;;  %v3126_v50 = vcvt.s32.f32 %v3124_v46  ;;  %vm2846_vm6 = vcmp.eq.s32.totalorder %v5856_v9, %v7354_v3 }
 0x33b   :  { %3048 = vmin.xlane.f32.xlu1 %v3047_v36  ;;  %2932 = vadd.xlane.f32.xlu0 %v2874_v59  ;;  %v3098_v59 = vcvt.s32.f32 %v3096_v43  ;;  %v2597_v43 = vmul.f32 0.6931472, %v5149_v1  ;;  %v2547_v1 = vpop.xlane.xlu0 %2546 }
 0x33c   :  { %v6695_v15 = vadd.f32 %v3783_v30, %v3782_v49  ;;  %v2541_v60 = vpop.xlane.xlu1 %2540  ;;  %v7349_v49 = vld [vmem:[#allocation17_spill] sm:$0xff]  ;;  %v3131_v55 = vsel %vm3130_vm1, %v3126_v50, inf }
 0x33d   :  { %vm2844_vm2 = vcmp.eq.s32.totalorder %v5856_v9, %v7349_v49  ;;  %5154 = vlog2.f32 %v2541_v60  ;;  %v7350_v30 = vld [vmem:[#allocation29_spill] sm:$0xff]  ;;  %v2877_v60 = vsel %vm2845_vm4, %v5213_v23, 0.0  ;;  %v3103_v54 = vsel %vm3102_vm3, %v3098_v59, inf  ;;  %v5214_v49 = vld [vmem:[#allocation7 + $0xf0] sm:$0xff] }
 0x33e   :  { %v2876_v36 = vsel %vm2844_vm2, %v5212_v63, 0.0  ;;  %v3138_v28 = vand.u32 65535, %v7350_v30  ;;  %v5151_v46 = vpop.eup %5150  ;;  %v2878_v63 = vsel %vm2846_vm6, %v5214_v49, 0.0  ;;  %v3180_v59 = vand.u32 65535, %v6297_v17  ;;  %v7356_v30 = vld [vmem:[#allocation22_spill] sm:$0xff]  ;;  %v7361_v17 = vld [vmem:[#allocation36_spill] sm:$0xff] }
 0x33f   :  { %3090 = vmin.xlane.f32.xlu1 %v3089_v51  ;;  %2934 = vadd.xlane.f32.xlu0 %v2875_v27  ;;  %v7352_v51 = vld [vmem:[#allocation31_spill] sm:$0xff]  ;;  %v2599_v50 = vmul.f32 0.6931472, %v5151_v46  ;;  %v3117_v23 = vsel %vm3116_vm7, %v3112_v45, inf }
 0x340   :  { %v6702_v4 = vpop.xlane.xlu1 %3240  ;;  %vm3144_vm5 = vcmp.eq.f32.partialorder %v7352_v51, %v6605_v42  ;;  %v3140_v27 = vcvt.s32.f32 %v3138_v28  ;;  %v2657_v28 = vadd.f32 %v2597_v43, %v7356_v30  ;;  %v7358_v51 = vld [vmem:[#allocation45_spill] sm:$0xff]  ;;  %v3182_v3 = vcvt.s32.f32 %v3180_v59  ;;  %v2543_v43 = vpop.xlane.xlu0 %2542  ;;  %v7362_v30 = vld [vmem:[#allocation30_spill] sm:$0xff] }
 0x341   :  { %7348 = vst [vmem:[#allocation19_spill] sm:$0xff] %v6702_v4  ;;  %v2658_v10 = vadd.f32 %v2599_v50, %v6260_v13  ;;  %v3152_v34 = vand.u32 65535, %v7358_v51  ;;  %v7364_v51 = vld [vmem:[#allocation26_spill] sm:$0xff] }
 0x342   :  { %v2947_v49 = vsub.f32 %v2657_v28, %v7360_v61  ;;  %v7365_v61 = vld [vmem:[#allocation33_spill] sm:$0xff] }
 0x343   :  { %2936 = vadd.xlane.f32.xlu0 %v2876_v36  ;;  %3132 = vmin.xlane.f32.xlu1 %v3131_v55  ;;  %v3145_v36 = vsel %vm3144_vm5, %v3140_v27, inf  ;;  %v5153_v55 = vpop.eup %5152  ;;  %v3154_v59 = vcvt.s32.f32 %v3152_v34  ;;  %v7369_v34 = vld [vmem:[#allocation48_spill] sm:$0xff] }
 0x344   :  { %v2537_v33 = vpop.xlane.xlu1 %2536  ;;  %v3785_v28 = vsel %vm3779_vm13, %v2947_v49, 0.0 }
 0x345   :  { %5156 = vlog2.f32 %v2537_v33 }
 0x346   :  { %5158 = vlog2.f32 %v2543_v43  ;;  %v7368_v43 = vld [vmem:[#allocation50_spill] sm:$0xff] }
 0x347   :  { %2938 = vadd.xlane.f32.xlu0 %v2877_v60  ;;  %3104 = vmin.xlane.f32.xlu1 %v3103_v54  ;;  %v7357_v60 = vld [vmem:[#allocation42_spill] sm:$0xff]  ;;  %v2603_v54 = vmul.f32 0.6931472, %v5153_v55  ;;  %vm3200_vm10 = vcmp.eq.f32.partialorder %v7368_v43, %v6673_v57  ;;  %5160 = vlog2.f32 %v2547_v1 }
 0x348   :  { %v6714_v41 = vpop.xlane.xlu1 %3212  ;;  %vm3186_vm8 = vcmp.eq.f32.partialorder %v7357_v60, %v6658_v29  ;;  %v7363_v55 = vld [vmem:[#allocation46_spill] sm:$0xff] }
 0x349   :  { %7353 = vst [vmem:[#allocation28_spill] sm:$0xff] %v6714_v41  ;;  %v3187_v50 = vsel %vm3186_vm8, %v3182_v3, inf  ;;  %v2660_v45 = vadd.f32 %v2603_v54, %v7362_v30  ;;  %v3786_v54 = vadd.f32 %v3785_v28, %v6695_v15  ;;  %v7367_v30 = vld [vmem:[#allocation38_spill] sm:$0xff] }
 0x34a   :  { %v5155_v46 = vpop.eup %5154 }
 0x34b   :  { %2940 = vadd.xlane.f32.xlu0 %v2878_v63  ;;  %3146 = vmin.xlane.f32.xlu1 %v3145_v36  ;;  %v2948_v63 = vsub.f32 %v2658_v10, %v7361_v17  ;;  %v2605_v36 = vmul.f32 0.6931472, %v5155_v46  ;;  %v3159_v17 = vsel %vm3158_vm9, %v3154_v59, inf }
 0x34c   :  { %v6720_v33 = vpop.xlane.xlu1 %3254 }
 0x34d   :  { %7355 = vst [vmem:[#allocation25_spill] sm:$0xff] %v6720_v33  ;;  %v3787_v10 = vsel %vm3779_vm13, %v2948_v63, 0.0  ;;  %v2661_v46 = vadd.f32 %v2605_v36, %v7364_v51  ;;  %v6746_v63 = vpop.xlane.xlu0 %2554  ;;  %v7370_v51 = vld [vmem:[#allocation37_spill] sm:$0xff] }
 0x34e   :  { %v3788_v49 = vadd.f32 %v3787_v10, %v3786_v54  ;;  %v7372_v10 = vld [vmem:[#allocation55_spill] sm:$0xff] }
 0x34f   :  { %3118 = vmin.xlane.f32.xlu1 %v3117_v23  ;;  %v3194_v23 = vand.u32 65535, %v7363_v55  ;;  %v3166_v55 = vand.u32 65535, %v7369_v34  ;;  %v2951_v15 = vsub.f32 %v2661_v46, %v7370_v51  ;;  %v3236_v1 = vand.u32 65535, %v7372_v10 }
 0x350   :  { %v6728_v27 = vpop.xlane.xlu1 %3226 }
 0x351   :  { %7359 = vst [vmem:[#allocation23_spill] sm:$0xff] %v6728_v27 }
 0x352   :  { %v5157_v13 = vpop.eup %5156 }
 0x353   :  { %v2601_v32 = vmul.f32 0.6931472, %v5157_v13  ;;  %3188 = vmin.xlane.f32.xlu1 %v3187_v50  ;;  %v7366_v13 = vld [vmem:[#allocation34_spill] sm:$0xff] }
 0x354   :  { %v2549_v60 = vpop.xlane.xlu1 %2548  ;;  %v2950_v50 = vsub.f32 %v2660_v45, %v7366_v13  ;;  %v3168_v13 = vcvt.s32.f32 %v3166_v55  ;;  %v7375_v55 = vld [vmem:[#allocation63_spill] sm:$0xff] }
 0x355   :  { %v2659_v3 = vadd.f32 %v2601_v32, %v7365_v61  ;;  %v3196_v32 = vcvt.s32.f32 %v3194_v23  ;;  %5162 = vlog2.f32 %v2549_v60  ;;  %v3793_v23 = vsel %vm3779_vm13, %v2951_v15, 0.0  ;;  %v7373_v60 = vld [vmem:[#allocation57_spill] sm:$0xff] }
 0x356   :  { %v3791_v61 = vsel %vm3779_vm13, %v2950_v50, 0.0  ;;  %vm3242_vm12 = vcmp.eq.f32.partialorder %v7373_v60, %v6702_v4  ;;  %v7374_v50 = vld [vmem:[#allocation58_spill] sm:$0xff]  ;;  %vm3214_vm14 = vcmp.eq.f32.partialorder %v7375_v55, %v6714_v41  ;;  %v7376_v15 = vld [vmem:[#allocation61_spill] sm:$0xff]  ;;  %v7379_v60 = vld [vmem:[#allocation44_spill] sm:$0xff] }
 0x357   :  { %v2949_v6 = vsub.f32 %v2659_v3, %v7367_v30  ;;  %3160 = vmin.xlane.f32.xlu1 %v3159_v17  ;;  %v3201_v28 = vsel %vm3200_vm10, %v3196_v32, inf  ;;  %v7371_v3 = vld [vmem:[#allocation52_spill] sm:$0xff]  ;;  %v6757_v30 = vpop.xlane.xlu0 %2550  ;;  %v3208_v43 = vand.u32 65535, %v7374_v50  ;;  %v5159_v32 = vpop.eup %5158 }
 0x358   :  { %v6748_v36 = vpop.xlane.xlu1 %3296  ;;  %vm3172_vm11 = vcmp.eq.f32.partialorder %v7371_v3, %v6685_v14  ;;  %v5161_v10 = vpop.eup %5160  ;;  %v7384_v41 = vld [vmem:[#allocation40_spill] sm:$0xff] }
 0x359   :  { %v3789_v59 = vsel %vm3779_vm13, %v2949_v6, 0.0  ;;  %v3173_v6 = vsel %vm3172_vm11, %v3168_v13, inf  ;;  %v3210_v3 = vcvt.s32.f32 %v3208_v43  ;;  %v7378_v13 = vld [vmem:[#allocation64_spill] sm:$0xff] }
 0x35a   :  { %v3790_v45 = vadd.f32 %v3789_v59, %v3788_v49  ;;  %v3238_v49 = vcvt.s32.f32 %v3236_v1  ;;  %v3250_v59 = vand.u32 65535, %v7376_v15  ;;  %v7377_v1 = vld [vmem:[#allocation66_spill] sm:$0xff] }
 0x35b   :  { %3202 = vmin.xlane.f32.xlu1 %v3201_v28  ;;  %v6767_v28 = vpop.xlane.xlu0 %2562  ;;  %vm3256_vm15 = vcmp.eq.f32.partialorder %v7377_v1, %v6720_v33  ;;  %v7382_v1 = vld [vmem:[#allocation39_spill] sm:$0xff] }
 0x35c   :  { %v3792_v54 = vadd.f32 %v3791_v61, %v3790_v45  ;;  %v2545_v17 = vpop.xlane.xlu1 %2544  ;;  %v3243_v51 = vsel %vm3242_vm12, %v3238_v49, inf  ;;  %v2607_v45 = vmul.f32 0.6931472, %v5159_v32  ;;  %v3252_v32 = vcvt.s32.f32 %v3250_v59 }
 0x35d   :  { %5164 = vlog2.f32 %v2545_v17 }
 0x35e   :  { %v3794_v46 = vadd.f32 %v3793_v23, %v3792_v54  ;;  %v3215_v54 = vsel %vm3214_vm14, %v3210_v3, inf  ;;  %v3222_v23 = vand.u32 65535, %v7378_v13  ;;  %v2662_v50 = vadd.f32 %v2607_v45, %v7379_v60  ;;  %v7383_v13 = vld [vmem:[#allocation47_spill] sm:$0xff] }
 0x35f   :  { %3174 = vmin.xlane.f32.xlu1 %v3173_v6  ;;  %v2611_v6 = vmul.f32 0.6931472, %v5161_v10  ;;  %v6777_v55 = vpop.xlane.xlu0 %2558  ;;  %v3257_v15 = vsel %vm3256_vm15, %v3252_v32, inf  ;;  %v3292_v3 = vand.u32 65535, %v7380_v37  ;;  %v7386_v37 = vld [vmem:[#allocation73_spill] sm:$0xff]  ;;  %5166 = vlog2.f32 %v6757_v30  ;;  %v7393_v30 = vld [vmem:[#allocation82_spill] sm:$0xff] }
 0x360   :  { %v6762_v34 = vpop.xlane.xlu1 %3268  ;;  %v2952_v10 = vsub.f32 %v2662_v50, %v7383_v13  ;;  %v3224_v60 = vcvt.s32.f32 %v3222_v23  ;;  %vm3298_vm1 = vcmp.eq.f32.partialorder %v7386_v37, %v6748_v36 }
 0x361   :  { %v2664_v33 = vadd.f32 %v2611_v6, %v7382_v1  ;;  %v3294_v32 = vcvt.s32.f32 %v3292_v3  ;;  %vm3270_vm2 = vcmp.eq.f32.partialorder %v6460_v48, %v6762_v34 }
 0x362   :  { %v5163_v17 = vpop.eup %5162  ;;  %v3795_v6 = vsel %vm3779_vm13, %v2952_v10, 0.0 }
 0x363   :  { %3244 = vmin.xlane.f32.xlu1 %v3243_v51  ;;  %v2613_v51 = vmul.f32 0.6931472, %v5163_v17  ;;  %v7385_v17 = vld [vmem:[#allocation43_spill] sm:$0xff]  ;;  %v6791_v50 = vpop.xlane.xlu0 %2570  ;;  %v3299_v3 = vsel %vm3298_vm1, %v3294_v32, inf }
 0x364   :  { %v6769_v61 = vpop.xlane.xlu1 %3310  ;;  %v7392_v32 = vld [vmem:[#allocation79_spill] sm:$0xff] }
 0x365   :  { %v2665_v59 = vadd.f32 %v2613_v51, %v7384_v41  ;;  %v3796_v41 = vadd.f32 %v3795_v6, %v3794_v46  ;;  %vm3312_vm3 = vcmp.eq.f32.partialorder %v6471_v56, %v6769_v61 }
 0x367   :  { %3216 = vmin.xlane.f32.xlu1 %v3215_v54  ;;  %v7381_v54 = vld [vmem:[#allocation68_spill] sm:$0xff] }
 0x368   :  { %v6775_v49 = vpop.xlane.xlu1 %3282  ;;  %vm3228_vm0 = vcmp.eq.f32.partialorder %v7381_v54, %v6728_v27  ;;  %v7388_v54 = vld [vmem:[#allocation41_spill] sm:$0xff] }
 0x369   :  { %v3229_v57 = vsel %vm3228_vm0, %v3224_v60, inf  ;;  %v2954_v27 = vsub.f32 %v2664_v33, %v7388_v54  ;;  %v7391_v33 = vld [vmem:[#allocation77_spill] sm:$0xff]  ;;  %v3278_v54 = vand.u32 65535, %v7392_v32  ;;  %vm3284_vm4 = vcmp.eq.f32.partialorder %v6479_v12, %v6775_v49 }
 0x36a   :  { %v5165_v43 = vpop.eup %5164  ;;  %v3306_v60 = vand.u32 65535, %v7391_v33 }
 0x36b   :  { %3258 = vmin.xlane.f32.xlu1 %v3257_v15  ;;  %v2609_v4 = vmul.f32 0.6931472, %v5165_v43  ;;  %v7387_v15 = vld [vmem:[#allocation74_spill] sm:$0xff]  ;;  %v7389_v43 = vld [vmem:[#allocation51_spill] sm:$0xff]  ;;  %v3799_v10 = vsel %vm3779_vm13, %v2954_v27, 0.0 }
 0x36c   :  { %v2557_v45 = vpop.xlane.xlu1 %2556  ;;  %v3264_v29 = vand.u32 65535, %v7387_v15 }
 0x36d   :  { %v2663_v14 = vadd.f32 %v2609_v4, %v7385_v17  ;;  %v7390_v4 = vld [vmem:[#allocation49_spill] sm:$0xff] }
 0x36e   :  { %v2955_v51 = vsub.f32 %v2665_v59, %v7390_v4  ;;  %v3266_v37 = vcvt.s32.f32 %v3264_v29  ;;  %v6804_v59 = vpop.xlane.xlu0 %2566  ;;  %v3308_v29 = vcvt.s32.f32 %v3306_v60  ;;  %v3280_v4 = vcvt.s32.f32 %v3278_v54 }
 0x36f   :  { %3230 = vmin.xlane.f32.xlu1 %v3229_v57  ;;  %v2953_v23 = vsub.f32 %v2663_v14, %v7389_v43  ;;  %v3348_v43 = vand.u32 65535, %v7393_v30 }
 0x370   :  { %v6794_v1 = vpop.xlane.xlu1 %3352  ;;  %v3801_v46 = vsel %vm3779_vm13, %v2955_v51, 0.0  ;;  %v3271_v15 = vsel %vm3270_vm2, %v3266_v37, inf  ;;  %v3313_v6 = vsel %vm3312_vm3, %v3308_v29, inf  ;;  %v3285_v56 = vsel %vm3284_vm4, %v3280_v4, inf  ;;  %v7394_v51 = vld [vmem:[#allocation84_spill] sm:$0xff] }
 0x371   :  { %v3797_v57 = vsel %vm3779_vm13, %v2953_v23, 0.0  ;;  %vm3354_vm5 = vcmp.eq.f32.partialorder %v7394_v51, %v6794_v1 }
 0x372   :  { %v3798_v13 = vadd.f32 %v3797_v57, %v3796_v41  ;;  %v6816_v23 = vpop.xlane.xlu0 %2578 }
 0x373   :  { %3300 = vmin.xlane.f32.xlu1 %v3299_v3  ;;  %v3350_v3 = vcvt.s32.f32 %v3348_v43  ;;  %v7397_v43 = vld [vmem:[#allocation56_spill] sm:$0xff] }
 0x374   :  { %v2553_v17 = vpop.xlane.xlu1 %2552  ;;  %v3800_v14 = vadd.f32 %v3799_v10, %v3798_v13  ;;  %v7395_v13 = vld [vmem:[#allocation85_spill] sm:$0xff]  ;;  %v5167_v10 = vpop.eup %5166 }
 0x375   :  { %5168 = vlog2.f32 %v2553_v17  ;;  %v3320_v33 = vand.u32 65535, %v7395_v13  ;;  %v3355_v60 = vsel %vm3354_vm5, %v3350_v3, inf  ;;  %v7399_v3 = vld [vmem:[#allocation89_spill] sm:$0xff] }
 0x376   :  { %v6808_v48 = vadd.f32 %v3801_v46, %v3800_v14  ;;  %5170 = vlog2.f32 %v6746_v63  ;;  %v6826_v12 = vpop.xlane.xlu0 %2574  ;;  %v3362_v14 = vand.u32 65535, %v6504_v58  ;;  %v2615_v46 = vmul.f32 0.6931472, %v5167_v10  ;;  %v7400_v10 = vld [vmem:[#allocation76_spill] sm:$0xff] }
 0x377   :  { %3272 = vmin.xlane.f32.xlu1 %v3271_v15  ;;  %5172 = vlog2.f32 %v2557_v45  ;;  %v3322_v37 = vcvt.s32.f32 %v3320_v33 }
 0x378   :  { %v6811_v27 = vpop.xlane.xlu1 %3324  ;;  %5174 = vlog2.f32 %v6777_v55  ;;  %v3364_v29 = vcvt.s32.f32 %v3362_v14  ;;  %v2666_v4 = vadd.f32 %v2615_v46, %v7397_v43  ;;  %v7401_v46 = vld [vmem:[#allocation92_spill] sm:$0xff] }
 0x379   :  { %vm3326_vm6 = vcmp.eq.f32.partialorder %v6512_v24, %v6811_v27  ;;  %v7396_v24 = vld [vmem:[#allocation88_spill] sm:$0xff] }
 0x37a   :  { %v6831_v15 = vpop.xlane.xlu0 %2582  ;;  %v3327_v32 = vsel %vm3326_vm6, %v3322_v37, inf }
 0x37b   :  { %3314 = vmin.xlane.f32.xlu1 %v3313_v6  ;;  %v3334_v6 = vand.u32 65535, %v7396_v24 }
 0x37c   :  { %v6818_v41 = vpop.xlane.xlu1 %3366 }
 0x37d   :  { %vm3368_vm7 = vcmp.eq.f32.partialorder %v6521_v21, %v6818_v41  ;;  %v3336_v33 = vcvt.s32.f32 %v3334_v6  ;;  %v3404_v21 = vand.u32 65535, %v6530_v35  ;;  %v7402_v35 = vld [vmem:[#allocation93_spill] sm:$0xff] }
 0x37e   :  { %v3369_v58 = vsel %vm3368_vm7, %v3364_v29, inf  ;;  %v6843_v55 = vpop.xlane.xlu0 %2586  ;;  %v3376_v6 = vand.u32 65535, %v7402_v35 }
 0x37f   :  { %3286 = vmin.xlane.f32.xlu1 %v3285_v56  ;;  %v7398_v56 = vld [vmem:[#allocation59_spill] sm:$0xff]  ;;  %v3406_v24 = vcvt.s32.f32 %v3404_v21  ;;  %v7404_v21 = vld [vmem:[#allocation94_spill] sm:$0xff] }
 0x380   :  { %v6823_v57 = vpop.xlane.xlu1 %3338 }
 0x381   :  { %vm3340_vm8 = vcmp.eq.f32.partialorder %v7399_v3, %v6823_v57 }
 0x382   :  { %v5169_v63 = vpop.eup %5168  ;;  %v3341_v37 = vsel %vm3340_vm8, %v3336_v33, inf }
 0x383   :  { %3356 = vmin.xlane.f32.xlu1 %v3355_v60  ;;  %v2617_v54 = vmul.f32 0.6931472, %v5169_v63  ;;  %v5171_v30 = vpop.eup %5170  ;;  %v2956_v63 = vsub.f32 %v2666_v4, %v7400_v10 }
 0x384   :  { %v2565_v17 = vpop.xlane.xlu1 %2564  ;;  %v2619_v60 = vmul.f32 0.6931472, %v5171_v30  ;;  %v7403_v30 = vld [vmem:[#allocation53_spill] sm:$0xff] }
 0x385   :  { %v2667_v51 = vadd.f32 %v2617_v54, %v7398_v56  ;;  %v3803_v4 = vsel %vm3779_vm13, %v2956_v63, 0.0 }
 0x386   :  { %v2668_v43 = vadd.f32 %v2619_v60, %v7403_v30  ;;  %v3804_v33 = vadd.f32 %v3803_v4, %v6808_v48  ;;  %v3418_v60 = vand.u32 65535, %v7404_v21  ;;  %v3390_v48 = vand.u32 65535, %v6572_v62 }
 0x387   :  { %3328 = vmin.xlane.f32.xlu1 %v3327_v32  ;;  %v2957_v14 = vsub.f32 %v2667_v51, %v6564_v16  ;;  %v5173_v32 = vpop.eup %5172  ;;  %v6851_v54 = vpop.xlane.xlu0 %3076 }
 0x388   :  { %v6836_v45 = vpop.xlane.xlu1 %3408  ;;  %v2621_v16 = vmul.f32 0.6931472, %v5173_v32  ;;  %v5175_v56 = vpop.eup %5174  ;;  %v2958_v10 = vsub.f32 %v2668_v43, %v6582_v40  ;;  %v3392_v62 = vcvt.s32.f32 %v3390_v48 }
 0x389   :  { %vm3410_vm9 = vcmp.eq.f32.partialorder %v7401_v46, %v6836_v45 }
 0x38a   :  { %v3807_v35 = vsel %vm3779_vm13, %v2958_v10, 0.0 }
 0x38b   :  { %3370 = vmin.xlane.f32.xlu1 %v3369_v58  ;;  %v3411_v58 = vsel %vm3410_vm9, %v3406_v24, inf  ;;  %v3420_v24 = vcvt.s32.f32 %v3418_v60 }
 0x38c   :  { %v2561_v13 = vpop.xlane.xlu1 %2560 }
 0x38d   :  { %5176 = vlog2.f32 %v2561_v13  ;;  %v3378_v13 = vcvt.s32.f32 %v3376_v6 }
 0x38e   :  { %5178 = vlog2.f32 %v6767_v28  ;;  %v3805_v28 = vsel %vm3779_vm13, %v2957_v14, 0.0 }
 0x38f   :  { %3342 = vmin.xlane.f32.xlu1 %v3341_v37  ;;  %5180 = vlog2.f32 %v2565_v17  ;;  %v3806_v63 = vadd.f32 %v3805_v28, %v3804_v33  ;;  %v2623_v37 = vmul.f32 0.6931472, %v5175_v56 }
 0x390   :  { %v6853_v29 = vpop.xlane.xlu1 %3380  ;;  %5182 = vlog2.f32 %v6804_v59 }
 0x391   :  { %vm3382_vm10 = vcmp.eq.f32.partialorder %v6568_v38, %v6853_v29  ;;  %v7405_v38 = vld [vmem:[#allocation54_spill] sm:$0xff]  ;;  %v3808_v30 = vadd.f32 %v3807_v35, %v3806_v63  ;;  %5184 = vlog2.f32 %v6791_v50 }
 0x392   :  { %v3383_v17 = vsel %vm3382_vm10, %v3378_v13, inf  ;;  %v2669_v14 = vadd.f32 %v2621_v16, %v7405_v38 }
 0x393   :  { %3412 = vmin.xlane.f32.xlu1 %v3411_v58 }
 0x394   :  { %v6861_v51 = vpop.xlane.xlu0 %3062  ;;  %v6863_v3 = vpop.xlane.xlu1 %3422 }
 0x395   :  { %vm3424_vm11 = vcmp.eq.f32.partialorder %v6577_v26, %v6863_v3  ;;  %v7406_v26 = vld [vmem:[#allocation62_spill] sm:$0xff] }
 0x396   :  { %v3425_v43 = vsel %vm3424_vm11, %v3420_v24, inf  ;;  %v2670_v58 = vadd.f32 %v2623_v37, %v7406_v26  ;;  %v3432_v37 = vand.u32 65535, %v6598_v18  ;;  %v3446_v26 = vand.u32 65535, %v6614_v44 }
 0x397   :  { %3384 = vmin.xlane.f32.xlu1 %v3383_v17  ;;  %v7407_v17 = vld [vmem:[#allocation75_spill] sm:$0xff] }
 0x398   :  { %v2911_v46 = vpop.xlane.xlu0 %2910  ;;  %v6872_v32 = vpop.xlane.xlu1 %3394 }
 0x399   :  { %v2959_v40 = vsub.f32 %v2669_v14, %v2911_v46  ;;  %vm3396_vm12 = vcmp.eq.f32.partialorder %v6587_v53, %v6872_v32 }
 0x39a   :  { %v5177_v6 = vpop.eup %5176  ;;  %v3397_v21 = vsel %vm3396_vm12, %v3392_v62, inf }
 0x39b   :  { %v2625_v4 = vmul.f32 0.6931472, %v5177_v6  ;;  %v3809_v59 = vsel %vm3779_vm13, %v2959_v40, 0.0  ;;  %3426 = vmin.xlane.f32.xlu1 %v3425_v43  ;;  %v5179_v16 = vpop.eup %5178  ;;  %v7408_v40 = vld [vmem:[#allocation60_spill] sm:$0xff] }
 0x39c   :  { %v3810_v28 = vadd.f32 %v3809_v59, %v3808_v30  ;;  %v2913_v56 = vpop.xlane.xlu0 %2912  ;;  %v2573_v13 = vpop.xlane.xlu1 %2572  ;;  %v2627_v60 = vmul.f32 0.6931472, %v5179_v16 }
 0x39d   :  { %v2960_v33 = vsub.f32 %v2670_v58, %v2913_v56  ;;  %v2671_v63 = vadd.f32 %v2625_v4, %v7407_v17  ;;  %v5181_v38 = vpop.eup %5180  ;;  %v3434_v4 = vcvt.s32.f32 %v3432_v37  ;;  %v7409_v56 = vld [vmem:[#allocation71_spill] sm:$0xff] }
 0x39e   :  { %v2629_v35 = vmul.f32 0.6931472, %v5181_v38  ;;  %v2672_v6 = vadd.f32 %v2627_v60, %v7408_v40  ;;  %v5183_v50 = vpop.eup %5182  ;;  %v3460_v60 = vand.u32 65535, %v6626_v5 }
 0x39f   :  { %v3811_v10 = vsel %vm3779_vm13, %v2960_v33, 0.0  ;;  %3398 = vmin.xlane.f32.xlu1 %v3397_v21  ;;  %v2631_v16 = vmul.f32 0.6931472, %v5183_v50  ;;  %v3448_v21 = vcvt.s32.f32 %v3446_v26 }
 0x3a0   :  { %v2915_v53 = vpop.xlane.xlu0 %2914  ;;  %v2569_v14 = vpop.xlane.xlu1 %2568  ;;  %v3812_v24 = vadd.f32 %v3811_v10, %v3810_v28 }
 0x3a1   :  { %v2961_v46 = vsub.f32 %v2671_v63, %v2915_v53  ;;  %5186 = vlog2.f32 %v2569_v14  ;;  %v7410_v63 = vld [vmem:[#allocation67_spill] sm:$0xff]  ;;  %v5185_v53 = vpop.eup %5184 }
 0x3a2   :  { %5188 = vlog2.f32 %v2573_v13  ;;  %v2673_v13 = vadd.f32 %v2629_v35, %v7409_v56  ;;  %v2674_v38 = vadd.f32 %v2631_v16, %v7410_v63 }
 0x3a3   :  { %v3813_v48 = vsel %vm3779_vm13, %v2961_v46, 0.0  ;;  %5190 = vlog2.f32 %v6826_v12 }
 0x3a4   :  { %v3814_v30 = vadd.f32 %v3813_v48, %v3812_v24  ;;  %v2917_v43 = vpop.xlane.xlu0 %2916  ;;  %v6886_v59 = vpop.xlane.xlu1 %3436  ;;  %v3462_v24 = vcvt.s32.f32 %v3460_v60  ;;  %v2635_v48 = vmul.f32 0.6931472, %v5185_v53  ;;  %5192 = vlog2.f32 %v6816_v23 }
 0x3a5   :  { %v2962_v58 = vsub.f32 %v2672_v6, %v2917_v43  ;;  %vm3438_vm14 = vcmp.eq.f32.partialorder %v6622_v47, %v6886_v59  ;;  %v7411_v43 = vld [vmem:[#allocation83_spill] sm:$0xff] }
 0x3a6   :  { %v3439_v18 = vsel %vm3438_vm14, %v3434_v4, inf }
 0x3a7   :  { %v3815_v28 = vsel %vm3779_vm13, %v2962_v58, 0.0  ;;  %3440 = vmin.xlane.f32.xlu1 %v3439_v18  ;;  %v7412_v18 = vld [vmem:[#allocation65_spill] sm:$0xff] }
 0x3a8   :  { %v2919_v62 = vpop.xlane.xlu0 %2918  ;;  %v6893_v33 = vpop.xlane.xlu1 %3450  ;;  %v3816_v44 = vadd.f32 %v3815_v28, %v3814_v30  ;;  %v2676_v16 = vadd.f32 %v2635_v48, %v7412_v18 }
 0x3a9   :  { %v2963_v10 = vsub.f32 %v2673_v13, %v2919_v62  ;;  %vm3452_vm15 = vcmp.eq.f32.partialorder %v6635_v19, %v6893_v33  ;;  %v3474_v13 = vand.u32 65535, %v6653_v25 }
 0x3aa   :  { %v3453_v17 = vsel %vm3452_vm15, %v3448_v21, inf }
 0x3ab   :  { %v3817_v47 = vsel %vm3779_vm13, %v2963_v10, 0.0  ;;  %3454 = vmin.xlane.f32.xlu1 %v3453_v17  ;;  %v7413_v10 = vld [vmem:[#allocation81_spill] sm:$0xff] }
 0x3ac   :  { %v3818_v14 = vadd.f32 %v3817_v47, %v3816_v44  ;;  %v2921_v37 = vpop.xlane.xlu0 %2920  ;;  %v6901_v46 = vpop.xlane.xlu1 %3464 }
 0x3ad   :  { %v2964_v5 = vsub.f32 %v2674_v38, %v2921_v37  ;;  %vm3466_vm0 = vcmp.eq.f32.partialorder %v6643_v7, %v6901_v46  ;;  %v3476_v38 = vcvt.s32.f32 %v3474_v13  ;;  %v3064_v13 = vcvt.f32.s32 %v6861_v51 }
 0x3ae   :  { %v5187_v19 = vpop.eup %5186  ;;  %v3467_v35 = vsel %vm3466_vm0, %v3462_v24, inf  ;;  %v3093_v51 = vcvt.f32.s32 %v6566_v2  ;;  %v5216_v2 = vld [vmem:[%s7148_s3] sm:$0xff] }
 0x3af   :  { %v2633_v40 = vmul.f32 0.6931472, %v5187_v19  ;;  %3468 = vmin.xlane.f32.xlu1 %v3467_v35  ;;  %v5189_v12 = vpop.eup %5188  ;;  %v3819_v30 = vsel %vm3779_vm13, %v2964_v5, 0.0  ;;  %v7414_v35 = vld [vmem:[#allocation21_spill] sm:$0xff] }
 0x3b0   :  { %v2923_v6 = vpop.xlane.xlu0 %2922  ;;  %v2581_v50 = vpop.xlane.xlu1 %2580  ;;  %v2637_v26 = vmul.f32 0.6931472, %v5189_v12  ;;  %v3820_v7 = vadd.f32 %v3819_v30, %v3818_v14  ;;  %vm2847_vm2 = vcmp.eq.s32.totalorder %v5856_v9, %v7414_v35  ;;  %v3051_v30 = vcvt.f32.s32 %v6553_v11 }
 0x3b1   :  { %v2675_v4 = vadd.f32 %v2633_v40, %v7411_v43  ;;  %5194 = vlog2.f32 %v2581_v50  ;;  %v5191_v17 = vpop.eup %5190  ;;  %v5215_v40 = vld [vmem:[#allocation7 + $0xf8] sm:$0xff] }
 0x3b2   :  { %v2677_v44 = vadd.f32 %v2637_v26, %v7413_v10  ;;  %v2639_v37 = vmul.f32 0.6931472, %v5191_v17  ;;  %v5193_v48 = vpop.eup %5192  ;;  %v2879_v12 = vsel %vm2847_vm2, %v5215_v40, 0.0  ;;  %v7417_v10 = vld [vmem:[#allocation70_spill] sm:$0xff] }
 0x3b3   :  { %v2965_v58 = vsub.f32 %v2675_v4, %v2923_v6  ;;  %v7415_v6 = vld [vmem:[#allocation72_spill] sm:$0xff]  ;;  %v2643_v26 = vmul.f32 0.6931472, %v5193_v48 }
 0x3b4   :  { %v2925_v28 = vpop.xlane.xlu0 %2924  ;;  %v2577_v56 = vpop.xlane.xlu1 %2576  ;;  %v2678_v50 = vadd.f32 %v2639_v37, %v7415_v6 }
 0x3b5   :  { %v3821_v62 = vsel %vm3779_vm13, %v2965_v58, 0.0  ;;  %v2966_v21 = vsub.f32 %v2676_v16, %v2925_v28  ;;  %5196 = vlog2.f32 %v2577_v56  ;;  %v3065_v16 = vcvt.f32.s32 %v6575_v8 }
 0x3b6   :  { %5198 = vlog2.f32 %v6831_v15  ;;  %v3822_v23 = vadd.f32 %v3821_v62, %v3820_v7  ;;  %v3052_v56 = vshll.u32 %v3051_v30, 16 }
 0x3b7   :  { %v3823_v60 = vsel %vm3779_vm13, %v2966_v21, 0.0 }
 0x3b8   :  { %v2927_v47 = vpop.xlane.xlu0 %2926  ;;  %v6914_v63 = vpop.xlane.xlu1 %3478  ;;  %v3824_v25 = vadd.f32 %v3823_v60, %v3822_v23  ;;  %v7416_v60 = vld [vmem:[#allocation87_spill] sm:$0xff] }
 0x3b9   :  { %v2967_v53 = vsub.f32 %v2677_v44, %v2927_v47  ;;  %vm3480_vm1 = vcmp.eq.f32.partialorder %v6662_v22, %v6914_v63  ;;  %v2680_v44 = vadd.f32 %v2643_v26, %v7417_v10  ;;  %v7418_v47 = vld [vmem:[#allocation91_spill] sm:$0xff] }
 0x3ba   :  { %v3481_v14 = vsel %vm3480_vm1, %v3476_v38, inf  ;;  %v3079_v38 = vcvt.f32.s32 %v7418_v47 }
 0x3bb   :  { %v3825_v24 = vsel %vm3779_vm13, %v2967_v53, 0.0  ;;  %3482 = vmin.xlane.f32.xlu1 %v3481_v14  ;;  %v3066_v53 = vshll.u32 %v3065_v16, 16 }
 0x3bc   :  { %v3826_v15 = vadd.f32 %v3825_v24, %v3824_v25  ;;  %v2929_v5 = vpop.xlane.xlu0 %2928  ;;  %v2585_v19 = vpop.xlane.xlu1 %2584  ;;  %v7419_v24 = vld [vmem:[#allocation86_spill] sm:$0xff]  ;;  %v3080_v30 = vshll.u32 %v3079_v38, 16  ;;  %v3135_v38 = vcvt.f32.s32 %v6607_v39 }
 0x3bd   :  { %5200 = vlog2.f32 %v2585_v19  ;;  %v2968_v58 = vsub.f32 %v2678_v50, %v2929_v5  ;;  %v3067_v19 = vadd.s32 %v3066_v53, %v3064_v13 }
 0x3be   :  { %v5195_v22 = vpop.eup %5194  ;;  %5202 = vlog2.f32 %v6843_v55 }
 0x3bf   :  { %2942 = vadd.xlane.f32.xlu1 %v2879_v12  ;;  %v2645_v9 = vmul.f32 0.6931472, %v5195_v22  ;;  %v3827_v23 = vsel %vm3779_vm13, %v2968_v58, 0.0  ;;  %v3078_v12 = vcvt.f32.s32 %v6851_v54  ;;  %v7420_v58 = vld [vmem:[#allocation78_spill] sm:$0xff]  ;;  %v3107_v54 = vcvt.f32.s32 %v6618_v52 }
 0x3c0   :  { %v2931_v43 = vpop.xlane.xlu0 %2930  ;;  %v6923_v4 = vpop.xlane.xlu1 %2588  ;;  %v3828_v35 = vadd.f32 %v3827_v23, %v3826_v15 }
 0x3c1   :  { %v2681_v5 = vadd.f32 %v2645_v9, %v7419_v24  ;;  %v5217_v9 = vld [vmem:[%s7148_s3 + $0x8] sm:$0xff]  ;;  %v3108_v53 = vshll.u32 %v3107_v54, 16  ;;  %5204 = vlog2.f32 %v6923_v4 }
 0x3c2   :  { %v5197_v18 = vpop.eup %5196  ;;  %vm3489_vm4 = vcmp.eq.s32.totalorder %v3067_v19, %v5217_v9 }
 0x3c3   :  { %v5199_v7 = vpop.eup %5198  ;;  %v2641_v28 = vmul.f32 0.6931472, %v5197_v18 }
 0x3c4   :  { %v2933_v62 = vpop.xlane.xlu0 %2932  ;;  %v3049_v21 = vpop.xlane.xlu1 %3048  ;;  %v2647_v25 = vmul.f32 0.6931472, %v5199_v7  ;;  %v3094_v7 = vshll.u32 %v3093_v51, 16 }
 0x3c5   :  { %v2679_v11 = vadd.f32 %v2641_v28, %v7416_v60  ;;  %v3050_v17 = vcvt.f32.s32 %v3049_v21  ;;  %v2970_v14 = vsub.f32 %v2680_v44, %v2933_v62  ;;  %v3081_v62 = vadd.s32 %v3080_v30, %v3078_v12 }
 0x3c6   :  { %v5343_v60 = vmov 0.0   ;;  %v3136_v30 = vshll.u32 %v3135_v38, 16  ;;  %v5223_v38 = vld [vmem:[%s7148_s3 + $0x38] sm:$0xff] }
 0x3c7   :  { %v2969_v8 = vsub.f32 %v2679_v11, %v2931_v43  ;;  %v3053_v37 = vadd.s32 %v3052_v56, %v3050_v17  ;;  %v2682_v43 = vadd.f32 %v2647_v25, %v7420_v58  ;;  %v3831_v16 = vsel %vm3779_vm13, %v2970_v14, 0.0  ;;  %v5218_v14 = vld [vmem:[%s7148_s3 + $0x10] sm:$0xff]  ;;  %v5220_v58 = vld [vmem:[%s7148_s3 + $0x20] sm:$0xff] }
 0x3c8   :  { %v2935_v48 = vpop.xlane.xlu0 %2934  ;;  %v3091_v40 = vpop.xlane.xlu1 %3090  ;;  %v4213_v44 = vsel %vm3489_vm4, 1.0, %v5343_v60  ;;  %vm3490_vm5 = vcmp.eq.s32.totalorder %v3081_v62, %v5218_v14 }
 0x3c9   :  { %v3829_v6 = vsel %vm3779_vm13, %v2969_v8, 0.0  ;;  %v2971_v50 = vsub.f32 %v2681_v5, %v2935_v48  ;;  %vm3488_vm3 = vcmp.eq.s32.totalorder %v3053_v37, %v5216_v2  ;;  %v3092_v15 = vcvt.f32.s32 %v3091_v40 }
 0x3ca   :  { %v5201_v22 = vpop.eup %5200  ;;  %v3830_v26 = vadd.f32 %v3829_v6, %v3828_v35  ;;  %v4212_v11 = vsel %vm3488_vm3, 1.0, %v5343_v60  ;;  %v3885_v51 = vsel %vm3779_vm13, %v4213_v44, 0.0  ;;  %v4214_v40 = vsel %vm3490_vm5, 1.0, %v5343_v60  ;;  %v5222_v44 = vld [vmem:[%s7148_s3 + $0x28] sm:$0xff] }
 0x3cb   :  { %v2649_v18 = vmul.f32 0.6931472, %v5201_v22  ;;  %v3833_v21 = vsel %vm3779_vm13, %v2971_v50, 0.0  ;;  %v3095_v17 = vadd.s32 %v3094_v7, %v3092_v15  ;;  %v3884_v37 = vsel %vm3779_vm13, %v4212_v11, 0.0 }
 0x3cc   :  { %v3832_v28 = vadd.f32 %v3831_v16, %v3830_v26  ;;  %v2937_v56 = vpop.xlane.xlu0 %2936  ;;  %v3133_v13 = vpop.xlane.xlu1 %3132  ;;  %v3886_v12 = vadd.f32 %v3885_v51, %v3884_v37  ;;  %v3149_v22 = vcvt.f32.s32 %v6605_v42  ;;  %v3121_v26 = vcvt.f32.s32 %v6631_v31 }
 0x3cd   :  { %v2972_v23 = vsub.f32 %v2682_v43, %v2937_v56  ;;  %v2683_v47 = vadd.f32 %v2649_v18, %v6519_v20  ;;  %v5219_v20 = vld [vmem:[%s7148_s3 + $0x18] sm:$0xff]  ;;  %v3134_v39 = vcvt.f32.s32 %v3133_v13  ;;  %v3887_v18 = vsel %vm3779_vm13, %v4214_v40, 0.0  ;;  %v5221_v56 = vld [vmem:[%s7148_s3 + $0x30] sm:$0xff] }
 0x3ce   :  { %v3834_v10 = vadd.f32 %v3833_v21, %v3832_v28  ;;  %vm3491_vm6 = vcmp.eq.s32.totalorder %v3095_v17, %v5219_v20  ;;  %v3888_v15 = vadd.f32 %v3887_v18, %v3886_v12  ;;  %v3150_v9 = vshll.u32 %v3149_v22, 16  ;;  %v7422_v20 = vld [vmem:[#allocation96_spill] sm:$0xff] }
 0x3cf   :  { %v3835_v52 = vsel %vm3779_vm13, %v2972_v23, 0.0  ;;  %v4215_v43 = vsel %vm3491_vm6, 1.0, %v5343_v60  ;;  %v3137_v16 = vadd.s32 %v3136_v30, %v3134_v39  ;;  %v3122_v42 = vshll.u32 %v3121_v26, 16  ;;  %v5224_v26 = vld [vmem:[%s7148_s3 + $0x40] sm:$0xff] }
 0x3d0   :  { %v2939_v25 = vpop.xlane.xlu0 %2938  ;;  %v3105_v8 = vpop.xlane.xlu1 %3104  ;;  %v3836_v19 = vadd.f32 %v3835_v52, %v3834_v10  ;;  %v3889_v28 = vsel %vm3779_vm13, %v4215_v43, 0.0  ;;  %v3163_v10 = vcvt.f32.s32 %v6665_v0  ;;  %v3205_v39 = vcvt.f32.s32 %v7422_v20 }
 0x3d1   :  { %v2973_v24 = vsub.f32 %v2683_v47, %v2939_v25  ;;  %v3106_v5 = vcvt.f32.s32 %v3105_v8  ;;  %vm3494_vm8 = vcmp.eq.s32.totalorder %v3137_v16, %v5221_v56  ;;  %v3890_v23 = vadd.f32 %v3889_v28, %v3888_v15  ;;  %v7421_v25 = vld [vmem:[#allocation95_spill] sm:$0xff] }
 0x3d2   :  { %v4218_v17 = vsel %vm3494_vm8, 1.0, %v5343_v60  ;;  %v3191_v8 = vcvt.f32.s32 %v7421_v25  ;;  %v3164_v37 = vshll.u32 %v3163_v10, 16  ;;  %v3206_v16 = vshll.u32 %v3205_v39, 16 }
 0x3d3   :  { %v3837_v35 = vsel %vm3779_vm13, %v2973_v24, 0.0  ;;  %v3109_v48 = vadd.s32 %v3108_v53, %v3106_v5  ;;  %v3895_v24 = vsel %vm3779_vm13, %v4218_v17, 0.0 }
 0x3d4   :  { %v6960_v6 = vadd.f32 %v3837_v35, %v3836_v19  ;;  %v3147_v50 = vpop.xlane.xlu1 %3146  ;;  %v3192_v40 = vshll.u32 %v3191_v8, 16 }
 0x3d5   :  { %vm3492_vm7 = vcmp.eq.s32.totalorder %v3109_v48, %v5220_v58  ;;  %v3148_v2 = vcvt.f32.s32 %v3147_v50  ;;  %v7423_v50 = vld [vmem:[#allocation24_spill] sm:$0xff] }
 0x3d6   :  { %v4216_v7 = vsel %vm3492_vm7, 1.0, %v5343_v60  ;;  %v3177_v22 = vcvt.f32.s32 %v7423_v50  ;;  %v5228_v50 = vld [vmem:[%s7148_s3 + $0x60] sm:$0xff] }
 0x3d7   :  { %v3891_v13 = vsel %vm3779_vm13, %v4216_v7, 0.0  ;;  %v3151_v62 = vadd.s32 %v3150_v9, %v3148_v2 }
 0x3d8   :  { %v3119_v54 = vpop.xlane.xlu1 %3118  ;;  %v3892_v52 = vadd.f32 %v3891_v13, %v3890_v23  ;;  %v3178_v9 = vshll.u32 %v3177_v22, 16  ;;  %v5226_v23 = vld [vmem:[%s7148_s3 + $0x58] sm:$0xff] }
 0x3d9   :  { %v3120_v31 = vcvt.f32.s32 %v3119_v54  ;;  %vm3495_vm10 = vcmp.eq.s32.totalorder %v3151_v62, %v5223_v38  ;;  %v7424_v62 = vld [vmem:[#allocation28_spill] sm:$0xff] }
 0x3da   :  { %v4219_v51 = vsel %vm3495_vm10, 1.0, %v5343_v60 }
 0x3db   :  { %v3123_v21 = vadd.s32 %v3122_v42, %v3120_v31  ;;  %v3897_v30 = vsel %vm3779_vm13, %v4219_v51, 0.0  ;;  %v5225_v31 = vld [vmem:[%s7148_s3 + $0x50] sm:$0xff] }
 0x3dc   :  { %v3189_v11 = vpop.xlane.xlu1 %3188 }
 0x3dd   :  { %vm3493_vm9 = vcmp.eq.s32.totalorder %v3123_v21, %v5222_v44  ;;  %v3190_v35 = vcvt.f32.s32 %v3189_v11  ;;  %v3219_v21 = vcvt.f32.s32 %v7424_v62  ;;  %v5227_v11 = vld [vmem:[%s7148_s3 + $0x48] sm:$0xff] }
 0x3de   :  { %v4217_v47 = vsel %vm3493_vm9, 1.0, %v5343_v60 }
 0x3df   :  { %v3893_v53 = vsel %vm3779_vm13, %v4217_v47, 0.0  ;;  %v3193_v2 = vadd.s32 %v3192_v40, %v3190_v35  ;;  %v3220_v8 = vshll.u32 %v3219_v21, 16  ;;  %v7427_v40 = vld [vmem:[#allocation23_spill] sm:$0xff] }
 0x3e0   :  { %v3894_v0 = vadd.f32 %v3893_v53, %v3892_v52  ;;  %v3161_v14 = vpop.xlane.xlu1 %3160  ;;  %v7425_v53 = vld [vmem:[#allocation19_spill] sm:$0xff] }
 0x3e1   :  { %v3162_v5 = vcvt.f32.s32 %v3161_v14  ;;  %vm3498_vm12 = vcmp.eq.s32.totalorder %v3193_v2, %v5225_v31  ;;  %v3247_v25 = vcvt.f32.s32 %v7425_v53  ;;  %v5230_v31 = vld [vmem:[%s7148_s3 + $0x78] sm:$0xff] }
 0x3e2   :  { %v3896_v19 = vadd.f32 %v3895_v24, %v3894_v0  ;;  %v4222_v10 = vsel %vm3498_vm12, 1.0, %v5343_v60  ;;  %v7426_v24 = vld [vmem:[#allocation25_spill] sm:$0xff] }
 0x3e3   :  { %v3165_v48 = vadd.s32 %v3164_v37, %v3162_v5  ;;  %v3903_v0 = vsel %vm3779_vm13, %v4222_v10, 0.0  ;;  %v3261_v5 = vcvt.f32.s32 %v7426_v24  ;;  %v3303_v10 = vcvt.f32.s32 %v6748_v36  ;;  %v5232_v36 = vld [vmem:[%s7148_s3 + $0x80] sm:$0xff] }
 0x3e4   :  { %v3203_v12 = vpop.xlane.xlu1 %3202  ;;  %v3898_v43 = vadd.f32 %v3897_v30, %v3896_v19  ;;  %v3289_v24 = vcvt.f32.s32 %v6775_v49  ;;  %v5233_v49 = vld [vmem:[%s7148_s3 + $0x90] sm:$0xff] }
 0x3e5   :  { %vm3496_vm11 = vcmp.eq.s32.totalorder %v3165_v48, %v5224_v26  ;;  %v3204_v58 = vcvt.f32.s32 %v3203_v12  ;;  %v3248_v48 = vshll.u32 %v3247_v25, 16  ;;  %v3233_v12 = vcvt.f32.s32 %v7427_v40 }
 0x3e6   :  { %v4220_v18 = vsel %vm3496_vm11, 1.0, %v5343_v60  ;;  %v3262_v26 = vshll.u32 %v3261_v5, 16 }
 0x3e7   :  { %v3899_v15 = vsel %vm3779_vm13, %v4220_v18, 0.0  ;;  %v3207_v42 = vadd.s32 %v3206_v16, %v3204_v58  ;;  %v3234_v2 = vshll.u32 %v3233_v12, 16 }
 0x3e8   :  { %v3900_v7 = vadd.f32 %v3899_v15, %v3898_v43  ;;  %v3175_v54 = vpop.xlane.xlu1 %3174 }
 0x3e9   :  { %v3176_v28 = vcvt.f32.s32 %v3175_v54  ;;  %vm3499_vm14 = vcmp.eq.s32.totalorder %v3207_v42, %v5226_v23  ;;  %v5229_v54 = vld [vmem:[%s7148_s3 + $0x70] sm:$0xff] }
 0x3ea   :  { %v4223_v52 = vsel %vm3499_vm14, 1.0, %v5343_v60 }
 0x3eb   :  { %v3179_v56 = vadd.s32 %v3178_v9, %v3176_v28  ;;  %v3905_v51 = vsel %vm3779_vm13, %v4223_v52, 0.0  ;;  %v3275_v28 = vcvt.f32.s32 %v6762_v34 }
 0x3ec   :  { %v3245_v13 = vpop.xlane.xlu1 %3244 }
 0x3ed   :  { %vm3497_vm15 = vcmp.eq.s32.totalorder %v3179_v56, %v5227_v11  ;;  %v3246_v19 = vcvt.f32.s32 %v3245_v13  ;;  %v5231_v56 = vld [vmem:[%s7148_s3 + $0x68] sm:$0xff] }
 0x3ee   :  { %v4221_v44 = vsel %vm3497_vm15, 1.0, %v5343_v60 }
 0x3ef   :  { %v3901_v17 = vsel %vm3779_vm13, %v4221_v44, 0.0  ;;  %v3249_v58 = vadd.s32 %v3248_v48, %v3246_v19  ;;  %v3276_v44 = vshll.u32 %v3275_v28, 16  ;;  %v3290_v48 = vshll.u32 %v3289_v24, 16 }
 0x3f0   :  { %v3902_v47 = vadd.f32 %v3901_v17, %v3900_v7  ;;  %v3217_v38 = vpop.xlane.xlu1 %3216 }
 0x3f1   :  { %v3218_v14 = vcvt.f32.s32 %v3217_v38  ;;  %vm3502_vm1 = vcmp.eq.s32.totalorder %v3249_v58, %v5229_v54  ;;  %v3317_v38 = vcvt.f32.s32 %v6769_v61  ;;  %v5235_v58 = vld [vmem:[%s7148_s3 + $0x88] sm:$0xff] }
 0x3f2   :  { %v3904_v37 = vadd.f32 %v3903_v0, %v3902_v47  ;;  %v4226_v13 = vsel %vm3502_vm1, 1.0, %v5343_v60 }
 0x3f3   :  { %v3221_v20 = vadd.s32 %v3220_v8, %v3218_v14  ;;  %v3911_v17 = vsel %vm3779_vm13, %v4226_v13, 0.0  ;;  %v3318_v19 = vshll.u32 %v3317_v38, 16 }
 0x3f4   :  { %v3906_v39 = vadd.f32 %v3905_v51, %v3904_v37  ;;  %v3259_v35 = vpop.xlane.xlu1 %3258  ;;  %v3304_v37 = vshll.u32 %v3303_v10, 16 }
 0x3f5   :  { %vm3500_vm0 = vcmp.eq.s32.totalorder %v3221_v20, %v5228_v50  ;;  %v3260_v22 = vcvt.f32.s32 %v3259_v35 }
 0x3f6   :  { %v4224_v30 = vsel %vm3500_vm0, 1.0, %v5343_v60 }
 0x3f7   :  { %v3907_v43 = vsel %vm3779_vm13, %v4224_v30, 0.0  ;;  %v3263_v15 = vadd.s32 %v3262_v26, %v3260_v22  ;;  %v3331_v30 = vcvt.f32.s32 %v6811_v27  ;;  %v5234_v26 = vld [vmem:[%s7148_s3 + $0x98] sm:$0xff] }
 0x3f8   :  { %v3908_v18 = vadd.f32 %v3907_v43, %v3906_v39  ;;  %v3231_v16 = vpop.xlane.xlu1 %3230 }
 0x3f9   :  { %v3232_v7 = vcvt.f32.s32 %v3231_v16  ;;  %vm3503_vm2 = vcmp.eq.s32.totalorder %v3263_v15, %v5230_v31  ;;  %v3332_v54 = vshll.u32 %v3331_v30, 16 }
 0x3fa   :  { %v4227_v23 = vsel %vm3503_vm2, 1.0, %v5343_v60 }
 0x3fb   :  { %v3235_v9 = vadd.s32 %v3234_v2, %v3232_v7  ;;  %v3913_v53 = vsel %vm3779_vm13, %v4227_v23, 0.0  ;;  %v3359_v7 = vcvt.f32.s32 %v6794_v1  ;;  %v5236_v1 = vld [vmem:[%s7148_s3 + $0xa0] sm:$0xff] }
 0x3fc   :  { %v3301_v42 = vpop.xlane.xlu1 %3300 }
 0x3fd   :  { %vm3501_vm3 = vcmp.eq.s32.totalorder %v3235_v9, %v5231_v56  ;;  %v3302_v25 = vcvt.f32.s32 %v3301_v42  ;;  %v3360_v23 = vshll.u32 %v3359_v7, 16 }
 0x3fe   :  { %v4225_v62 = vsel %vm3501_vm3, 1.0, %v5343_v60 }
 0x3ff   :  { %v3909_v21 = vsel %vm3779_vm13, %v4225_v62, 0.0  ;;  %v3305_v20 = vadd.s32 %v3304_v37, %v3302_v25  ;;  %v5237_v25 = vld [vmem:[%s7148_s3 + $0xb0] sm:$0xff]  ;;  %v5238_v37 = vld [vmem:[%s7148_s3 + $0xa8] sm:$0xff] }
 0x400   :  { %v3910_v11 = vadd.f32 %v3909_v21, %v3908_v18  ;;  %v3273_v34 = vpop.xlane.xlu1 %3272 }
 0x401   :  { %v3274_v52 = vcvt.f32.s32 %v3273_v34  ;;  %vm3506_vm5 = vcmp.eq.s32.totalorder %v3305_v20, %v5233_v49  ;;  %v3345_v34 = vcvt.f32.s32 %v6823_v57  ;;  %v3415_v20 = vcvt.f32.s32 %v6836_v45  ;;  %v5240_v45 = vld [vmem:[%s7148_s3 + $0xc0] sm:$0xff] }
 0x402   :  { %v3912_v47 = vadd.f32 %v3911_v17, %v3910_v11  ;;  %v4230_v43 = vsel %vm3506_vm5, 1.0, %v5343_v60  ;;  %v3373_v11 = vcvt.f32.s32 %v6818_v41  ;;  %v3429_v49 = vcvt.f32.s32 %v6863_v3 }
 0x403   :  { %v3277_v8 = vadd.s32 %v3276_v44, %v3274_v52  ;;  %v3919_v9 = vsel %vm3779_vm13, %v4230_v43, 0.0  ;;  %v3346_v38 = vshll.u32 %v3345_v34, 16  ;;  %v3416_v30 = vshll.u32 %v3415_v20, 16 }
 0x404   :  { %v3914_v0 = vadd.f32 %v3913_v53, %v3912_v47  ;;  %v3315_v14 = vpop.xlane.xlu1 %3314  ;;  %v3374_v47 = vshll.u32 %v3373_v11, 16 }
 0x405   :  { %vm3504_vm4 = vcmp.eq.s32.totalorder %v3277_v8, %v5232_v36  ;;  %v3316_v5 = vcvt.f32.s32 %v3315_v14  ;;  %v3387_v14 = vcvt.f32.s32 %v6853_v29 }
 0x406   :  { %v4228_v51 = vsel %vm3504_vm4, 1.0, %v5343_v60 }
 0x407   :  { %v3915_v61 = vsel %vm3779_vm13, %v4228_v51, 0.0  ;;  %v3319_v40 = vadd.s32 %v3318_v19, %v3316_v5  ;;  %v5239_v51 = vld [vmem:[%s7148_s3 + $0xb8] sm:$0xff] }
 0x408   :  { %v3916_v39 = vadd.f32 %v3915_v61, %v3914_v0  ;;  %v3287_v35 = vpop.xlane.xlu1 %3286 }
 0x409   :  { %v3288_v12 = vcvt.f32.s32 %v3287_v35  ;;  %vm3507_vm6 = vcmp.eq.s32.totalorder %v3319_v40, %v5234_v26 }
 0x40a   :  { %v4231_v2 = vsel %vm3507_vm6, 1.0, %v5343_v60 }
 0x40b   :  { %v3291_v50 = vadd.s32 %v3290_v48, %v3288_v12  ;;  %v3921_v31 = vsel %vm3779_vm13, %v4231_v2, 0.0 }
 0x40c   :  { %v3357_v22 = vpop.xlane.xlu1 %3356 }
 0x40d   :  { %vm3505_vm7 = vcmp.eq.s32.totalorder %v3291_v50, %v5235_v58  ;;  %v3358_v56 = vcvt.f32.s32 %v3357_v22  ;;  %v3401_v58 = vcvt.f32.s32 %v6872_v32 }
 0x40e   :  { %v4229_v18 = vsel %vm3505_vm7, 1.0, %v5343_v60 }
 0x40f   :  { %v3917_v16 = vsel %vm3779_vm13, %v4229_v18, 0.0  ;;  %v3361_v10 = vadd.s32 %v3360_v23, %v3358_v56  ;;  %v3443_v56 = vcvt.f32.s32 %v6886_v59 }
 0x410   :  { %v3918_v15 = vadd.f32 %v3917_v16, %v3916_v39  ;;  %v3329_v27 = vpop.xlane.xlu1 %3328  ;;  %v3388_v39 = vshll.u32 %v3387_v14, 16 }
 0x411   :  { %v3330_v42 = vcvt.f32.s32 %v3329_v27  ;;  %vm3510_vm9 = vcmp.eq.s32.totalorder %v3361_v10, %v5237_v25  ;;  %v3457_v10 = vcvt.f32.s32 %v6893_v33 }
 0x412   :  { %v3920_v28 = vadd.f32 %v3919_v9, %v3918_v15  ;;  %v4234_v24 = vsel %vm3510_vm9, 1.0, %v5343_v60  ;;  %v3430_v15 = vshll.u32 %v3429_v49, 16  ;;  %v3402_v9 = vshll.u32 %v3401_v58, 16  ;;  %v2941_v49 = vpop.xlane.xlu0 %2940 }
 0x413   :  { %v3333_v13 = vadd.s32 %v3332_v54, %v3330_v42  ;;  %v3927_v35 = vsel %vm3779_vm13, %v4234_v24, 0.0 }
 0x414   :  { %v3922_v62 = vadd.f32 %v3921_v31, %v3920_v28  ;;  %v3371_v21 = vpop.xlane.xlu1 %3370  ;;  %v5241_v28 = vld [vmem:[%s7148_s3 + $0xd0] sm:$0xff] }
 0x415   :  { %vm3508_vm8 = vcmp.eq.s32.totalorder %v3333_v13, %v5236_v1  ;;  %v3372_v44 = vcvt.f32.s32 %v3371_v21  ;;  %v5242_v13 = vld [vmem:[%s7148_s3 + $0xd8] sm:$0xff]  ;;  %v3444_v1 = vshll.u32 %v3443_v56, 16 }
 0x416   :  { %v4232_v17 = vsel %vm3508_vm8, 1.0, %v5343_v60 }
 0x417   :  { %v3923_v41 = vsel %vm3779_vm13, %v4232_v17, 0.0  ;;  %v3375_v57 = vadd.s32 %v3374_v47, %v3372_v44 }
 0x418   :  { %v3343_v52 = vpop.xlane.xlu1 %3342  ;;  %v3924_v36 = vadd.f32 %v3923_v41, %v3922_v62  ;;  %v5243_v62 = vld [vmem:[%s7148_s3 + $0xc8] sm:$0xff]  ;;  %v3458_v41 = vshll.u32 %v3457_v10, 16 }
 0x419   :  { %v3344_v53 = vcvt.f32.s32 %v3343_v52  ;;  %vm3511_vm11 = vcmp.eq.s32.totalorder %v3375_v57, %v5239_v51  ;;  %v3471_v57 = vcvt.f32.s32 %v6901_v46  ;;  %v5203_v51 = vpop.eup %5202 }
 0x41a   :  { %v4235_v40 = vsel %vm3511_vm11, 1.0, %v5343_v60 }
 0x41b   :  { %v3347_v8 = vadd.s32 %v3346_v38, %v3344_v53  ;;  %v3929_v43 = vsel %vm3779_vm13, %v4235_v40, 0.0 }
 0x41c   :  { %v3413_v0 = vpop.xlane.xlu1 %3412 }
 0x41d   :  { %vm3509_vm10 = vcmp.eq.s32.totalorder %v3347_v8, %v5238_v37  ;;  %v3414_v50 = vcvt.f32.s32 %v3413_v0  ;;  %v5244_v8 = vld [vmem:[%s7148_s3 + $0xe0] sm:$0xff] }
 0x41e   :  { %v4233_v5 = vsel %vm3509_vm10, 1.0, %v5343_v60 }
 0x41f   :  { %v3925_v19 = vsel %vm3779_vm13, %v4233_v5, 0.0  ;;  %v3417_v27 = vadd.s32 %v3416_v30, %v3414_v50  ;;  %v5245_v5 = vld [vmem:[%s7148_s3 + $0xe8] sm:$0xff]  ;;  %v7428_v30 = vld [vmem:[#allocation80_spill] sm:$0xff] }
 0x420   :  { %v3926_v29 = vadd.f32 %v3925_v19, %v3924_v36  ;;  %v3385_v61 = vpop.xlane.xlu1 %3384  ;;  %v3472_v36 = vshll.u32 %v3471_v57, 16 }
 0x421   :  { %v3386_v48 = vcvt.f32.s32 %v3385_v61  ;;  %vm3514_vm14 = vcmp.eq.s32.totalorder %v3417_v27, %v5241_v28  ;;  %v7429_v27 = vld [vmem:[#allocation90_spill] sm:$0xff] }
 0x422   :  { %v3928_v12 = vadd.f32 %v3927_v35, %v3926_v29  ;;  %v4238_v21 = vsel %vm3514_vm14, 1.0, %v5343_v60  ;;  %v5246_v35 = vld [vmem:[%s7148_s3 + $0xf0] sm:$0xff] }
 0x423   :  { %v3389_v22 = vadd.s32 %v3388_v39, %v3386_v48  ;;  %v3935_v44 = vsel %vm3779_vm13, %v4238_v21, 0.0  ;;  %v2651_v39 = vmul.f32 0.6931472, %v5203_v51 }
 0x424   :  { %v3427_v26 = vpop.xlane.xlu1 %3426  ;;  %v3930_v16 = vadd.f32 %v3929_v43, %v3928_v12  ;;  %v5205_v12 = vpop.eup %5204 }
 0x425   :  { %vm3512_vm12 = vcmp.eq.s32.totalorder %v3389_v22, %v5240_v45  ;;  %v3428_v18 = vcvt.f32.s32 %v3427_v26  ;;  %v3485_v22 = vcvt.f32.s32 %v6914_v63  ;;  %v2684_v26 = vadd.f32 %v2651_v39, %v7428_v30 }
 0x426   :  { %v4236_v2 = vsel %vm3512_vm12, 1.0, %v5343_v60  ;;  %v2653_v58 = vmul.f32 0.6931472, %v5205_v12 }
 0x427   :  { %v3931_v3 = vsel %vm3779_vm13, %v4236_v2, 0.0  ;;  %v3431_v42 = vadd.s32 %v3430_v15, %v3428_v18  ;;  %v2974_v43 = vsub.f32 %v2684_v26, %v2941_v49  ;;  %v3486_v18 = vshll.u32 %v3485_v22, 16 }
 0x428   :  { %v3932_v7 = vadd.f32 %v3931_v3, %v3930_v16  ;;  %v3399_v54 = vpop.xlane.xlu1 %3398  ;;  %v2685_v3 = vadd.f32 %v2653_v58, %v7429_v27 }
 0x429   :  { %v3400_v32 = vcvt.f32.s32 %v3399_v54  ;;  %vm3515_vm15 = vcmp.eq.s32.totalorder %v3431_v42, %v5242_v13  ;;  %v3839_v2 = vsel %vm3779_vm13, %v2974_v43, 0.0  ;;  %v5247_v54 = vld [vmem:[%s7148_s3 + $0xf8] sm:$0xff] }
 0x42a   :  { %v4239_v55 = vsel %vm3515_vm15, 1.0, %v5343_v60  ;;  %v3840_v63 = vadd.f32 %v3839_v2, %v6960_v6 }
 0x42b   :  { %v3403_v31 = vadd.s32 %v3402_v9, %v3400_v32  ;;  %v3937_v47 = vsel %vm3779_vm13, %v4239_v55, 0.0 }
 0x42d   :  { %vm3513_vm0 = vcmp.eq.s32.totalorder %v3403_v31, %v5243_v62 }
 0x42e   :  { %v4237_v23 = vsel %vm3513_vm0, 1.0, %v5343_v60 }
 0x42f   :  { %v3933_v11 = vsel %vm3779_vm13, %v4237_v23, 0.0 }
 0x430   :  { %v3934_v34 = vadd.f32 %v3933_v11, %v3932_v7  ;;  %v3441_v59 = vpop.xlane.xlu1 %3440 }
 0x431   :  { %v3442_v17 = vcvt.f32.s32 %v3441_v59 }
 0x432   :  { %v3936_v52 = vadd.f32 %v3935_v44, %v3934_v34 }
 0x433   :  { %v3445_v38 = vadd.s32 %v3444_v1, %v3442_v17 }
 0x434   :  { %v3938_v53 = vadd.f32 %v3937_v47, %v3936_v52  ;;  %v3455_v25 = vpop.xlane.xlu1 %3454 }
 0x435   :  { %vm3516_vm1 = vcmp.eq.s32.totalorder %v3445_v38, %v5244_v8  ;;  %v3456_v33 = vcvt.f32.s32 %v3455_v25 }
 0x436   :  { %v4240_v0 = vsel %vm3516_vm1, 1.0, %v5343_v60 }
 0x437   :  { %v3939_v14 = vsel %vm3779_vm13, %v4240_v0, 0.0  ;;  %v3459_v37 = vadd.s32 %v3458_v41, %v3456_v33 }
 0x438   :  { %v3940_v4 = vadd.f32 %v3939_v14, %v3938_v53  ;;  %v3469_v24 = vpop.xlane.xlu1 %3468 }
 0x439   :  { %vm3517_vm2 = vcmp.eq.s32.totalorder %v3459_v37, %v5245_v5  ;;  %v3470_v46 = vcvt.f32.s32 %v3469_v24 }
 0x43a   :  { %v4241_v19 = vsel %vm3517_vm2, 1.0, %v5343_v60 }
 0x43b   :  { %v3941_v20 = vsel %vm3779_vm13, %v4241_v19, 0.0  ;;  %v3473_v29 = vadd.s32 %v3472_v36, %v3470_v46 }
 0x43c   :  { %v3942_v61 = vadd.f32 %v3941_v20, %v3940_v4 }
 0x43d   :  { %vm3518_vm3 = vcmp.eq.s32.totalorder %v3473_v29, %v5246_v35 }
 0x43e   :  { %v4242_v48 = vsel %vm3518_vm3, 1.0, %v5343_v60 }
 0x43f   :  { %v3943_v40 = vsel %vm3779_vm13, %v4242_v48, 0.0 }
 0x440   :  { %v3944_v50 = vadd.f32 %v3943_v40, %v3942_v61 }
 0x444   :  { %v3483_v45 = vpop.xlane.xlu1 %3482 }
 0x445   :  { %v3484_v16 = vcvt.f32.s32 %v3483_v45 }
 0x447   :  { %v3487_v15 = vadd.s32 %v3486_v18, %v3484_v16 }
 0x448   :  { %v2943_v7 = vpop.xlane.xlu1 %2942 }
 0x449   :  { %vm3519_vm4 = vcmp.eq.s32.totalorder %v3487_v15, %v5247_v54  ;;  %v2975_v9 = vsub.f32 %v2685_v3, %v2943_v7 }
 0x44a   :  { %v4243_v42 = vsel %vm3519_vm4, 1.0, %v5343_v60 }
 0x44b   :  { %v3841_v32 = vsel %vm3779_vm13, %v2975_v9, 0.0  ;;  %v3945_v28 = vsel %vm3779_vm13, %v4243_v42, 0.0 }
 0x44c   :  { %v3842_v31 = vadd.f32 %v3841_v32, %v3840_v63  ;;  %v3946_v56 = vadd.f32 %v3945_v28, %v3944_v50 }
 0x44e   :  { %3947 = vadd.xlane.f32.xlu1 %v3946_v56  ;;  %3843 = vadd.xlane.f32.xlu0 %v3842_v31 }
 0x44f   :  { %5299 = shalt.err (!%p5296_p0)
}
 0x450   :  { %s5345_s3 = smov 128   ;;  %s5346_s27 = smov 8   ;;  %v7430_v52 = vlaneseq }
 0x451   :  { %3974 = dma.vmem_to_hbm [thread:$0]  %s3969_s25, 4096, %s7149_s4, [#allocation4], %s5345_s3, %s5345_s3, %s5346_s27  }
 0x452   :  { %v3585_v47 = vshrl.u32 %v7430_v52, 7  ;;  %s5347_s4 = smov [#allocation8]  }
 0x453   :  { %s3981_s6 = sshll.u32 %s5347_s4, 4  ;;  %s3982_s6 = int_to_ptr.vmem [resolvable:$true] %s3981_s6 }
 0x454   :  { %vm3957_vm13 = vcmp.eq.s32.totalorder %v3585_v47, 1  ;;  %vm3956_vm5 = vcmp.eq.s32.totalorder %v3585_v47, 0  ;;  %s5308_s1 = scalar_lea.vmem %s3982_s6, 128  ;;  %p5313_p2 = scmp.lt.s32.totalorder %s3982_s6, %s3982_s6 }
 0x455   :  { %p5309_p1 = scmp.ne.s32.totalorder %s3982_s6, %s5308_s1  ;;  %p5314_p3 = scmp.lt.s32.totalorder %s5308_s1, %s5308_s1 }
 0x457   :  { %p5315_p4 = por %p5314_p3, %p5313_p2 }
 0x459   :  { %p5316_p5 = pnand %p5315_p4, %p5309_p1 }
 0x4d7   :  { %v3844_v60 = vpop.xlane.xlu0 %3843  ;;  %v3948_v6 = vpop.xlane.xlu1 %3947 }
 0x4d8   :  { %v3845_v13 = vrot.slane %v3844_v60, 4  ;;  %v3949_v62 = vrot.slane %v3948_v6, 4 }
 0x4da   :  { %v3846_v21 = vadd.f32 %v3845_v13, %v3844_v60  ;;  %v3950_v23 = vadd.f32 %v3949_v62, %v3948_v6 }
 0x4dc   :  { %v3847_v11 = vrot.slane %v3846_v21, 2  ;;  %v3951_v55 = vrot.slane %v3950_v23, 2 }
 0x4de   :  { %v3952_v34 = vadd.f32 %v3951_v55, %v3950_v23  ;;  %v3848_v59 = vadd.f32 %v3847_v11, %v3846_v21 }
 0x4e0   :  { %v3849_v1 = vrot.slane %v3848_v59, 1  ;;  %v3953_v10 = vrot.slane %v3952_v34, 1 }
 0x4e2   :  { %v3850_v44 = vadd.f32 %v3849_v1, %v3848_v59  ;;  %v3954_v17 = vadd.f32 %v3953_v10, %v3952_v34 }
 0x4e4   :  { %4780 = vpush %v3850_v44 }
 0x4e5   :  { %4782 = vpush %v3954_v17 }
 0x515   :  { %s4781_s30 = spop %4780 }
 0x516   :  { %v3960_v38 = vstv %s4781_s30  ;;  %s4783_s0 = spop %4782 }
 0x517   :  { %v3958_v53 = vstv %s4783_s0 }
 0x518   :  { %v3959_v25 = vsel %vm3957_vm13, %v3958_v53, 0.0 }
 0x519   :  { %v3961_v41 = vsel %vm3956_vm5, %v3960_v38, %v3959_v25 }
 0x51a   :  { %3962 = vst [vmem:[#allocation8] sm:$0xff] %v3961_v41 }
 0x51b   :  { %5319 = shalt.err (!%p5316_p5)
}
 0x51c   :  { %3984 = dma.vmem_to_hbm [thread:$0]  %s3982_s6, 128, %s7150_s5, [#allocation9]  }
 0x51d   :  { %5332 = dma.done.wait [#allocation4], 4096  }
 0x51e   :  { %5333 = vsyncadd [#allocation4], 4294963200 }
 0x51f   :  { %5334 = dma.done.wait [#allocation9], 128  }
 0x520   :  { %5335 = vsyncadd [#allocation9], 4294967168 }
 0x521   :  { %3991 = vsyncpa [#allocation3], 1 }
 0x522   :  { %3992 = vsyncpa [#allocation6], 1 }
 0x523   :  { %3993 = vsyncpa [#allocation4], 1 }
 0x524   :  { %3994 = vsyncpa [#allocation9], 1 }

</bundles_post_ra>
